<compile_context>
chip_gen: v7x
topology: tpu7x:2x2x1
jax: 0.10.0
libtpu: 0.0.40
codegen_flags: <defaults>
</compile_context>

<pallas_src>
import jax
import jax.numpy as jnp
from jax.experimental import pallas as pl
from jax.experimental.pallas import tpu as pltpu


def resblock_kernel(x_ref, w1_ref, b1_ref, w2_ref, b2_ref,
                    gamma1_ref, beta1_ref, gamma2_ref, beta2_ref,
                    scalars_ref, o_ref):
    x = x_ref[...]                                   # (TB, D) f32

    gain1 = scalars_ref[0]
    bias1 = scalars_ref[1]
    gain2 = scalars_ref[2]
    bias2 = scalars_ref[3]

    # ---- norm1: Affine (SMEM scalars), cast to bf16 for the MXU ----
    h = (x * gain1 + bias1).astype(jnp.bfloat16)

    # ---- layer1: Linear (bf16 MXU, f32 accumulate) ----
    h = jnp.dot(h, w1_ref[...], preferred_element_type=jnp.float32) + b1_ref[...]

    # ---- act1: Supact (f32 VPU/EUP) ----
    g1 = gamma1_ref[...]                             # (1, D)
    inv1 = jax.nn.sigmoid(beta1_ref[...] * h)
    o1 = (g1 + inv1 * (1.0 - g1)) * h

    # ---- norm2: Affine ----
    h = (o1 * gain2 + bias2).astype(jnp.bfloat16)

    # ---- layer2: Linear ----
    h = jnp.dot(h, w2_ref[...], preferred_element_type=jnp.float32) + b2_ref[...]

    # ---- act2: Supact ----
    g2 = gamma2_ref[...]
    inv2 = jax.nn.sigmoid(beta2_ref[...] * h)
    o2 = (g2 + inv2 * (1.0 - g2)) * h

    # ---- residual skip (nn.Identity, in_size == out_size) ----
    o_ref[...] = o2 + x


def prepare_params(params):
    """Hoisted, call ONCE per parameter set (not per forward).

    Pre-transposes weights to (in, out), casts them to bf16, reshapes the
    per-feature vectors to (1, D) and packs the 4 affine scalars into one
    (4,) f32 SMEM-bound array.
    """
    D = params["w1"].shape[0]
    return {
        "w1": params["w1"].T.astype(jnp.bfloat16),          # (in, out) bf16
        "b1": params["b1"].reshape(1, D).astype(jnp.float32),
        "w2": params["w2"].T.astype(jnp.bfloat16),
        "b2": params["b2"].reshape(1, D).astype(jnp.float32),
        "gamma1": params["gamma1"].reshape(1, D).astype(jnp.float32),
        "beta1": params["beta1"].reshape(1, D).astype(jnp.float32),
        "gamma2": params["gamma2"].reshape(1, D).astype(jnp.float32),
        "beta2": params["beta2"].reshape(1, D).astype(jnp.float32),
        "scalars": jnp.stack([params["gain1"][0], params["bias1"][0],
                              params["gain2"][0], params["bias2"][0]]
                             ).astype(jnp.float32),          # (4,) SMEM
    }


def resblock_forward(x, prepped, *, tb=256):
    """x: (B, D) float32; prepped: output of prepare_params()."""
    B, D = x.shape

    # Batch tiling: TB rows per grid step (TB multiple of 8, or == B).
    TB = min(tb, B)
    if B % TB != 0:
        B_pad = pl.cdiv(B, TB) * TB
        x_in = jnp.pad(x, ((0, B_pad - B), (0, 0)))
    else:
        B_pad = B
        x_in = x
    grid = (B_pad // TB,)

    x_spec = pl.BlockSpec((TB, D), lambda i: (i, 0))
    out_spec = pl.BlockSpec((TB, D), lambda i: (i, 0))
    w_spec = pl.BlockSpec((D, D), lambda i: (0, 0))      # resident across tiles
    vec_spec = pl.BlockSpec((1, D), lambda i: (0, 0))    # resident across tiles
    smem_spec = pl.BlockSpec(memory_space=pltpu.MemorySpace.SMEM)

    args = (x_in,
            prepped["w1"], prepped["b1"], prepped["w2"], prepped["b2"],
            prepped["gamma1"], prepped["beta1"],
            prepped["gamma2"], prepped["beta2"],
            prepped["scalars"])
    in_specs = [x_spec,
                w_spec, vec_spec, w_spec, vec_spec,
                vec_spec, vec_spec, vec_spec, vec_spec,
                smem_spec]

    # Explicit VMEM budget (resident bf16 weights + double-buffered x/out + vecs),
    # with headroom, never below the default and capped for v7x's 64 MiB.
    vmem_needed = (2 * D * D * 2            # two bf16 weight matrices
                   + 2 * 2 * TB * D * 4     # x + out, double-buffered, f32
                   + 8 * D * 4)             # bias/gamma/beta vectors
    vmem_limit = int(min(max(2 * vmem_needed, 32 << 20), 60 << 20))

    cost = pl.CostEstimate(
        flops=4 * B_pad * D * D,            # two (B,D)x(D,D) matmuls
        transcendentals=2 * B_pad * D,      # two sigmoids
        bytes_accessed=2 * B_pad * D * 4 + 2 * D * D * 2 + 8 * D * 4 + 16,
    )

    out = pl.pallas_call(
        resblock_kernel,
        out_shape=jax.ShapeDtypeStruct((B_pad, D), jnp.float32),
        grid=grid,
        in_specs=in_specs,
        out_specs=out_spec,
        compiler_params=pltpu.CompilerParams(
            dimension_semantics=("parallel",),
            vmem_limit_bytes=vmem_limit,
        ),
        cost_estimate=cost,
    )(*args)

    return out[:B] if B_pad != B else out


def resblock_reference(x, params, *, matmul_dtype=jnp.float32):
    """Pure-JAX reference mirroring the PyTorch forward.

    matmul_dtype=bf16 reproduces the kernel's mixed-precision matmul path.
    """
    def linear(h, w, b):
        return jnp.dot(h.astype(matmul_dtype), w.T.astype(matmul_dtype),
                       preferred_element_type=jnp.float32) + b

    def supact(h, gamma, beta):
        inv = jax.nn.sigmoid(beta * h)
        return (gamma + inv * (1.0 - gamma)) * h

    xskip = x                                                  # nn.Identity
    h = x * params["gain1"] + params["bias1"]                  # norm1
    h = linear(h, params["w1"], params["b1"])                  # layer1
    o1 = supact(h, params["gamma1"], params["beta1"])          # act1
    h = o1 * params["gain2"] + params["bias2"]                 # norm2
    h = linear(h, params["w2"], params["b2"])                  # layer2
    o2 = supact(h, params["gamma2"], params["beta2"]) + xskip  # act2 + skip
    return o2


def init_params(key, in_size, out_size):
    assert in_size == out_size, "reachable ResBlock forward requires in_size == out_size"
    ks = jax.random.split(key, 10)
    k = 1.0 / jnp.sqrt(in_size)
    return {
        # nn.Linear weights stored in PyTorch layout (out, in)
        "w1": jax.random.uniform(ks[0], (out_size, in_size), jnp.float32, -k, k),
        "b1": jax.random.uniform(ks[1], (out_size,), jnp.float32, -k, k),
        "w2": jax.random.uniform(ks[2], (out_size, out_size), jnp.float32, -k, k),
        "b2": jax.random.uniform(ks[3], (out_size,), jnp.float32, -k, k),
        # Affine params (module init = ones/zeros; perturbed so the scalar path is exercised)
        "gain1": 1.0 + 0.1 * jax.random.normal(ks[4], (1,), jnp.float32),
        "bias1": 0.1 * jax.random.normal(ks[5], (1,), jnp.float32),
        "gain2": 1.0 + 0.1 * jax.random.normal(ks[6], (1,), jnp.float32),
        "bias2": 0.1 * jax.random.normal(ks[7], (1,), jnp.float32),
        # Supact params (module init = ones/zeros; perturbed)
        "gamma1": 1.0 + 0.1 * jax.random.normal(ks[8], (in_size,), jnp.float32),
        "beta1": 0.1 * jax.random.normal(ks[9], (in_size,), jnp.float32),
        "gamma2": 1.0 + 0.05 * jax.random.normal(ks[8], (in_size,), jnp.float32),
        "beta2": 0.05 * jax.random.normal(ks[9], (in_size,), jnp.float32),
    }


if __name__ == "__main__":
    B, D = 512, 256                     # batch, in_size == out_size (2 batch tiles of 256)
    key = jax.random.PRNGKey(0)
    kx, kp = jax.random.split(key)

    x = jax.random.normal(kx, (B, D), jnp.float32)
    params = init_params(kp, D, D)
    prepped = prepare_params(params)    # hoisted: transpose/cast/reshape once

    out = resblock_forward(x, prepped, tb=256)
    out = jax.block_until_ready(out)

    assert out.shape == (B, D) and out.dtype == jnp.float32

    # Tight check vs a reference that uses the same bf16-matmul / f32-accumulate path.
    ref_bf16 = resblock_reference(x, params, matmul_dtype=jnp.bfloat16)
    assert jnp.allclose(out, ref_bf16, atol=2e-3, rtol=2e-3), \
        float(jnp.max(jnp.abs(out - ref_bf16)))

    # Loose check vs the full-f32 PyTorch-equivalent reference (bf16 matmul tolerance).
    ref_f32 = resblock_reference(x, params, matmul_dtype=jnp.float32)
    assert jnp.allclose(out, ref_f32, atol=1e-1, rtol=1e-1), \
        float(jnp.max(jnp.abs(out - ref_f32)))

    print("KERNEL_OK")
</pallas_src>

<mosaic_0001>
module attributes {stable_mosaic.version = 11 : i64} {
  func.func @resblock_kernel(%arg0: i32, %arg1: memref<256x256xf32, #tpu.memory_space<vmem>>, %arg2: memref<256x256xbf16, #tpu.memory_space<vmem>>, %arg3: memref<1x256xf32, #tpu.memory_space<vmem>>, %arg4: memref<256x256xbf16, #tpu.memory_space<vmem>>, %arg5: memref<1x256xf32, #tpu.memory_space<vmem>>, %arg6: memref<1x256xf32, #tpu.memory_space<vmem>>, %arg7: memref<1x256xf32, #tpu.memory_space<vmem>>, %arg8: memref<1x256xf32, #tpu.memory_space<vmem>>, %arg9: memref<1x256xf32, #tpu.memory_space<vmem>>, %arg10: memref<4xf32, #tpu.memory_space<smem>>, %arg11: memref<256x256xf32, #tpu.memory_space<vmem>>) attributes {dimension_semantics = [#tpu.dimension_semantics<parallel>], iteration_bounds = array<i64: 2>, scalar_prefetch = 0 : i64, scratch_operands = 0 : i64, tpu.core_type = #tpu.core_type<tc>, window_params = [{transform_indices = @transform_0, window_bounds = array<i64: 256, 256>}, {pipeline_mode = #tpu.pipeline_mode<synchronous>, transform_indices = @transform_1, window_bounds = array<i64: 256, 256>}, {pipeline_mode = #tpu.pipeline_mode<synchronous>, transform_indices = @transform_2, window_bounds = array<i64: 1, 256>}, {pipeline_mode = #tpu.pipeline_mode<synchronous>, transform_indices = @transform_3, window_bounds = array<i64: 256, 256>}, {pipeline_mode = #tpu.pipeline_mode<synchronous>, transform_indices = @transform_4, window_bounds = array<i64: 1, 256>}, {pipeline_mode = #tpu.pipeline_mode<synchronous>, transform_indices = @transform_5, window_bounds = array<i64: 1, 256>}, {pipeline_mode = #tpu.pipeline_mode<synchronous>, transform_indices = @transform_6, window_bounds = array<i64: 1, 256>}, {pipeline_mode = #tpu.pipeline_mode<synchronous>, transform_indices = @transform_7, window_bounds = array<i64: 1, 256>}, {pipeline_mode = #tpu.pipeline_mode<synchronous>, transform_indices = @transform_8, window_bounds = array<i64: 1, 256>}, {transform_indices = @transform_9, window_bounds = array<i64: 4>}, {transform_indices = @transform_10, window_bounds = array<i64: 256, 256>}]} {
    %c0 = arith.constant 0 : index
    %c0_0 = arith.constant 0 : index
    %0 = vector.load %arg1[%c0, %c0_0] : memref<256x256xf32, #tpu.memory_space<vmem>>, vector<256x256xf32>
    %c0_1 = arith.constant 0 : index
    %1 = memref.load %arg10[%c0_1] : memref<4xf32, #tpu.memory_space<smem>>
    %c1 = arith.constant 1 : index
    %2 = memref.load %arg10[%c1] : memref<4xf32, #tpu.memory_space<smem>>
    %c2 = arith.constant 2 : index
    %3 = memref.load %arg10[%c2] : memref<4xf32, #tpu.memory_space<smem>>
    %c3 = arith.constant 3 : index
    %4 = memref.load %arg10[%c3] : memref<4xf32, #tpu.memory_space<smem>>
    %5 = vector.broadcast %1 : f32 to vector<256x256xf32>
    %6 = arith.mulf %0, %5 : vector<256x256xf32>
    %7 = vector.broadcast %2 : f32 to vector<256x256xf32>
    %8 = arith.addf %6, %7 : vector<256x256xf32>
    %9 = arith.truncf %8 : vector<256x256xf32> to vector<256x256xbf16>
    %c0_2 = arith.constant 0 : index
    %c0_3 = arith.constant 0 : index
    %10 = vector.load %arg2[%c0_2, %c0_3] : memref<256x256xbf16, #tpu.memory_space<vmem>>, vector<256x256xbf16>
    %cst = arith.constant dense<0.000000e+00> : vector<256x256xf32>
    %11 = tpu.matmul %9, %10, %cst {dimension_numbers = #tpu.dot_dimension_numbers<[1], [0], [0], [1], [0, 0, 1, 1], [], []>} : vector<256x256xbf16>, vector<256x256xbf16>, vector<256x256xf32> -> vector<256x256xf32>
    %c0_4 = arith.constant 0 : index
    %c0_5 = arith.constant 0 : index
    %12 = vector.load %arg3[%c0_4, %c0_5] : memref<1x256xf32, #tpu.memory_space<vmem>>, vector<1x256xf32>
    %13 = vector.broadcast %12 : vector<1x256xf32> to vector<256x256xf32>
    %14 = arith.addf %11, %13 : vector<256x256xf32>
    %c0_6 = arith.constant 0 : index
    %c0_7 = arith.constant 0 : index
    %15 = vector.load %arg6[%c0_6, %c0_7] : memref<1x256xf32, #tpu.memory_space<vmem>>, vector<1x256xf32>
    %c0_8 = arith.constant 0 : index
    %c0_9 = arith.constant 0 : index
    %16 = vector.load %arg7[%c0_8, %c0_9] : memref<1x256xf32, #tpu.memory_space<vmem>>, vector<1x256xf32>
    %17 = vector.broadcast %16 : vector<1x256xf32> to vector<256x256xf32>
    %18 = arith.mulf %17, %14 : vector<256x256xf32>
    %19 = arith.negf %18 : vector<256x256xf32>
    %20 = math.exp %19 : vector<256x256xf32>
    %cst_10 = arith.constant 1.000000e+00 : f32
    %21 = vector.broadcast %cst_10 : f32 to vector<256x256xf32>
    %22 = arith.addf %21, %20 : vector<256x256xf32>
    %23 = arith.divf %21, %22 : vector<256x256xf32>
    %cst_11 = arith.constant 1.000000e+00 : f32
    %24 = vector.broadcast %cst_11 : f32 to vector<1x256xf32>
    %25 = arith.subf %24, %15 : vector<1x256xf32>
    %26 = vector.broadcast %25 : vector<1x256xf32> to vector<256x256xf32>
    %27 = arith.mulf %23, %26 : vector<256x256xf32>
    %28 = vector.broadcast %15 : vector<1x256xf32> to vector<256x256xf32>
    %29 = arith.addf %28, %27 : vector<256x256xf32>
    %30 = arith.mulf %29, %14 : vector<256x256xf32>
    %31 = vector.broadcast %3 : f32 to vector<256x256xf32>
    %32 = arith.mulf %30, %31 : vector<256x256xf32>
    %33 = vector.broadcast %4 : f32 to vector<256x256xf32>
    %34 = arith.addf %32, %33 : vector<256x256xf32>
    %35 = arith.truncf %34 : vector<256x256xf32> to vector<256x256xbf16>
    %c0_12 = arith.constant 0 : index
    %c0_13 = arith.constant 0 : index
    %36 = vector.load %arg4[%c0_12, %c0_13] : memref<256x256xbf16, #tpu.memory_space<vmem>>, vector<256x256xbf16>
    %cst_14 = arith.constant dense<0.000000e+00> : vector<256x256xf32>
    %37 = tpu.matmul %35, %36, %cst_14 {dimension_numbers = #tpu.dot_dimension_numbers<[1], [0], [0], [1], [0, 0, 1, 1], [], []>} : vector<256x256xbf16>, vector<256x256xbf16>, vector<256x256xf32> -> vector<256x256xf32>
    %c0_15 = arith.constant 0 : index
    %c0_16 = arith.constant 0 : index
    %38 = vector.load %arg5[%c0_15, %c0_16] : memref<1x256xf32, #tpu.memory_space<vmem>>, vector<1x256xf32>
    %39 = vector.broadcast %38 : vector<1x256xf32> to vector<256x256xf32>
    %40 = arith.addf %37, %39 : vector<256x256xf32>
    %c0_17 = arith.constant 0 : index
    %c0_18 = arith.constant 0 : index
    %41 = vector.load %arg8[%c0_17, %c0_18] : memref<1x256xf32, #tpu.memory_space<vmem>>, vector<1x256xf32>
    %c0_19 = arith.constant 0 : index
    %c0_20 = arith.constant 0 : index
    %42 = vector.load %arg9[%c0_19, %c0_20] : memref<1x256xf32, #tpu.memory_space<vmem>>, vector<1x256xf32>
    %43 = vector.broadcast %42 : vector<1x256xf32> to vector<256x256xf32>
    %44 = arith.mulf %43, %40 : vector<256x256xf32>
    %45 = arith.negf %44 : vector<256x256xf32>
    %46 = math.exp %45 : vector<256x256xf32>
    %cst_21 = arith.constant 1.000000e+00 : f32
    %47 = vector.broadcast %cst_21 : f32 to vector<256x256xf32>
    %48 = arith.addf %47, %46 : vector<256x256xf32>
    %49 = arith.divf %47, %48 : vector<256x256xf32>
    %cst_22 = arith.constant 1.000000e+00 : f32
    %50 = vector.broadcast %cst_22 : f32 to vector<1x256xf32>
    %51 = arith.subf %50, %41 : vector<1x256xf32>
    %52 = vector.broadcast %51 : vector<1x256xf32> to vector<256x256xf32>
    %53 = arith.mulf %49, %52 : vector<256x256xf32>
    %54 = vector.broadcast %41 : vector<1x256xf32> to vector<256x256xf32>
    %55 = arith.addf %54, %53 : vector<256x256xf32>
    %56 = arith.mulf %55, %40 : vector<256x256xf32>
    %57 = arith.addf %56, %0 : vector<256x256xf32>
    %c0_23 = arith.constant 0 : index
    %c0_24 = arith.constant 0 : index
    %58 = vector.load %arg11[%c0_23, %c0_24] : memref<256x256xf32, #tpu.memory_space<vmem>>, vector<256x256xf32>
    tpu.vector_store %arg11[%c0_23, %c0_24], %57 {strides = array<i32>} : memref<256x256xf32, #tpu.memory_space<vmem>>, vector<256x256xf32>,
    return
  }
  func.func @transform_0(%arg0: i32) -> (i32, i32) {
    %c0_i32 = arith.constant 0 : i32
    %c0_i32_0 = arith.constant 0 : i32
    return %arg0, %c0_i32 : i32, i32
  }
  func.func @transform_1(%arg0: i32) -> (i32, i32) {
    %c0_i32 = arith.constant 0 : i32
    %c0_i32_0 = arith.constant 0 : i32
    %c0_i32_1 = arith.constant 0 : i32
    return %c0_i32, %c0_i32_0 : i32, i32
  }
  func.func @transform_2(%arg0: i32) -> (i32, i32) {
    %c0_i32 = arith.constant 0 : i32
    %c0_i32_0 = arith.constant 0 : i32
    %c0_i32_1 = arith.constant 0 : i32
    return %c0_i32, %c0_i32_0 : i32, i32
  }
  func.func @transform_3(%arg0: i32) -> (i32, i32) {
    %c0_i32 = arith.constant 0 : i32
    %c0_i32_0 = arith.constant 0 : i32
    %c0_i32_1 = arith.constant 0 : i32
    return %c0_i32, %c0_i32_0 : i32, i32
  }
  func.func @transform_4(%arg0: i32) -> (i32, i32) {
    %c0_i32 = arith.constant 0 : i32
    %c0_i32_0 = arith.constant 0 : i32
    %c0_i32_1 = arith.constant 0 : i32
    return %c0_i32, %c0_i32_0 : i32, i32
  }
  func.func @transform_5(%arg0: i32) -> (i32, i32) {
    %c0_i32 = arith.constant 0 : i32
    %c0_i32_0 = arith.constant 0 : i32
    %c0_i32_1 = arith.constant 0 : i32
    return %c0_i32, %c0_i32_0 : i32, i32
  }
  func.func @transform_6(%arg0: i32) -> (i32, i32) {
    %c0_i32 = arith.constant 0 : i32
    %c0_i32_0 = arith.constant 0 : i32
    %c0_i32_1 = arith.constant 0 : i32
    return %c0_i32, %c0_i32_0 : i32, i32
  }
  func.func @transform_7(%arg0: i32) -> (i32, i32) {
    %c0_i32 = arith.constant 0 : i32
    %c0_i32_0 = arith.constant 0 : i32
    %c0_i32_1 = arith.constant 0 : i32
    return %c0_i32, %c0_i32_0 : i32, i32
  }
  func.func @transform_8(%arg0: i32) -> (i32, i32) {
    %c0_i32 = arith.constant 0 : i32
    %c0_i32_0 = arith.constant 0 : i32
    %c0_i32_1 = arith.constant 0 : i32
    return %c0_i32, %c0_i32_0 : i32, i32
  }
  func.func @transform_9(%arg0: i32) -> i32 {
    %c0_i32 = arith.constant 0 : i32
    %c0_i32_0 = arith.constant 0 : i32
    return %c0_i32 : i32
  }
  func.func @transform_10(%arg0: i32) -> (i32, i32) {
    %c0_i32 = arith.constant 0 : i32
    %c0_i32_0 = arith.constant 0 : i32
    return %arg0, %c0_i32 : i32, i32
  }
}

</mosaic_0001>

<bundles_post_ra>
// kernel: tpu_custom_call.1
= control target key start
LH: loop header
LB: loop body
LE: loop exit
PB: predicated region body
PF: predicated region fallthrough
CT: control target
= control target key end

     0   :  { %s6748_s0 = inlined_call_operand.hbm [shape: f32[512,256], index: 0, kind: input, shape index: {}]   ;;  %s6749_s1 = inlined_call_operand.hbm [shape: bf16[256,256], index: 1, kind: input, shape index: {}]   ;;  %s6750_s2 = inlined_call_operand.vmem [shape: f32[1,256], index: 2, kind: input, shape index: {}]   ;;  %s6751_s3 = inlined_call_operand.hbm [shape: bf16[256,256], index: 3, kind: input, shape index: {}]   ;;  %s6752_s4 = inlined_call_operand.vmem [shape: f32[1,256], index: 4, kind: input, shape index: {}]   ;;  %s6753_s5 = inlined_call_operand.vmem [shape: f32[1,256], index: 5, kind: input, shape index: {}]   ;;  %s6754_s6 = inlined_call_operand.vmem [shape: f32[1,256], index: 6, kind: input, shape index: {}]   ;;  %s6755_s7 = inlined_call_operand.vmem [shape: f32[1,256], index: 7, kind: input, shape index: {}]   ;;  %s6756_s8 = inlined_call_operand.vmem [shape: f32[1,256], index: 8, kind: input, shape index: {}]   ;;  %s6757_s9 = inlined_call_operand.vmem [shape: f32[4], index: 9, kind: input, shape index: {}]   ;;  %s6758_s10 = inlined_call_operand.hbm [shape: f32[512,256], index: 10, kind: output, shape index: {}]  }
   0x1   :  { %6774 = sst [smem:[#allocation23_spill]] %s6757_s9 }
   0x2   :  { %6775 = sst [smem:[#allocation24_spill]] %s6758_s10 }
   0x3   :  { %15 = vsyncpa [#allocation3], 0 }
   0x4   :  { %17 = vsyncpa [#allocation3 + $0x1], 0 }
   0x5   :  { %18 = vsyncpa [#allocation7], 0 }
   0x6   :  { %19 = vsyncpa [#allocation5], 0 }
   0x7   :  { %20 = vsyncpa [#allocation4], 0 }
   0x8   :  { %22 = vsyncpa [#allocation4 + $0x1], 0  ;;  %s4428_s13 = smov 0   ;;  %s4430_s14 = smov 0  }
   0x9   :  { %s4432_s15 = smov 0   ;;  %s4434_s16 = smov 0  }
   0xa LB: > { %6776 = sst [smem:[#allocation15_spill]] %s4348_s13  ;;  %s4449_s17 = sadd.s32 4294967295, %s4360_s16   ;;  %s4360_s16 = sphi %s4434_s16, %s6843_s16   ;;  %s4356_s15 = sphi %s4432_s15, %s6842_s15   ;;  %s4352_s14 = sphi %s4430_s14, %s6841_s14   ;;  %s4348_s13 = sphi %s4428_s13, %s6840_s13  }
   0xb   : > { %s3209_s18 = sadd.s32 4294967294, %s4360_s16   ;;  %p48_p0 = scmp.ne.s32.totalorder %s4352_s14, %s4348_s13 }
   0xc   : > { %p6760_p1 = scmp.eq.s32.totalorder %s4449_s17, 0  ;;  %p267_p3 = scmp.eq.s32.totalorder %s3209_s18, 1 }
   0xd   : > { %p3210_p5 = scmp.ge.s32.totalorder %s4360_s16, 1  ;;  %p274_p7 = scmp.lt.s32.totalorder %s4360_s16, 3 }
   0xe   : > { %p4458_p4 = por %p6760_p1, %p48_p0  ;;  %p4463_p6 = por %p267_p3, %p48_p0 }
   0xf   : > { %p4468_p8 = pnand %p3210_p5, %p274_p7  ;;  %s4362_s22 = smov [#allocation6]  }
  0x10   : > { %s6777_s19 = scalar_select %p4458_p4, 1, 0 }
  0x11   : > { %s6778_s20 = scalar_select %p4463_p6, 1, 0 }
  0x12   : > { %s286_s23 = sshll.u32 %s4362_s22, 4  ;;  %p3446_p9 = pneg %p4468_p8  ;;  %s4472_s23 = int_to_ptr.vmem [resolvable:$true] %s286_s23 }
  0x13   : > { %6779 = sst [smem:[#allocation16_spill]] %s6778_s20  ;;  %s4363_s25 = smov [#allocation8]  }
  0x14   : > { %p4479_p11 = pnand %p3446_p9, %p6760_p1  ;;  %s302_s26 = sshll.u32 %s4363_s25, 4  ;;  %s4483_s26 = int_to_ptr.vmem [resolvable:$true] %s302_s26 }
  0x15   : > { %s6782_s9 = sld [smem:[#allocation23_spill]]  ;;  %s4185_s12 = scalar_lea.hbm %s6749_s1, 4096 }
  0x16   : > { %p4186_p12 = scmp.ne.s32.totalorder %s6749_s1, %s4185_s12  ;;  %p4498_p13 = pneg %p4479_p11 }
  0x17   : > { %p4192_p5 = scmp.lt.u32.totalorder %s4185_s12, %s6749_s1 }
  0x18   : > { %p4188_p0 = pnand %p4498_p13, %p4186_p12 }
  0x1a   : > { %p4189_p3 = pneg %p4188_p0 }
  0x1b   : > { %s331_s29 = sshll.u32 %s6782_s9, 4  ;;  %s4488_s29 = int_to_ptr.vmem [resolvable:$true] %s331_s29 }
  0x1c   : > { %p4194_p7 = pnand %p4192_p5, %p4189_p3 }
  0x1e   : > { %4197 = shalt.err (!%p4194_p7)
}
  0x1f   : > { %s4198_s28 = scalar_lea.vmem %s4472_s23, 4096  ;;  %p4206_p2 = scmp.lt.s32.totalorder %s4472_s23, %s4472_s23 }
  0x20   : > { %p4199_p9 = scmp.ne.s32.totalorder %s4472_s23, %s4198_s28  ;;  %p4207_p6 = scmp.lt.s32.totalorder %s4198_s28, %s4198_s28 }
  0x22   : > { %p4201_p10 = pnand %p4199_p9, %p4498_p13  ;;  %p4208_p12 = por %p4207_p6, %p4206_p2 }
  0x24   : > { %p4202_p1 = pneg %p4201_p10 }
  0x26   : > { %p4209_p0 = pnand %p4208_p12, %p4202_p1 }
  0x28   : > { %4212 = shalt.err (!%p4209_p0)
}
  0x29   : > { %s4364_s30 = smov 128   ;;  %s4365_s11 = smov 8  }
  0x2a   : > { %3449 = dma.hbm_to_vmem [thread:$0]  (!%p4479_p11), %s6749_s1, 4096, %s4472_s23, [#allocation7], %s4364_s30, %s4364_s30, %s4365_s11  }
  0x2b   : > { %s4213_s27 = scalar_lea.hbm %s6751_s3, 4096 }
  0x2c   : > { %p4214_p2 = scmp.ne.s32.totalorder %s6751_s3, %s4213_s27  ;;  %p4220_p10 = scmp.lt.u32.totalorder %s4213_s27, %s6751_s3 }
  0x2e   : > { %p4216_p1 = pnand %p4214_p2, %p4498_p13 }
  0x30   : > { %p4217_p6 = pneg %p4216_p1 }
  0x32   : > { %p4222_p3 = pnand %p4220_p10, %p4217_p6 }
  0x34   : > { %4225 = shalt.err (!%p4222_p3)
}
  0x35   : > { %s4226_s23 = scalar_lea.vmem %s4483_s26, 4096  ;;  %p4234_p12 = scmp.lt.s32.totalorder %s4483_s26, %s4483_s26 }
  0x36   : > { %p4227_p5 = scmp.ne.s32.totalorder %s4483_s26, %s4226_s23  ;;  %p4235_p0 = scmp.lt.s32.totalorder %s4226_s23, %s4226_s23 }
  0x38   : > { %p4229_p7 = pnand %p4227_p5, %p4498_p13  ;;  %p4236_p2 = por %p4235_p0, %p4234_p12 }
  0x3a   : > { %p4230_p9 = pneg %p4229_p7 }
  0x3c   : > { %p4237_p1 = pnand %p4236_p2, %p4230_p9 }
  0x3e   : > { %4240 = shalt.err (!%p4237_p1)
}
  0x3f   : > { %3452 = dma.hbm_to_vmem [thread:$0]  (!%p4479_p11), %s6751_s3, 4096, %s4483_s26, [#allocation7], %s4364_s30, %s4364_s30, %s4365_s11  }
  0x40   : > { %s4241_s13 = scalar_lea.vmem %s4488_s29, 16  ;;  %p4249_p5 = scmp.lt.s32.totalorder %s4488_s29, %s4488_s29 }
  0x41   : > { %p4242_p6 = scmp.ne.s32.totalorder %s4488_s29, %s4241_s13  ;;  %p4250_p7 = scmp.lt.s32.totalorder %s4241_s13, %s4241_s13 }
  0x43   : > { %p4244_p10 = pnand %p4242_p6, %p4498_p13  ;;  %p4251_p9 = por %p4250_p7, %p4249_p5 }
  0x45   : > { %p4245_p3 = pneg %p4244_p10 }
  0x47   : > { %p4252_p12 = pnand %p4251_p9, %p4245_p3 }
  0x49   : > { %4255 = shalt.err (!%p4252_p12)
}
  0x4a   : > { %s4366_s12 = smov [#allocation9]   ;;  %s4552_s20 = sadd.s32 1, %s4360_s16  }
  0x4b   : > { %3455 = dma.vmem_to_smem (!%p4479_p11), %s4488_s29, 16, %s4366_s12, [#allocation5]  }
  0x4c   : > { %s32_s26 = ssub.s32 %s4360_s16, %s4552_s20  ;;  %s35_s30 = sadd.s32 1, %s4356_s15 }
  0x4d   : > { %p33_p13 = scmp.eq.s32.totalorder %s32_s26, 0  ;;  %p42_p0 = scmp.ne.s32.totalorder %s4356_s15, %s4352_s14 }
  0x4e   : > { %p43_p2 = scmp.eq.s32.totalorder %s4360_s16, 0  ;;  %p3467_p1 = scmp.lt.s32.totalorder %s4360_s16, 2 }
  0x4f   : > { %s4562_s24 = scalar_select %p33_p13, %s4356_s15, %s35_s30  }
  0x50   : > { %p44_p6 = por %p43_p2, %p42_p0  ;;  %p6784_p10 = scmp.eq.s32.totalorder %s4449_s17, 1 }
  0x51   : > { %s342_s18 = sand.u32 1, %s4356_s15   ;;  %s3427_s22 = sshll.u32 %s4360_s16, 13 }
  0x52   : > { %p4566_p3 = por %p6784_p10, %p42_p0  ;;  %s3215_s29 = sshll.u32 %s342_s18, 9 }
  0x53   : > { %s4575_s28 = scalar_lea.hbm %s6748_s0, %s3427_s22  ;;  %s346_s23 = scalar_lea.vmem [#allocation2], %s3215_s29 }
  0x54   : > { %s6785_s11 = scalar_select %p4566_p3, 1, 0 }
  0x55   : > { %s354_s9 = sshll.u32 %s346_s23, 4  ;;  %p4577_p11 = pnand %p3467_p1, %p44_p6  ;;  %s4581_s9 = int_to_ptr.vmem [resolvable:$true] %s354_s9 }
  0x56   : > { %s4583_s13 = scalar_lea.sflag [#allocation3], %s342_s18  ;;  %s4256_s12 = scalar_lea.hbm %s4575_s28, 8192 }
  0x57   : > { %p4257_p5 = scmp.ne.s32.totalorder %s4575_s28, %s4256_s12  ;;  %p4258_p7 = pneg %p4577_p11 }
  0x58   : > { %s4261_s22 = scalar_lea.hbm %s6748_s0, 16384  ;;  %p4262_p13 = scmp.lt.u32.totalorder %s4575_s28, %s6748_s0 }
  0x59   : > { %p4259_p9 = pnand %p4258_p7, %p4257_p5  ;;  %p4263_p0 = scmp.lt.u32.totalorder %s4261_s22, %s4256_s12 }
  0x5a   : > { %p4265_p1 = scmp.lt.u32.totalorder %s4256_s12, %s4575_s28 }
  0x5b   : > { %p4260_p12 = pneg %p4259_p9  ;;  %p4264_p2 = por %p4263_p0, %p4262_p13 }
  0x5d   : > { %p4266_p6 = por %p4265_p1, %p4264_p2 }
  0x5f   : > { %p4267_p10 = pnand %p4266_p6, %p4260_p12 }
  0x61   : > { %4270 = shalt.err (!%p4267_p10)
}
  0x62   : > { %s4271_s18 = scalar_lea.vmem %s4581_s9, 8192  ;;  %s4367_s27 = smov [#allocation2]  }
  0x63   : > { %p4272_p5 = scmp.ne.s32.totalorder %s4581_s9, %s4271_s18  ;;  %s4276_s23 = sshll.u32 %s4367_s27, 4  ;;  %s4277_s23 = int_to_ptr.vmem [resolvable:$false] %s4276_s23 }
  0x64   : > { %s4278_s26 = scalar_lea.vmem %s4277_s23, 16384  ;;  %p4279_p4 = scmp.lt.s32.totalorder %s4581_s9, %s4277_s23 }
  0x65   : > { %p4274_p9 = pnand %p4272_p5, %p4258_p7  ;;  %p4280_p13 = scmp.lt.s32.totalorder %s4278_s26, %s4271_s18 }
  0x67   : > { %p4275_p3 = pneg %p4274_p9  ;;  %p4281_p0 = por %p4280_p13, %p4279_p4 }
  0x69   : > { %p4282_p2 = pnand %p4281_p0, %p4275_p3 }
  0x6b   : > { %4285 = shalt.err (!%p4282_p2)
}
  0x6c   : > { %s4368_s12 = smov 256   ;;  %s4369_s30 = smov 16  }
  0x6d   : > { %3459 = dma.hbm_to_vmem [thread:$0]  (!%p4577_p11), %s4575_s28, 8192, %s4581_s9, %s4583_s13, %s4368_s12, %s4368_s12, %s4369_s30  }
  0x6e   : > { %366 = sbr.rel (%p4468_p8) target bundleno = 903 (0x387), region = 60 }
  0x75   : > { %s4614_s22 = sand.u32 1, %s4352_s14   ;;  %p6787_p4 = scmp.ne.s32.totalorder %s6777_s19, 0 }
  0x76   : > { %s3220_s29 = sshll.u32 %s4614_s22, 9  ;;  %s369_s25 = scalar_lea.sflag [#allocation3], %s4614_s22 }
  0x77   : > { %s4620_s18 = scalar_lea.vmem [#allocation2], %s3220_s29 }
  0x78   : > { %4331 = dma.done.wait (%p6787_p4), %s369_s25, 8192  }
  0x79   : > { %4333 = vsyncadd (%p6787_p4), %s369_s25, 4294959104  ;;  %p6788_p3 = scmp.eq.s32.totalorder %s4449_s17, 0 }
  0x7b   : > { %4335 = dma.done.wait (%p6788_p3), [#allocation7], 8192   ;;  %p6789_p8 = pmov %p6788_p3 }
  0x7c   : > { %p6790_p11 = pmov %p6788_p3 }
  0x7d   : > { %4337 = vsyncadd (%p6789_p8), [#allocation7], 4294959104 }
  0x7e   : > { %4339 = dma.done.wait (%p6790_p11), [#allocation5], 16   ;;  %p6791_p7 = pmov %p6788_p3 }
  0x80   : > { %4341 = vsyncadd (%p6791_p7), [#allocation5], 4294967280 }
  0x81   : > { %389 = sfence }
  0x82   : > { %v3513_v0 = vld [vmem:[#allocation6 + $0x4] ss:$8 sps:$4 sm:$0xff]   ;;  %v3515_v1 = vld [vmem:[#allocation6] ss:$8 sps:$4 sm:$0xff]   ;;  %v3516_v2 = vld [vmem:[#allocation6 + $0x14] ss:$8 sps:$4 sm:$0xff]  }
  0x83   : > { %858 = vmatprep.subr.bf16.mxu0 %v3513_v0  ;;  %v3518_v3 = vld [vmem:[#allocation6 + $0x10] ss:$8 sps:$4 sm:$0xff]   ;;  %v3519_v4 = vld [vmem:[#allocation6 + $0x24] ss:$8 sps:$4 sm:$0xff]   ;;  %v3521_v5 = vld [vmem:[#allocation6 + $0x20] ss:$8 sps:$4 sm:$0xff]  }
  0x84   : > { %859 = vmatpush1.bf16.msra.mxu0 %v3515_v1  ;;  %v3522_v6 = vld [vmem:[#allocation6 + $0x34] ss:$8 sps:$4 sm:$0xff]   ;;  %v3524_v7 = vld [vmem:[#allocation6 + $0x30] ss:$8 sps:$4 sm:$0xff]   ;;  %s488_s19 = sld [smem:[#allocation9]]  ;;  %s3225_s21 = sld [smem:[#allocation9 + $0x1]] }
  0x85   : > { %860 = vmatprep.subr.bf16.mxu0 %v3516_v2  ;;  %v3525_v8 = vld [vmem:[#allocation6 + $0x44] ss:$8 sps:$4 sm:$0xff]   ;;  %v3527_v9 = vld [vmem:[#allocation6 + $0x40] ss:$8 sps:$4 sm:$0xff]   ;;  %v3528_v10 = vld [vmem:[#allocation6 + $0x54] ss:$8 sps:$4 sm:$0xff]  }
  0x86   : > { %v3530_v11 = vld [vmem:[#allocation6 + $0x50] ss:$8 sps:$4 sm:$0xff]   ;;  %v3531_v13 = vld [vmem:[#allocation6 + $0x64] ss:$8 sps:$4 sm:$0xff]   ;;  %v3533_v19 = vld [vmem:[#allocation6 + $0x60] ss:$8 sps:$4 sm:$0xff]  }
  0x87   : > { %v425_v14 = vld [vmem:[%s4620_s18 + $0x8] sm:$0xff]  ;;  %v427_v15 = vld [vmem:[%s4620_s18 + $0x18] sm:$0xff]  ;;  %v424_v24 = vld [vmem:[%s4620_s18] sm:$0xff]  ;;  %s5143_s26 = sld [smem:[#allocation9 + $0x2]]  ;;  %s5171_s12 = sld [smem:[#allocation9 + $0x3]] }
  0x88   : > { %861 = vmatpush1.bf16.msra.mxu0 %v3518_v3  ;;  %v3534_v20 = vld [vmem:[#allocation6 + $0x74] ss:$8 sps:$4 sm:$0xff]   ;;  %v3536_v26 = vld [vmem:[#allocation6 + $0x70] ss:$8 sps:$4 sm:$0xff]   ;;  %v429_v27 = vld [vmem:[%s4620_s18 + $0x28] sm:$0xff]  ;;  %s6138_s10 = scalar_lea.vmem [#allocation10], %s3220_s29 }
  0x89   : > { %862 = vmatprep.subr.bf16.mxu0 %v3519_v4  ;;  %v426_v25 = vld [vmem:[%s4620_s18 + $0x10] sm:$0xff]  ;;  %v3537_v28 = vld [vmem:[#allocation6 + $0x84] ss:$8 sps:$4 sm:$0xff]   ;;  %v431_v29 = vld [vmem:[%s4620_s18 + $0x38] sm:$0xff]  ;;  %s3429_s29 = sshll.u32 %s4449_s17, 13  ;;  %s3105_s13 = sshll.u32 %s6138_s10, 4  ;;  %s6701_s13 = int_to_ptr.vmem [resolvable:$true] %s3105_s13 }
  0x8a   : > { %v4634_v12 = vstv %s488_s19  ;;  %v4638_v16 = vstv %s3225_s21  ;;  %v428_v32 = vld [vmem:[%s4620_s18 + $0x20] sm:$0xff]  ;;  %v442_v36 = vld [vmem:[%s4620_s18 + $0x90] sm:$0xff]  ;;  %s3091_s17 = scalar_lea.sflag [#allocation4], %s4614_s22  ;;  %s4286_s30 = scalar_lea.vmem %s6701_s13, 8192 }
  0x8b   : > { %v494_v17 = vmul.f32 %v4634_v12, %v425_v14  ;;  %v496_v18 = vmul.f32 %v4634_v12, %v427_v15  ;;  %v493_v30 = vmul.f32 %v4634_v12, %v424_v24  ;;  %v495_v31 = vmul.f32 %v4634_v12, %v426_v25  ;;  %v3539_v33 = vld [vmem:[#allocation6 + $0x80] ss:$8 sps:$4 sm:$0xff]   ;;  %v430_v38 = vld [vmem:[%s4620_s18 + $0x30] sm:$0xff]  ;;  %v447_v40 = vld [vmem:[%s4620_s18 + $0xb8] sm:$0xff]  ;;  %p4287_p12 = scmp.ne.s32.totalorder %s6701_s13, %s4286_s30  ;;  %p6835_p1 = scmp.ne.s32.totalorder %s6785_s11, 0 }
  0x8c   : > { %863 = vmatpush1.bf16.msra.mxu0 %v3521_v5  ;;  %v498_v34 = vmul.f32 %v4634_v12, %v429_v27  ;;  %v440_v35 = vld [vmem:[%s4620_s18 + $0x80] sm:$0xff]  ;;  %v500_v37 = vmul.f32 %v4634_v12, %v431_v29  ;;  %v445_v39 = vld [vmem:[%s4620_s18 + $0xa8] sm:$0xff]  ;;  %v3540_v41 = vld [vmem:[#allocation6 + $0x94] ss:$8 sps:$4 sm:$0xff]   ;;  %v4659_v42 = vmul.f32 %v4634_v12, %v428_v32  ;;  %v511_v47 = vmul.f32 %v4634_v12, %v442_v36  ;;  %s4370_s25 = smov [#allocation10]  }
  0x8d   : > { %864 = vmatprep.subr.bf16.mxu0 %v3522_v6  ;;  %v559_v21 = vadd.f32 %v4638_v16, %v494_v17  ;;  %v561_v22 = vadd.f32 %v4638_v16, %v496_v18  ;;  %v444_v43 = vld [vmem:[%s4620_s18 + $0xa0] sm:$0xff]  ;;  %v4663_v44 = vadd.f32 %v4638_v16, %v493_v30  ;;  %v4666_v45 = vadd.f32 %v4638_v16, %v495_v31  ;;  %v446_v48 = vld [vmem:[%s4620_s18 + $0xb0] sm:$0xff]  ;;  %v449_v49 = vld [vmem:[%s4620_s18 + $0xc8] sm:$0xff]  ;;  %p4288_p6 = pnand %p4287_p12, %p6835_p1  ;;  %s4290_s19 = sshll.u32 %s4370_s25, 4  ;;  %s4291_s19 = int_to_ptr.vmem [resolvable:$false] %s4290_s19 }
  0x8e   : > { %v509_v46 = vmul.f32 %v4634_v12, %v440_v35  ;;  %v4673_v50 = vadd.f32 %v4638_v16, %v498_v34  ;;  %v4676_v51 = vmul.f32 %v4634_v12, %v430_v38  ;;  %v514_v52 = vmul.f32 %v4634_v12, %v445_v39  ;;  %v451_v54 = vld [vmem:[%s4620_s18 + $0xd8] sm:$0xff]  ;;  %v448_v55 = vld [vmem:[%s4620_s18 + $0xc0] sm:$0xff]  ;;  %v450_v61 = vld [vmem:[%s4620_s18 + $0xd0] sm:$0xff]  ;;  %s4292_s21 = scalar_lea.vmem %s4291_s19, 16384  ;;  %p4293_p5 = scmp.lt.s32.totalorder %s6701_s13, %s4291_s19 }
  0x8f   : > { %v623_v23 = vpack.c.bf16 %v561_v22, %v559_v21  ;;  %v516_v53 = vmul.f32 %v4634_v12, %v447_v40  ;;  %v3542_v56 = vld [vmem:[#allocation6 + $0x90] ss:$8 sps:$4 sm:$0xff]   ;;  %v4683_v57 = vadd.f32 %v4638_v16, %v500_v37  ;;  %v4689_v59 = vadd.f32 %v4638_v16, %v511_v47  ;;  %v3543_v62 = vld [vmem:[#allocation6 + $0xa4] ss:$8 sps:$4 sm:$0xff]   ;;  %v3545_v5 = vld [vmem:[#allocation6 + $0xa0] ss:$8 sps:$4 sm:$0xff]   ;;  %p4289_p10 = pneg %p4288_p6  ;;  %p4294_p9 = scmp.lt.s32.totalorder %s4292_s21, %s4286_s30 }
  0x90   : > { %865 = vmatpush1.bf16.msra.mxu0 %v3524_v7  ;;  %v4686_v58 = vadd.f32 %v4638_v16, %v509_v46  ;;  %v513_v60 = vmul.f32 %v4634_v12, %v444_v43  ;;  %v4694_v63 = vadd.f32 %v4638_v16, %v514_v52  ;;  %v515_v1 = vmul.f32 %v4634_v12, %v446_v48  ;;  %v453_v3 = vld [vmem:[%s4620_s18 + $0xe8] sm:$0xff]  ;;  %v455_v4 = vld [vmem:[%s4620_s18 + $0xf8] sm:$0xff]  ;;  %v456_v21 = vld [vmem:[%s4620_s18 + $0x100] sm:$0xff] }
  0x91   : > { %866 = vmatprep.subr.bf16.mxu0 %v3525_v8  ;;  %890 = vmatprep.mubr.bf16.mxu0 %v623_v23  ;;  %v4697_v0 = vadd.f32 %v4638_v16, %v516_v53  ;;  %v518_v2 = vmul.f32 %v4634_v12, %v449_v49  ;;  %v520_v8 = vmul.f32 %v4634_v12, %v451_v54  ;;  %v461_v27 = vld [vmem:[%s4620_s18 + $0x128] sm:$0xff]  ;;  %v462_v34 = vld [vmem:[%s4620_s18 + $0x130] sm:$0xff]  ;;  %v467_v49 = vld [vmem:[%s4620_s18 + $0x158] sm:$0xff]  ;;  %p4295_p13 = por %p4294_p9, %p4293_p5 }
  0x92   : > { %v4706_v7 = vadd.f32 %v4638_v16, %v513_v60  ;;  %v4715_v15 = vadd.f32 %v4638_v16, %v515_v1  ;;  %v519_v18 = vmul.f32 %v4634_v12, %v450_v61  ;;  %v522_v24 = vmul.f32 %v4634_v12, %v453_v3  ;;  %v3548_v35 = vld [vmem:[#allocation6 + $0xb0] ss:$8 sps:$4 sm:$0xff]   ;;  %v3549_v40 = vld [vmem:[#allocation6 + $0xc4] ss:$8 sps:$4 sm:$0xff]   ;;  %v3558_v61 = vld [vmem:[#allocation6 + $0xf4] ss:$8 sps:$4 sm:$0xff]  }
  0x93   : > { %v4718_v17 = vadd.f32 %v4638_v16, %v518_v2  ;;  %v4725_v22 = vadd.f32 %v4638_v16, %v520_v8  ;;  %v524_v25 = vmul.f32 %v4634_v12, %v455_v4  ;;  %v465_v48 = vld [vmem:[%s4620_s18 + $0x148] sm:$0xff]  ;;  %v525_v54 = vmul.f32 %v4634_v12, %v456_v21  ;;  %v466_v60 = vld [vmem:[%s4620_s18 + $0x150] sm:$0xff]  ;;  %v471_v4 = vld [vmem:[%s4620_s18 + $0x178] sm:$0xff]  ;;  %p4296_p0 = pnand %p4295_p13, %p4289_p10 }
  0x94   : > { %867 = vmatpush1.bf16.msra.mxu0 %v3527_v9  ;;  %v517_v9 = vmul.f32 %v4634_v12, %v448_v55  ;;  %v4738_v30 = vadd.f32 %v4638_v16, %v519_v18  ;;  %v4747_v37 = vadd.f32 %v4638_v16, %v522_v24  ;;  %v530_v1 = vmul.f32 %v4634_v12, %v461_v27  ;;  %v469_v3 = vld [vmem:[%s4620_s18 + $0x168] sm:$0xff]  ;;  %v470_v18 = vld [vmem:[%s4620_s18 + $0x170] sm:$0xff] }
  0x95   : > { %868 = vmatprep.subr.bf16.mxu0 %v3528_v10  ;;  %v452_v10 = vld [vmem:[%s4620_s18 + $0xe0] sm:$0xff]  ;;  %v4750_v38 = vadd.f32 %v4638_v16, %v524_v25  ;;  %v4783_v8 = vadd.f32 %v4638_v16, %v525_v54  ;;  %v534_v25 = vmul.f32 %v4634_v12, %v465_v48  ;;  %v474_v54 = vld [vmem:[%s4620_s18 + $0x190] sm:$0xff]  ;;  %v481_v27 = vld [vmem:[%s4620_s18 + $0x1c8] sm:$0xff] }
  0x96   : > { %v4728_v23 = vadd.f32 %v4638_v16, %v517_v9  ;;  %v521_v31 = vmul.f32 %v4634_v12, %v452_v10  ;;  %v4795_v21 = vadd.f32 %v4638_v16, %v530_v1  ;;  %v472_v48 = vld [vmem:[%s4620_s18 + $0x180] sm:$0xff]  ;;  %v538_v1 = vmul.f32 %v4634_v12, %v469_v3  ;;  %v485_v52 = vld [vmem:[%s4620_s18 + $0x1e8] sm:$0xff]  ;;  %v486_v29 = vld [vmem:[%s4620_s18 + $0x1f0] sm:$0xff] }
  0x97   : > { %v3561_v6 = vld [vmem:[#allocation8 + $0x4] ss:$8 sps:$4 sm:$0xff]  }
  0x98   : > { %869 = vmatpush1.bf16.msra.mxu0 %v3530_v11  ;;  %v454_v11 = vld [vmem:[%s4620_s18 + $0xf0] sm:$0xff]  ;;  %v4756_v43 = vadd.f32 %v4638_v16, %v521_v31  ;;  %2093 = vmatprep.subr.bf16.mxu1 %v3561_v6  ;;  %v625_v6 = vpack.c.bf16 %v4683_v57, %v4673_v50  ;;  %v3569_v50 = vld [vmem:[#allocation8 + $0x20] ss:$8 sps:$4 sm:$0xff]  }
  0x99   : > { %870 = vmatprep.subr.bf16.mxu0 %v3531_v13  ;;  %v3546_v13 = vld [vmem:[#allocation6 + $0xb4] ss:$8 sps:$4 sm:$0xff]   ;;  %v523_v32 = vmul.f32 %v4634_v12, %v454_v11  ;;  %v531_v11 = vmul.f32 %v4634_v12, %v462_v34 }
  0x9a   : > { %v479_v34 = vld [vmem:[%s4620_s18 + $0x1b8] sm:$0xff] }
  0x9b   : > { %v4759_v46 = vadd.f32 %v4638_v16, %v523_v32  ;;  %v4808_v31 = vadd.f32 %v4638_v16, %v531_v11  ;;  %v536_v32 = vmul.f32 %v4634_v12, %v467_v49  ;;  %v477_v49 = vld [vmem:[%s4620_s18 + $0x1a8] sm:$0xff] }
  0x9c   : > { %871 = vmatpush1.bf16.msra.mxu0 %v3533_v19  ;;  %v457_v19 = vld [vmem:[%s4620_s18 + $0x108] sm:$0xff] }
  0x9d   : > { %872 = vmatprep.subr.bf16.mxu0 %v3534_v20  ;;  %v459_v20 = vld [vmem:[%s4620_s18 + $0x118] sm:$0xff]  ;;  %v526_v39 = vmul.f32 %v4634_v12, %v457_v19 }
  0x9e   : > { %v528_v47 = vmul.f32 %v4634_v12, %v459_v20  ;;  %v3552_v19 = vld [vmem:[#allocation6 + $0xd4] ss:$8 sps:$4 sm:$0xff]  }
  0x9f   : > { %v4767_v53 = vadd.f32 %v4638_v16, %v526_v39  ;;  %v4815_v39 = vadd.f32 %v4638_v16, %v534_v25  ;;  %v539_v25 = vmul.f32 %v4634_v12, %v470_v18  ;;  %v543_v18 = vmul.f32 %v4634_v12, %v474_v54  ;;  %v483_v20 = vld [vmem:[%s4620_s18 + $0x1d8] sm:$0xff] }
  0xa0   : > { %873 = vmatpush1.bf16.msra.mxu0 %v3536_v26  ;;  %v458_v26 = vld [vmem:[%s4620_s18 + $0x110] sm:$0xff] }
  0xa1   : > { %874 = vmatprep.subr.bf16.mxu0 %v3537_v28  ;;  %v463_v28 = vld [vmem:[%s4620_s18 + $0x138] sm:$0xff]  ;;  %v527_v55 = vmul.f32 %v4634_v12, %v458_v26  ;;  %v473_v26 = vld [vmem:[%s4620_s18 + $0x188] sm:$0xff]  ;;  %v4855_v3 = vadd.f32 %v4638_v16, %v539_v25  ;;  %v4878_v54 = vadd.f32 %v4638_v16, %v543_v18 }
  0xa2   : > { %v532_v2 = vmul.f32 %v4634_v12, %v463_v28 }
  0xa3   : > { %v4786_v9 = vadd.f32 %v4638_v16, %v527_v55  ;;  %v3554_v55 = vld [vmem:[#allocation6 + $0xd0] ss:$8 sps:$4 sm:$0xff]   ;;  %6794 = vst [vmem:[#allocation19_spill] sm:$0xff] %v4878_v54 }
  0xa4   : > { %875 = vmatpush1.bf16.msra.mxu0 %v3539_v33  ;;  %v460_v33 = vld [vmem:[%s4620_s18 + $0x120] sm:$0xff]  ;;  %v4798_v24 = vadd.f32 %v4638_v16, %v532_v2  ;;  %v540_v2 = vmul.f32 %v4634_v12, %v471_v4  ;;  %v4841_v4 = vadd.f32 %v4638_v16, %v538_v1 }
  0xa5   : > { %876 = vmatprep.subr.bf16.mxu0 %v3540_v41  ;;  %v529_v10 = vmul.f32 %v4634_v12, %v460_v33  ;;  %v475_v33 = vld [vmem:[%s4620_s18 + $0x198] sm:$0xff] }
  0xa6   : > { %v544_v1 = vmul.f32 %v4634_v12, %v475_v33  ;;  %v546_v33 = vmul.f32 %v4634_v12, %v477_v49  ;;  %v480_v49 = vld [vmem:[%s4620_s18 + $0x1c0] sm:$0xff]  ;;  %v487_v41 = vld [vmem:[%s4620_s18 + $0x1f8] sm:$0xff] }
  0xa7   : > { %v4805_v28 = vadd.f32 %v4638_v16, %v529_v10  ;;  %v3555_v10 = vld [vmem:[#allocation6 + $0xe4] ss:$8 sps:$4 sm:$0xff]  }
  0xa8   : > { %877 = vmatpush1.bf16.msra.mxu0 %v3542_v56  ;;  %v464_v56 = vld [vmem:[%s4620_s18 + $0x140] sm:$0xff]  ;;  %v4869_v25 = vadd.f32 %v4638_v16, %v544_v1 }
  0xa9   : > { %878 = vmatprep.subr.bf16.mxu0 %v3543_v62  ;;  %v4776_v62 = vadd.f32 %v4638_v16, %v528_v47  ;;  %v535_v47 = vmul.f32 %v4634_v12, %v466_v60 }
  0xab   : > { %v4832_v60 = vadd.f32 %v4638_v16, %v535_v47  ;;  %v476_v47 = vld [vmem:[%s4620_s18 + $0x1a0] sm:$0xff] }
  0xac   : > { %879 = vmatpush1.bf16.msra.mxu0 %v3545_v5  ;;  %v3551_v5 = vld [vmem:[#allocation6 + $0xc0] ss:$8 sps:$4 sm:$0xff]  }
  0xad   : > { %880 = vmatprep.subr.bf16.mxu0 %v3546_v13  ;;  %v468_v13 = vld [vmem:[%s4620_s18 + $0x160] sm:$0xff] }
  0xae   : > { %v537_v11 = vmul.f32 %v4634_v12, %v468_v13  ;;  %v478_v13 = vld [vmem:[%s4620_s18 + $0x1b0] sm:$0xff] }
  0xaf   : > { %v547_v1 = vmul.f32 %v4634_v12, %v478_v13  ;;  %v549_v13 = vmul.f32 %v4634_v12, %v480_v49 }
  0xb0   : > { %881 = vmatpush1.bf16.msra.mxu0 %v3548_v35  ;;  %v533_v35 = vmul.f32 %v4634_v12, %v464_v56 }
  0xb1   : > { %882 = vmatprep.subr.bf16.mxu0 %v3549_v40  ;;  %v4824_v40 = vadd.f32 %v4638_v16, %v536_v32  ;;  %v4844_v32 = vadd.f32 %v4638_v16, %v540_v2  ;;  %v548_v2 = vmul.f32 %v4634_v12, %v479_v34  ;;  %v482_v34 = vld [vmem:[%s4620_s18 + $0x1d0] sm:$0xff]  ;;  %v4923_v49 = vadd.f32 %v4638_v16, %v549_v13 }
  0xb2   : > { %v4829_v56 = vadd.f32 %v4638_v16, %v533_v35  ;;  %v542_v35 = vmul.f32 %v4634_v12, %v473_v26  ;;  %v622_v13 = vpack.c.bf16 %v4666_v45, %v4663_v44  ;;  %v3567_v45 = vld [vmem:[#allocation8 + $0x24] ss:$8 sps:$4 sm:$0xff]  }
  0xb3   : > { %v4890_v18 = vadd.f32 %v4638_v16, %v548_v2  ;;  %v433_v2 = vld [vmem:[%s4620_s18 + $0x48] sm:$0xff] }
  0xb4   : > { %883 = vmatpush1.bf16.msra.mxu0 %v3551_v5  ;;  %v4852_v5 = vadd.f32 %v4638_v16, %v537_v11  ;;  %v4861_v26 = vadd.f32 %v4638_v16, %v542_v35  ;;  %v3557_v35 = vld [vmem:[#allocation6 + $0xe0] ss:$8 sps:$4 sm:$0xff]   ;;  %v545_v11 = vmul.f32 %v4634_v12, %v476_v47  ;;  %v550_v47 = vmul.f32 %v4634_v12, %v481_v27 }
  0xb5   : > { %884 = vmatprep.subr.bf16.mxu0 %v3552_v19  ;;  %v541_v19 = vmul.f32 %v4634_v12, %v472_v48  ;;  %v556_v27 = vmul.f32 %v4634_v12, %v487_v41  ;;  %v437_v44 = vld [vmem:[%s4620_s18 + $0x68] sm:$0xff] }
  0xb6   : > { %6792 = vst [vmem:[#allocation17_spill] sm:$0xff] %v4861_v26  ;;  %v4898_v36 = vadd.f32 %v4638_v16, %v545_v11  ;;  %v4910_v14 = vadd.f32 %v4638_v16, %v550_v47  ;;  %v551_v11 = vmul.f32 %v4634_v12, %v482_v34  ;;  %v554_v26 = vmul.f32 %v4634_v12, %v485_v52  ;;  %v3564_v47 = vld [vmem:[#allocation8 + $0x14] ss:$8 sps:$4 sm:$0xff]  }
  0xb7   : > { %v4875_v48 = vadd.f32 %v4638_v16, %v541_v19  ;;  %v4887_v19 = vadd.f32 %v4638_v16, %v546_v33  ;;  %v484_v33 = vld [vmem:[%s4620_s18 + $0x1e0] sm:$0xff] }
  0xb8   : > { %885 = vmatpush1.bf16.msra.mxu0 %v3554_v55  ;;  %v552_v55 = vmul.f32 %v4634_v12, %v483_v20  ;;  %v4926_v34 = vadd.f32 %v4638_v16, %v551_v11  ;;  %v555_v20 = vmul.f32 %v4634_v12, %v486_v29  ;;  %v4934_v41 = vadd.f32 %v4638_v16, %v554_v26  ;;  %v3566_v11 = vld [vmem:[#allocation8 + $0x10] ss:$8 sps:$4 sm:$0xff]  }
  0xb9   : > { %6793 = vst [vmem:[#allocation18_spill] sm:$0xff] %v4875_v48  ;;  %886 = vmatprep.subr.bf16.mxu0 %v3555_v10  ;;  %6795 = vst [vmem:[#allocation20_spill] sm:$0xff] %v4887_v19  ;;  %v4901_v10 = vadd.f32 %v4638_v16, %v547_v1  ;;  %v3563_v48 = vld [vmem:[#allocation8] ss:$8 sps:$4 sm:$0xff]   ;;  %v3560_v1 = vld [vmem:[#allocation6 + $0xf0] ss:$8 sps:$4 sm:$0xff]  }
  0xba   : > { %v4917_v54 = vadd.f32 %v4638_v16, %v552_v55  ;;  %v435_v19 = vld [vmem:[%s4620_s18 + $0x58] sm:$0xff]  ;;  %v502_v55 = vmul.f32 %v4634_v12, %v433_v2  ;;  %v4947_v2 = vadd.f32 %v4638_v16, %v555_v20  ;;  %2094 = vmatpush1.bf16.msra.mxu1 %v3563_v48  ;;  %v562_v48 = vadd.f32 %v4638_v16, %v4659_v42  ;;  %v432_v20 = vld [vmem:[%s4620_s18 + $0x40] sm:$0xff] }
  0xbb   : > { %v504_v26 = vmul.f32 %v4634_v12, %v435_v19  ;;  %2095 = vmatprep.subr.bf16.mxu1 %v3564_v47  ;;  %v434_v47 = vld [vmem:[%s4620_s18 + $0x50] sm:$0xff] }
  0xbc   : > { %887 = vmatpush1.bf16.msra.mxu0 %v3557_v35  ;;  %v553_v35 = vmul.f32 %v4634_v12, %v484_v33  ;;  %v651_v52 = vpack.c.bf16 %v4917_v54, %v4910_v14  ;;  %v567_v57 = vadd.f32 %v4638_v16, %v502_v55  ;;  %v501_v33 = vmul.f32 %v4634_v12, %v432_v20  ;;  %v436_v20 = vld [vmem:[%s4620_s18 + $0x60] sm:$0xff] }
  0xbd   : > { %888 = vmatprep.subr.bf16.mxu0 %v3558_v61  ;;  %v4937_v61 = vadd.f32 %v4638_v16, %v556_v27  ;;  %v569_v19 = vadd.f32 %v4638_v16, %v504_v26  ;;  %v439_v27 = vld [vmem:[%s4620_s18 + $0x78] sm:$0xff]  ;;  %v503_v42 = vmul.f32 %v4634_v12, %v434_v47  ;;  %v506_v55 = vmul.f32 %v4634_v12, %v437_v44  ;;  %v3573_v26 = vld [vmem:[#allocation8 + $0x44] ss:$8 sps:$4 sm:$0xff]   ;;  %v3599_v14 = vld [vmem:[#allocation8 + $0xc0] ss:$8 sps:$4 sm:$0xff]  }
  0xbe   : > { %v4944_v29 = vadd.f32 %v4638_v16, %v553_v35  ;;  %2096 = vmatpush1.bf16.msra.mxu1 %v3566_v11  ;;  %v3570_v35 = vld [vmem:[#allocation8 + $0x34] ss:$8 sps:$4 sm:$0xff]  }
  0xbf   : > { %2097 = vmatprep.subr.bf16.mxu1 %v3567_v45  ;;  %v627_v11 = vpack.c.bf16 %v569_v19, %v567_v57  ;;  %v566_v45 = vadd.f32 %v4638_v16, %v501_v33  ;;  %v438_v57 = vld [vmem:[%s4620_s18 + $0x70] sm:$0xff]  ;;  %v441_v19 = vld [vmem:[%s4620_s18 + $0x88] sm:$0xff]  ;;  %v443_v44 = vld [vmem:[%s4620_s18 + $0x98] sm:$0xff] }
  0xc0   : > { %889 = vmatpush1.bf16.msra.mxu0 %v3560_v1  ;;  %v564_v1 = vadd.f32 %v4638_v16, %v4676_v51  ;;  %v3572_v51 = vld [vmem:[#allocation8 + $0x30] ss:$8 sps:$4 sm:$0xff]   ;;  %v510_v33 = vmul.f32 %v4634_v12, %v441_v19  ;;  %v6821_v54 = vpack.c.bf16 %v4947_v2, %v4944_v29  ;;  %v686_v29 = vld [vmem:[%s6750_s2] sm:$0x3] }
  0xc1   : > { %v3602_v19 = vld [vmem:[#allocation8 + $0xd0] ss:$8 sps:$4 sm:$0xff]  }
  0xc2   : > { %2098 = vmatpush1.bf16.msra.mxu1 %v3569_v50 }
  0xc3   : > { %891 = vmatmul.mubr.bf16.vlgmr.msra.gmra.mrb[0].mxu0 %v622_v13  ;;  %v624_v13 = vpack.c.bf16 %v564_v1, %v562_v48  ;;  %2099 = vmatprep.subr.bf16.mxu1 %v3570_v35  ;;  %v568_v48 = vadd.f32 %v4638_v16, %v503_v42  ;;  %v571_v1 = vadd.f32 %v4638_v16, %v506_v55 }
  0xc4   : > { %900 = vmatprep.mubr.bf16.mxu0 %v625_v6  ;;  %v508_v6 = vmul.f32 %v4634_v12, %v439_v27  ;;  %v505_v27 = vmul.f32 %v4634_v12, %v436_v20  ;;  %v507_v35 = vmul.f32 %v4634_v12, %v438_v57  ;;  %v512_v42 = vmul.f32 %v4634_v12, %v443_v44  ;;  %v3596_v20 = vld [vmem:[#allocation8 + $0xb0] ss:$8 sps:$4 sm:$0xff]   ;;  %v3603_v44 = vld [vmem:[#allocation8 + $0xe4] ss:$8 sps:$4 sm:$0xff]  }
  0xc5   : > { %v626_v47 = vpack.c.bf16 %v568_v48, %v566_v45  ;;  %v575_v55 = vadd.f32 %v4638_v16, %v510_v33  ;;  %v6796_v48 = vpack.c.bf16 %v4689_v59, %v4686_v58  ;;  %v6797_v12 = vpack.c.bf16 %v4697_v0, %v4694_v63 }
  0xc6   : > { %2100 = vmatpush1.bf16.msra.mxu1 %v3572_v51  ;;  %v573_v50 = vadd.f32 %v4638_v16, %v508_v6  ;;  %v570_v51 = vadd.f32 %v4638_v16, %v505_v27  ;;  %v577_v6 = vadd.f32 %v4638_v16, %v512_v42  ;;  %v6801_v58 = vpack.c.bf16 %v4750_v38, %v4747_v37  ;;  %v3576_v37 = vld [vmem:[#allocation8 + $0x54] ss:$8 sps:$4 sm:$0xff]   ;;  %v3578_v38 = vld [vmem:[#allocation8 + $0x50] ss:$8 sps:$4 sm:$0xff]  }
  0xc7   : > { %2101 = vmatprep.subr.bf16.mxu1 %v3573_v26  ;;  %v6802_v59 = vpack.c.bf16 %v4759_v46, %v4756_v43  ;;  %v6803_v63 = vpack.c.bf16 %v4776_v62, %v4767_v53  ;;  %v6804_v0 = vpack.c.bf16 %v4786_v9, %v4783_v8  ;;  %v6810_v43 = vpack.c.bf16 %v4855_v3, %v4852_v5  ;;  %v3579_v46 = vld [vmem:[#allocation8 + $0x64] ss:$8 sps:$4 sm:$0xff]   ;;  %v3581_v8 = vld [vmem:[#allocation8 + $0x60] ss:$8 sps:$4 sm:$0xff]   ;;  %v3582_v9 = vld [vmem:[#allocation8 + $0x74] ss:$8 sps:$4 sm:$0xff]  }
  0xc8   : > { %v631_v45 = vpack.c.bf16 %v577_v6, %v575_v55  ;;  %v6811_v53 = vld [vmem:[#allocation17_spill] sm:$0xff]  ;;  %v3588_v3 = vld [vmem:[#allocation8 + $0x94] ss:$8 sps:$4 sm:$0xff]   ;;  %v6819_v57 = vpack.c.bf16 %v4926_v34, %v4923_v49 }
  0xc9   : > { %v6812_v62 = vpack.c.bf16 %v4869_v25, %v6811_v53  ;;  %v3591_v5 = vld [vmem:[#allocation8 + $0xa4] ss:$8 sps:$4 sm:$0xff]   ;;  %v3593_v25 = vld [vmem:[#allocation8 + $0xa0] ss:$8 sps:$4 sm:$0xff]   ;;  %v3606_v34 = vld [vmem:[#allocation8 + $0xf4] ss:$8 sps:$4 sm:$0xff]  }
  0xca   : > { %v3605_v49 = vld [vmem:[#allocation8 + $0xe0] ss:$8 sps:$4 sm:$0xff]  }
  0xcb   : > { %901 = vmatmul.mubr.bf16.gmra.mrb[4].mxu0 %v624_v13  ;;  %v629_v13 = vpack.c.bf16 %v573_v50, %v571_v1  ;;  %v6798_v1 = vpack.c.bf16 %v4715_v15, %v4706_v7  ;;  %v6799_v50 = vpack.c.bf16 %v4725_v22, %v4718_v17  ;;  %v6805_v7 = vpack.c.bf16 %v4798_v24, %v4795_v21  ;;  %v3584_v21 = vld [vmem:[#allocation8 + $0x70] ss:$8 sps:$4 sm:$0xff]  }
  0xcc   : > { %910 = vmatprep.mubr.bf16.mxu0 %v627_v11  ;;  %v572_v11 = vadd.f32 %v4638_v16, %v507_v35  ;;  %v6800_v16 = vpack.c.bf16 %v4738_v30, %v4728_v23  ;;  %v6806_v15 = vpack.c.bf16 %v4808_v31, %v4805_v28  ;;  %v6807_v17 = vpack.c.bf16 %v4824_v40, %v4815_v39  ;;  %v3575_v30 = vld [vmem:[#allocation8 + $0x40] ss:$8 sps:$4 sm:$0xff]   ;;  %v6813_v24 = vld [vmem:[#allocation19_spill] sm:$0xff]  ;;  %v3585_v39 = vld [vmem:[#allocation8 + $0x84] ss:$8 sps:$4 sm:$0xff]  }
  0xcd   : > { %v6808_v22 = vpack.c.bf16 %v4832_v60, %v4829_v56  ;;  %v6809_v23 = vpack.c.bf16 %v4844_v32, %v4841_v4  ;;  %2102 = vmatpush1.bf16.msra.mxu1 %v3575_v30  ;;  %v6814_v28 = vld [vmem:[#allocation18_spill] sm:$0xff]  ;;  %v6816_v40 = vld [vmem:[#allocation20_spill] sm:$0xff]  ;;  %v6818_v32 = vpack.c.bf16 %v4901_v10, %v4898_v36  ;;  %v6820_v36 = vpack.c.bf16 %v4937_v61, %v4934_v41  ;;  %v1052_v35 = vld [vmem:[%s6754_s6] sm:$0x3] }
  0xce   : > { %v628_v26 = vpack.c.bf16 %v572_v11, %v570_v51  ;;  %2103 = vmatprep.subr.bf16.mxu1 %v3576_v37  ;;  %v6815_v31 = vpack.c.bf16 %v6813_v24, %v6814_v28  ;;  %v6817_v56 = vpack.c.bf16 %v4890_v18, %v6816_v40  ;;  %v3587_v60 = vld [vmem:[#allocation8 + $0x80] ss:$8 sps:$4 sm:$0xff]   ;;  %v3590_v4 = vld [vmem:[#allocation8 + $0x90] ss:$8 sps:$4 sm:$0xff]   ;;  %v3594_v18 = vld [vmem:[#allocation8 + $0xb4] ss:$8 sps:$4 sm:$0xff]   ;;  %v688_v41 = vlaneseq }
  0xcf   : > { %v3597_v10 = vld [vmem:[#allocation8 + $0xc4] ss:$8 sps:$4 sm:$0xff]  }
  0xd0   : > { %v689_v61 = vshrl.u32 %v688_v41, 7 }
  0xd1   : > { %2104 = vmatpush1.bf16.msra.mxu1 %v3578_v38 }
  0xd2   : > { %2105 = vmatprep.subr.bf16.mxu1 %v3579_v46  ;;  %v5055_v27 = vsub.s32 0, %v689_v61  ;;  %v5060_v2 = vsub.s32 1, %v689_v61 }
  0xd3   : > { %911 = vmatmul.mubr.bf16.gmra.mrb[8].mxu0 %v626_v47  ;;  %v3608_v47 = vld [vmem:[#allocation8 + $0xf0] ss:$8 sps:$4 sm:$0xff]  }
  0xd4   : > { %920 = vmatprep.mubr.bf16.mxu0 %v629_v13  ;;  %6822 = vst [vmem:[#allocation17_spill] sm:$0xff] %v5055_v27  ;;  %6823 = vst [vmem:[#allocation19_spill] sm:$0xff] %v5060_v2  ;;  %v5066_v13 = vrot.slane %v686_v29, %v5055_v27  ;;  %v5069_v33 = vrot.slane %v686_v29, %v5060_v2  ;;  %v5072_v42 = vrot.slane %v1052_v35, %v5055_v27 }
  0xd5   : > { %2106 = vmatpush1.bf16.msra.mxu1 %v3581_v8  ;;  %v5075_v11 = vrot.slane %v1052_v35, %v5060_v2 }
  0xd6   : > { %2107 = vmatprep.subr.bf16.mxu1 %v3582_v9 }
  0xd9   : > { %2108 = vmatpush1.bf16.msra.mxu1 %v3584_v21 }
  0xda   : > { %2109 = vmatprep.subr.bf16.mxu1 %v3585_v39 }
  0xdb   : > { %921 = vmatmul.mubr.bf16.gmra.mrb[12].mxu0 %v628_v26 }
  0xdc   : > { %930 = vmatprep.mubr.bf16.mxu0 %v631_v45 }
  0xdd   : > { %2110 = vmatpush1.bf16.msra.mxu1 %v3587_v60 }
  0xde   : > { %2111 = vmatprep.subr.bf16.mxu1 %v3588_v3 }
  0xe1   : > { %2112 = vmatpush1.bf16.msra.mxu1 %v3590_v4 }
  0xe2   : > { %2113 = vmatprep.subr.bf16.mxu1 %v3591_v5 }
  0xe3   : > { %931 = vmatmul.mubr.bf16.gmra.mrb[16].mxu0 %v6796_v48 }
  0xe4   : > { %940 = vmatprep.mubr.bf16.mxu0 %v6797_v12 }
  0xe5   : > { %2114 = vmatpush1.bf16.msra.mxu1 %v3593_v25 }
  0xe6   : > { %2115 = vmatprep.subr.bf16.mxu1 %v3594_v18 }
  0xe9   : > { %2116 = vmatpush1.bf16.msra.mxu1 %v3596_v20 }
  0xea   : > { %2117 = vmatprep.subr.bf16.mxu1 %v3597_v10 }
  0xeb   : > { %941 = vmatmul.mubr.bf16.gmra.mrb[20].mxu0 %v6798_v1 }
  0xec   : > { %950 = vmatprep.mubr.bf16.mxu0 %v6799_v50 }
  0xed   : > { %2118 = vmatpush1.bf16.msra.mxu1 %v3599_v14 }
  0xf3   : > { %951 = vmatmul.mubr.bf16.gmra.mrb[24].mxu0 %v6800_v16 }
  0xf4   : > { %960 = vmatprep.mubr.bf16.mxu0 %v6801_v58 }
  0xfb   : > { %961 = vmatmul.mubr.bf16.gmra.mrb[28].mxu0 %v6802_v59 }
  0xfc   : > { %970 = vmatprep.mubr.bf16.mxu0 %v6803_v63 }
 0x103   : > { %971 = vmatmul.mubr.bf16.gmra.mrb[32].mxu0 %v6804_v0 }
 0x104   : > { %980 = vmatprep.mubr.bf16.mxu0 %v6805_v7 }
 0x10b   : > { %981 = vmatmul.mubr.bf16.gmra.mrb[36].mxu0 %v6806_v15 }
 0x10c   : > { %990 = vmatprep.mubr.bf16.mxu0 %v6807_v17 }
 0x113   : > { %991 = vmatmul.mubr.bf16.gmra.mrb[40].mxu0 %v6808_v22 }
 0x114   : > { %1000 = vmatprep.mubr.bf16.mxu0 %v6809_v23 }
 0x11b   : > { %1001 = vmatmul.mubr.bf16.gmra.mrb[44].mxu0 %v6810_v43 }
 0x11c   : > { %1010 = vmatprep.mubr.bf16.mxu0 %v6812_v62 }
 0x123   : > { %1011 = vmatmul.mubr.bf16.gmra.mrb[48].mxu0 %v6815_v31  ;;  %v5120_v31 = vld [vmem:[%s6753_s5] sm:$0x3] }
 0x124   : > { %1020 = vmatprep.mubr.bf16.mxu0 %v6817_v56  ;;  %v1512_v20 = vsub.f32 1.0, %v5120_v31 }
 0x12b   : > { %1021 = vmatmul.mubr.bf16.gmra.mrb[52].mxu0 %v6818_v32 }
 0x12c   : > { %1030 = vmatprep.mubr.bf16.mxu0 %v651_v52  ;;  %v3600_v52 = vld [vmem:[#allocation8 + $0xd4] ss:$8 sps:$4 sm:$0xff]  }
 0x12d   : > { %2119 = vmatprep.subr.bf16.mxu1 %v3600_v52 }
 0x12e   : > { %2120 = vmatpush1.bf16.msra.mxu1 %v3602_v19 }
 0x12f   : > { %2121 = vmatprep.subr.bf16.mxu1 %v3603_v44 }
 0x132   : > { %2122 = vmatpush1.bf16.msra.mxu1 %v3605_v49 }
 0x133   : > { %1031 = vmatmul.mubr.bf16.gmra.mrb[56].mxu0 %v6819_v57  ;;  %2123 = vmatprep.subr.bf16.mxu1 %v3606_v34 }
 0x134   : > { %1040 = vmatprep.mubr.bf16.mxu0 %v6820_v36 }
 0x136   : > { %2124 = vmatpush1.bf16.msra.mxu1 %v3608_v47 }
 0x13b   : > { %1041 = vmatmul.mubr.bf16.gmra.mrb[60].mxu0 %v6821_v54 }
 0x196   : > { %v892_v51 = vpop.f32.mrb[0].mxu0 }
 0x197   : > { %v5078_v55 = vadd.f32 %v892_v51, %v5066_v13  ;;  %v894_v6 = vpop.f32.mrb[1].mxu0 }
 0x198   : > { %v5081_v26 = vadd.f32 %v894_v6, %v5069_v33  ;;  %v896_v45 = vpop.f32.mrb[2].mxu0 }
 0x199   : > { %v1064_v48 = vmul.f32 %v5072_v42, %v5078_v55  ;;  %v5086_v12 = vadd.f32 %v896_v45, %v5066_v13  ;;  %v898_v1 = vpop.f32.mrb[3].mxu0  ;;  %v5146_v45 = vrot.slane %v1512_v20, %v5055_v27 }
 0x19a   : > { %v1065_v50 = vmul.f32 %v5075_v11, %v5081_v26  ;;  %v5091_v16 = vadd.f32 %v898_v1, %v5069_v33 }
 0x19b   : > { %v3260_v58 = vmul.f32 -1.442695, %v1064_v48  ;;  %v1066_v59 = vmul.f32 %v5072_v42, %v5086_v12  ;;  %v5149_v48 = vrot.slane %v1512_v20, %v5060_v2  ;;  %v5183_v20 = vstv %s5143_s26  ;;  %s6834_s26 = sld [smem:[#allocation24_spill]] }
 0x19c   : > { %v3261_v63 = vmul.f32 -1.442695, %v1065_v50  ;;  %v1067_v0 = vmul.f32 %v5075_v11, %v5091_v16 }
 0x19d   : > { %3609 = vpow2.f32 %v3260_v58  ;;  %v3262_v7 = vmul.f32 -1.442695, %v1066_v59  ;;  %v5156_v59 = vrot.slane %v5120_v31, %v5055_v27 }
 0x19e   : > { %3611 = vpow2.f32 %v3261_v63  ;;  %v3263_v15 = vmul.f32 -1.442695, %v1067_v0  ;;  %v902_v17 = vpop.f32.mrb[4].mxu0 }
 0x19f   : > { %3613 = vpow2.f32 %v3262_v7  ;;  %v5098_v22 = vadd.f32 %v902_v17, %v5066_v13  ;;  %v904_v23 = vpop.f32.mrb[5].mxu0 }
 0x1a0   : > { %3615 = vpow2.f32 %v3263_v15  ;;  %v5101_v30 = vadd.f32 %v904_v23, %v5069_v33  ;;  %v906_v37 = vpop.f32.mrb[6].mxu0 }
 0x1a1   : > { %v1068_v38 = vmul.f32 %v5072_v42, %v5098_v22  ;;  %v5106_v43 = vadd.f32 %v906_v37, %v5066_v13  ;;  %v908_v46 = vpop.f32.mrb[7].mxu0 }
 0x1a2   : > { %v1069_v53 = vmul.f32 %v5075_v11, %v5101_v30  ;;  %v5111_v62 = vadd.f32 %v908_v46, %v5069_v33 }
 0x1a3   : > { %v3264_v8 = vmul.f32 -1.442695, %v1068_v38  ;;  %v1070_v9 = vmul.f32 %v5072_v42, %v5106_v43 }
 0x1a4   : > { %v3265_v21 = vmul.f32 -1.442695, %v1069_v53  ;;  %v1071_v24 = vmul.f32 %v5075_v11, %v5111_v62 }
 0x1a5   : > { %3617 = vpow2.f32 %v3264_v8  ;;  %v3266_v28 = vmul.f32 -1.442695, %v1070_v9 }
 0x1a6   : > { %3619 = vpow2.f32 %v3265_v21  ;;  %v3267_v39 = vmul.f32 -1.442695, %v1071_v24  ;;  %v912_v40 = vpop.f32.mrb[8].mxu0 }
 0x1a7   : > { %v3610_v56 = vpop.eup %3609  ;;  %3621 = vpow2.f32 %v3266_v28  ;;  %v5123_v60 = vadd.f32 %v912_v40, %v5066_v13  ;;  %v914_v3 = vpop.f32.mrb[9].mxu0  ;;  %v5177_v40 = vrot.slane %v5120_v31, %v5060_v2 }
 0x1a8   : > { %v3612_v4 = vpop.eup %3611  ;;  %v1320_v32 = vadd.f32 1.0, %v3610_v56  ;;  %3623 = vpow2.f32 %v3267_v39  ;;  %v5126_v5 = vadd.f32 %v914_v3, %v5069_v33  ;;  %v916_v25 = vpop.f32.mrb[10].mxu0 }
 0x1a9   : > { %v3614_v18 = vpop.eup %3613  ;;  %v1321_v57 = vadd.f32 1.0, %v3612_v4  ;;  %v1072_v36 = vmul.f32 %v5072_v42, %v5123_v60  ;;  %v5132_v10 = vadd.f32 %v916_v25, %v5066_v13  ;;  %v918_v14 = vpop.f32.mrb[11].mxu0 }
 0x1aa   : > { %v3616_v54 = vpop.eup %3615  ;;  %3625 = vrcp.f32 %v1320_v32  ;;  %v1322_v52 = vadd.f32 1.0, %v3614_v18  ;;  %v1073_v19 = vmul.f32 %v5075_v11, %v5126_v5  ;;  %v5137_v44 = vadd.f32 %v918_v14, %v5069_v33 }
 0x1ab   : > { %3627 = vrcp.f32 %v1321_v57  ;;  %v1323_v49 = vadd.f32 1.0, %v3616_v54  ;;  %v3268_v34 = vmul.f32 -1.442695, %v1072_v36  ;;  %v1074_v47 = vmul.f32 %v5072_v42, %v5132_v10 }
 0x1ac   : > { %3629 = vrcp.f32 %v1322_v52  ;;  %v3269_v41 = vmul.f32 -1.442695, %v1073_v19  ;;  %v1075_v61 = vmul.f32 %v5075_v11, %v5137_v44 }
 0x1ad   : > { %3631 = vrcp.f32 %v1323_v49  ;;  %v3270_v29 = vmul.f32 -1.442695, %v1074_v47 }
 0x1ae   : > { %3633 = vpow2.f32 %v3268_v34  ;;  %v3271_v35 = vmul.f32 -1.442695, %v1075_v61  ;;  %v922_v51 = vpop.f32.mrb[12].mxu0 }
 0x1af   : > { %v3618_v6 = vpop.eup %3617  ;;  %3635 = vpow2.f32 %v3269_v41  ;;  %v5152_v1 = vadd.f32 %v922_v51, %v5066_v13  ;;  %v924_v50 = vpop.f32.mrb[13].mxu0 }
 0x1b0   : > { %v3620_v58 = vpop.eup %3619  ;;  %v1324_v63 = vadd.f32 1.0, %v3618_v6  ;;  %3637 = vpow2.f32 %v3270_v29  ;;  %v5159_v0 = vadd.f32 %v924_v50, %v5069_v33  ;;  %v926_v7 = vpop.f32.mrb[14].mxu0 }
 0x1b1   : > { %v3622_v15 = vpop.eup %3621  ;;  %v1325_v17 = vadd.f32 1.0, %v3620_v58  ;;  %3639 = vpow2.f32 %v3271_v35  ;;  %v1076_v23 = vmul.f32 %v5072_v42, %v5152_v1  ;;  %v5164_v37 = vadd.f32 %v926_v7, %v5066_v13  ;;  %v928_v38 = vpop.f32.mrb[15].mxu0 }
 0x1b2   : > { %v3624_v46 = vpop.eup %3623  ;;  %3641 = vrcp.f32 %v1324_v63  ;;  %v1326_v53 = vadd.f32 1.0, %v3622_v15  ;;  %v1077_v8 = vmul.f32 %v5075_v11, %v5159_v0  ;;  %v5169_v9 = vadd.f32 %v928_v38, %v5069_v33 }
 0x1b3   : > { %3643 = vrcp.f32 %v1325_v17  ;;  %v1327_v21 = vadd.f32 1.0, %v3624_v46  ;;  %v3272_v24 = vmul.f32 -1.442695, %v1076_v23  ;;  %v1078_v28 = vmul.f32 %v5072_v42, %v5164_v37 }
 0x1b4   : > { %v3626_v39 = vpop.eup %3625  ;;  %3645 = vrcp.f32 %v1326_v53  ;;  %v3273_v56 = vmul.f32 -1.442695, %v1077_v8  ;;  %v1079_v3 = vmul.f32 %v5075_v11, %v5169_v9  ;;  %v5202_v23 = vstv %s5171_s12  ;;  %s6699_s12 = scalar_lea.hbm %s6834_s26, %s3429_s29 }
 0x1b5   : > { %v3628_v4 = vpop.eup %3627  ;;  %v1524_v32 = vmul.f32 %v3626_v39, %v5146_v45  ;;  %3647 = vrcp.f32 %v1327_v21  ;;  %v3274_v25 = vmul.f32 -1.442695, %v1078_v28 }
 0x1b6   : > { %v3630_v18 = vpop.eup %3629  ;;  %v1525_v57 = vmul.f32 %v3628_v4, %v5149_v48  ;;  %3649 = vpow2.f32 %v3272_v24  ;;  %v3275_v36 = vmul.f32 -1.442695, %v1079_v3  ;;  %v932_v14 = vpop.f32.mrb[16].mxu0 }
 0x1b7   : > { %v3632_v31 = vpop.eup %3631  ;;  %v1599_v54 = vadd.f32 %v5156_v59, %v1524_v32  ;;  %v1526_v52 = vmul.f32 %v3630_v18, %v5146_v45  ;;  %3651 = vpow2.f32 %v3273_v56  ;;  %v5189_v19 = vadd.f32 %v932_v14, %v5066_v13  ;;  %v934_v49 = vpop.f32.mrb[17].mxu0 }
 0x1b8   : > { %v3634_v34 = vpop.eup %3633  ;;  %v1600_v47 = vadd.f32 %v5177_v40, %v1525_v57  ;;  %v1527_v41 = vmul.f32 %v3632_v31, %v5149_v48  ;;  %3653 = vpow2.f32 %v3274_v25  ;;  %v5194_v61 = vadd.f32 %v934_v49, %v5069_v33  ;;  %v936_v29 = vpop.f32.mrb[18].mxu0 }
 0x1b9   : > { %v3636_v35 = vpop.eup %3635  ;;  %v1663_v51 = vmul.f32 %v1599_v54, %v5078_v55  ;;  %v1601_v6 = vadd.f32 %v5156_v59, %v1526_v52  ;;  %v1328_v50 = vadd.f32 1.0, %v3634_v34  ;;  %3655 = vpow2.f32 %v3275_v36  ;;  %v938_v58 = vpop.f32.mrb[19].mxu0 }
 0x1ba   : > { %v3638_v63 = vpop.eup %3637  ;;  %v1602_v7 = vadd.f32 %v5177_v40, %v1527_v41  ;;  %v1329_v15 = vadd.f32 1.0, %v3636_v35  ;;  %v1080_v17 = vmul.f32 %v5072_v42, %v5189_v19  ;;  %v5208_v55 = vmul.f32 %v1600_v47, %v5081_v26 }
 0x1bb   : > { %v3640_v38 = vpop.eup %3639  ;;  %v5205_v46 = vmul.f32 %v5183_v20, %v1663_v51  ;;  %3657 = vrcp.f32 %v1328_v50  ;;  %v1330_v53 = vadd.f32 1.0, %v3638_v63  ;;  %v1665_v21 = vmul.f32 %v1601_v6, %v5086_v12 }
 0x1bc   : > { %v3642_v8 = vpop.eup %3641  ;;  %3659 = vrcp.f32 %v1329_v15  ;;  %v1331_v24 = vadd.f32 1.0, %v3640_v38  ;;  %v3276_v28 = vmul.f32 -1.442695, %v1080_v17  ;;  %v5212_v56 = vmul.f32 %v1602_v7, %v5091_v16 }
 0x1bd   : > { %v3644_v39 = vpop.eup %3643  ;;  %v1528_v3 = vmul.f32 %v3642_v8, %v5146_v45  ;;  %3661 = vrcp.f32 %v1330_v53  ;;  %v1081_v4 = vmul.f32 %v5075_v11, %v5194_v61  ;;  %v5219_v25 = vadd.f32 %v936_v29, %v5066_v13 }
 0x1be   : > { %v3646_v26 = vpop.eup %3645  ;;  %v1529_v32 = vmul.f32 %v3644_v39, %v5149_v48  ;;  %3663 = vrcp.f32 %v1331_v24  ;;  %v5222_v12 = vadd.f32 %v938_v58, %v5069_v33  ;;  %v942_v18 = vpop.f32.mrb[20].mxu0  ;;  %v5235_v63 = vmul.f32 %v5183_v20, %v1665_v21 }
 0x1bf   : > { %v3648_v57 = vpop.eup %3647  ;;  %v1603_v16 = vadd.f32 %v5156_v59, %v1528_v3  ;;  %v1530_v36 = vmul.f32 %v3646_v26, %v5146_v45  ;;  %3665 = vpow2.f32 %v3276_v28  ;;  %v3277_v14 = vmul.f32 -1.442695, %v1081_v4  ;;  %v944_v31 = vpop.f32.mrb[21].mxu0 }
 0x1c0   : > { %v3650_v54 = vpop.eup %3649  ;;  %v1604_v52 = vadd.f32 %v5177_v40, %v1529_v32  ;;  %v1531_v49 = vmul.f32 %v3648_v57, %v5149_v48  ;;  %v1082_v34 = vmul.f32 %v5072_v42, %v5219_v25  ;;  %v1083_v47 = vmul.f32 %v5075_v11, %v5222_v12  ;;  %v946_v41 = vpop.f32.mrb[22].mxu0 }
 0x1c1   : > { %v3652_v29 = vpop.eup %3651  ;;  %v1667_v35 = vmul.f32 %v1603_v16, %v5098_v22  ;;  %v1605_v51 = vadd.f32 %v5156_v59, %v1530_v36  ;;  %v1332_v6 = vadd.f32 1.0, %v3650_v54  ;;  %3667 = vpow2.f32 %v3277_v14  ;;  %v948_v50 = vpop.f32.mrb[23].mxu0 }
 0x1c2   : > { %v3654_v58 = vpop.eup %3653  ;;  %v1668_v7 = vmul.f32 %v1604_v52, %v5101_v30  ;;  %v1606_v15 = vadd.f32 %v5177_v40, %v1531_v49  ;;  %v1333_v17 = vadd.f32 1.0, %v3652_v29  ;;  %v3278_v22 = vmul.f32 -1.442695, %v1082_v34 }
 0x1c3   : > { %v3656_v38 = vpop.eup %3655  ;;  %v1669_v53 = vmul.f32 %v1605_v51, %v5106_v43  ;;  %3669 = vrcp.f32 %v1332_v6  ;;  %v1334_v8 = vadd.f32 1.0, %v3654_v58  ;;  %v5241_v24 = vmul.f32 %v5183_v20, %v1667_v35 }
 0x1c4   : > { %v5244_v28 = vmul.f32 %v5183_v20, %v1668_v7  ;;  %3671 = vrcp.f32 %v1333_v17  ;;  %v1335_v21 = vadd.f32 1.0, %v3656_v38  ;;  %v1670_v30 = vmul.f32 %v1606_v15, %v5111_v62 }
 0x1c5   : > { %v3658_v39 = vpop.eup %3657  ;;  %3673 = vrcp.f32 %v1334_v8  ;;  %v3279_v3 = vmul.f32 -1.442695, %v1083_v47  ;;  %v5248_v4 = vadd.f32 %v942_v18, %v5066_v13  ;;  %v5251_v26 = vmul.f32 %v5183_v20, %v1669_v53 }
 0x1c6   : > { %v3660_v43 = vpop.eup %3659  ;;  %v1532_v32 = vmul.f32 %v3658_v39, %v5146_v45  ;;  %3675 = vrcp.f32 %v1335_v21  ;;  %v5255_v57 = vadd.f32 %v944_v31, %v5069_v33  ;;  %v5257_v16 = vpop.f32.mrb[24].mxu0  ;;  %v5263_v14 = vadd.f32 %v946_v41, %v5066_v13 }
 0x1c7   : > { %v3662_v36 = vpop.eup %3661  ;;  %v1533_v62 = vmul.f32 %v3660_v43, %v5149_v48  ;;  %3677 = vpow2.f32 %v3278_v22  ;;  %v1084_v18 = vmul.f32 %v5072_v42, %v5248_v4  ;;  %v5265_v54 = vpop.f32.mrb[25].mxu0  ;;  %v5284_v39 = vmul.f32 %v5183_v20, %v1670_v30 }
 0x1c8   : > { %v3664_v52 = vpop.eup %3663  ;;  %v1607_v49 = vadd.f32 %v5156_v59, %v1532_v32  ;;  %v1534_v31 = vmul.f32 %v3662_v36, %v5146_v45  ;;  %3679 = vpow2.f32 %v3279_v3  ;;  %v1085_v34 = vmul.f32 %v5075_v11, %v5255_v57  ;;  %v5271_v47 = vpop.f32.mrb[26].mxu0 }
 0x1c9   : > { %v3666_v29 = vpop.eup %3665  ;;  %v1608_v35 = vadd.f32 %v5177_v40, %v1533_v62  ;;  %v1535_v51 = vmul.f32 %v3664_v52, %v5149_v48  ;;  %v3280_v41 = vmul.f32 -1.442695, %v1084_v18  ;;  %v1086_v6 = vmul.f32 %v5072_v42, %v5263_v14  ;;  %v5277_v58 = vpop.f32.mrb[27].mxu0 }
 0x1ca   : > { %v1671_v7 = vmul.f32 %v1607_v49, %v5123_v60  ;;  %v1609_v15 = vadd.f32 %v5156_v59, %v1534_v31  ;;  %v1336_v17 = vadd.f32 1.0, %v3666_v29  ;;  %v3281_v38 = vmul.f32 -1.442695, %v1085_v34 }
 0x1cb   : > { %v3668_v53 = vpop.eup %3667  ;;  %v1672_v8 = vmul.f32 %v1608_v35, %v5126_v5  ;;  %v1610_v22 = vadd.f32 %v5177_v40, %v1535_v51  ;;  %3681 = vpow2.f32 %v3280_v41  ;;  %v3282_v21 = vmul.f32 -1.442695, %v1086_v6 }
 0x1cc   : > { %v1673_v3 = vmul.f32 %v1609_v15, %v5132_v10  ;;  %3683 = vrcp.f32 %v1336_v17  ;;  %v1337_v43 = vadd.f32 1.0, %v3668_v53  ;;  %v5288_v60 = vmul.f32 %v5183_v20, %v1671_v7 }
 0x1cd   : > { %v3670_v32 = vpop.eup %3669  ;;  %v1674_v36 = vmul.f32 %v1610_v22, %v5137_v44  ;;  %3685 = vpow2.f32 %v3281_v38  ;;  %v5292_v5 = vadd.f32 %v948_v50, %v5069_v33  ;;  %v5295_v18 = vmul.f32 %v5183_v20, %v1672_v8 }
 0x1ce   : > { %v3672_v62 = vpop.eup %3671  ;;  %v1536_v30 = vmul.f32 %v3670_v32, %v5146_v45  ;;  %3687 = vrcp.f32 %v1337_v43  ;;  %v1729_v10 = vmul.f32 %v5183_v20, %v5208_v55  ;;  %v5300_v52 = vpop.f32.mrb[28].mxu0  ;;  %v5303_v31 = vmul.f32 %v5183_v20, %v1673_v3 }
 0x1cf   : > { %v3674_v49 = vpop.eup %3673  ;;  %v1537_v44 = vmul.f32 %v3672_v62, %v5149_v48  ;;  %3689 = vpow2.f32 %v3282_v21  ;;  %v1087_v50 = vmul.f32 %v5075_v11, %v5292_v5  ;;  %v5308_v34 = vpop.f32.mrb[29].mxu0  ;;  %v5311_v35 = vmul.f32 %v5183_v20, %v1674_v36 }
 0x1d0   : > { %v3676_v29 = vpop.eup %3675  ;;  %v1611_v55 = vadd.f32 %v5156_v59, %v1536_v30  ;;  %v1538_v51 = vmul.f32 %v3674_v49, %v5146_v45  ;;  %v1731_v41 = vmul.f32 %v5183_v20, %v5212_v56  ;;  %v5317_v6 = vpop.f32.mrb[30].mxu0  ;;  %v1794_v53 = vadd.f32 %v5202_v23, %v1729_v10 }
 0x1d1   : > { %v3678_v7 = vpop.eup %3677  ;;  %v1612_v15 = vadd.f32 %v5177_v40, %v1537_v44  ;;  %v1539_v17 = vmul.f32 %v3676_v29, %v5149_v48  ;;  %v3283_v38 = vmul.f32 -1.442695, %v1087_v50  ;;  %v5322_v8 = vpop.f32.mrb[31].mxu0  ;;  %v1793_v49 = vadd.f32 %v5202_v23, %v5205_v46 }
 0x1d2   : > { %v3680_v22 = vpop.eup %3679  ;;  %v1675_v21 = vmul.f32 %v1611_v55, %v5152_v1  ;;  %v1613_v3 = vadd.f32 %v5156_v59, %v1538_v51  ;;  %v1338_v43 = vadd.f32 1.0, %v3678_v7  ;;  %v1796_v56 = vadd.f32 %v5202_v23, %v1731_v41 }
 0x1d3   : > { %v1676_v32 = vmul.f32 %v1612_v15, %v5159_v0  ;;  %v1614_v36 = vadd.f32 %v5177_v40, %v1539_v17  ;;  %v1339_v62 = vadd.f32 1.0, %v3680_v22  ;;  %3691 = vpow2.f32 %v3283_v38 }
 0x1d4   : > { %v1677_v30 = vmul.f32 %v1613_v3, %v5164_v37  ;;  %3693 = vrcp.f32 %v1338_v43  ;;  %v1858_v10 = vpack.c.bf16 %v1796_v56, %v1794_v53  ;;  %v5333_v1 = vmul.f32 %v5183_v20, %v1675_v21 }
 0x1d5   : > { %v3682_v44 = vpop.eup %3681  ;;  %v5336_v50 = vmul.f32 %v5183_v20, %v1676_v32  ;;  %3695 = vrcp.f32 %v1339_v62  ;;  %v1795_v0 = vadd.f32 %v5202_v23, %v5235_v63  ;;  %v1678_v55 = vmul.f32 %v1614_v36, %v5169_v9 }
 0x1d6   : > { %v3684_v29 = vpop.eup %3683  ;;  %v1340_v37 = vadd.f32 1.0, %v3682_v44  ;;  %2125 = vmatprep.mubr.bf16.mxu1 %v1858_v10  ;;  %v5343_v51 = vadd.f32 %v5257_v16, %v5066_v13  ;;  %v5347_v46 = vadd.f32 %v5265_v54, %v5069_v33  ;;  %v5349_v41 = vpop.f32.mrb[32].mxu0  ;;  %v5352_v15 = vmul.f32 %v5183_v20, %v1677_v30 }
 0x1d7   : > { %v3686_v7 = vpop.eup %3685  ;;  %v1540_v63 = vmul.f32 %v3684_v29, %v5146_v45  ;;  %v1857_v17 = vpack.c.bf16 %v1795_v0, %v1793_v49  ;;  %v5357_v9 = vadd.f32 %v5271_v47, %v5066_v13  ;;  %v5359_v38 = vpop.f32.mrb[33].mxu0  ;;  %v5373_v32 = vadd.f32 %v5277_v58, %v5069_v33 }
 0x1d8   : > { %v3688_v16 = vpop.eup %3687  ;;  %3697 = vrcp.f32 %v1340_v37  ;;  %v1341_v53 = vadd.f32 1.0, %v3686_v7  ;;  %v1088_v54 = vmul.f32 %v5072_v42, %v5343_v51  ;;  %v1089_v22 = vmul.f32 %v5075_v11, %v5347_v46  ;;  %v5365_v21 = vpop.f32.mrb[34].mxu0 }
 0x1d9   : > { %v3690_v3 = vpop.eup %3689  ;;  %v1615_v43 = vadd.f32 %v5156_v59, %v1540_v63  ;;  %v1541_v56 = vmul.f32 %v3688_v16, %v5149_v48  ;;  %2126 = vmatmul.mubr.bf16.vlgmr.msra.gmra.mrb[0].mxu1 %v1857_v17  ;;  %v1090_v47 = vmul.f32 %v5072_v42, %v5357_v9  ;;  %v5375_v36 = vpop.f32.mrb[35].mxu0  ;;  %v1091_v29 = vmul.f32 %v5075_v11, %v5373_v32 }
 0x1da   : > { %3699 = vrcp.f32 %v1341_v53  ;;  %v1342_v62 = vadd.f32 1.0, %v3690_v3  ;;  %v3284_v30 = vmul.f32 -1.442695, %v1088_v54  ;;  %v3285_v10 = vmul.f32 -1.442695, %v1089_v22 }
 0x1db   : > { %v1679_v49 = vmul.f32 %v1615_v43, %v5189_v19  ;;  %v1616_v44 = vadd.f32 %v5177_v40, %v1541_v56  ;;  %v3286_v0 = vmul.f32 -1.442695, %v1090_v47  ;;  %v5382_v37 = vmul.f32 %v5183_v20, %v1678_v55 }
 0x1dc   : > { %3701 = vrcp.f32 %v1342_v62  ;;  %v1798_v58 = vadd.f32 %v5202_v23, %v5244_v28  ;;  %v1800_v7 = vadd.f32 %v5202_v23, %v5284_v39  ;;  %v3287_v19 = vmul.f32 -1.442695, %v1091_v29 }
 0x1dd   : > { %v3692_v63 = vpop.eup %3691  ;;  %v1680_v17 = vmul.f32 %v1616_v44, %v5194_v61  ;;  %3703 = vpow2.f32 %v3284_v30  ;;  %v1797_v16 = vadd.f32 %v5202_v23, %v5241_v24  ;;  %v1799_v22 = vadd.f32 %v5202_v23, %v5251_v26 }
 0x1de   : > { %v3694_v53 = vpop.eup %3693  ;;  %v1343_v54 = vadd.f32 1.0, %v3692_v63  ;;  %3705 = vpow2.f32 %v3285_v10  ;;  %v1860_v55 = vpack.c.bf16 %v1800_v7, %v1798_v58  ;;  %v5393_v3 = vpop.f32.mrb[36].mxu0  ;;  %v5396_v39 = vmul.f32 %v5183_v20, %v1679_v49 }
 0x1df   : > { %v3696_v28 = vpop.eup %3695  ;;  %v1542_v61 = vmul.f32 %v3694_v53, %v5146_v45  ;;  %3707 = vpow2.f32 %v3286_v0  ;;  %v5401_v43 = vadd.f32 %v5300_v52, %v5066_v13  ;;  %v5403_v24 = vpop.f32.mrb[37].mxu0  ;;  %v1859_v26 = vpack.c.bf16 %v1799_v22, %v1797_v16 }
 0x1e0   : > { %v1543_v56 = vmul.f32 %v3696_v28, %v5149_v48  ;;  %3709 = vrcp.f32 %v1343_v54  ;;  %2135 = vmatprep.mubr.bf16.mxu1 %v1860_v55  ;;  %v5408_v47 = vadd.f32 %v5308_v34, %v5069_v33  ;;  %v5410_v62 = vpop.f32.mrb[38].mxu0  ;;  %v5417_v10 = vadd.f32 %v5317_v6, %v5066_v13 }
 0x1e1   : > { %v1617_v30 = vadd.f32 %v5156_v59, %v1542_v61  ;;  %3711 = vpow2.f32 %v3287_v19  ;;  %v1092_v52 = vmul.f32 %v5072_v42, %v5401_v43  ;;  %v5419_v49 = vpop.f32.mrb[39].mxu0  ;;  %v5422_v0 = vmul.f32 %v5183_v20, %v1680_v17  ;;  %2136 = vmatmul.mubr.bf16.gmra.mrb[4].mxu1 %v1859_v26 }
 0x1e2   : > { %v3698_v44 = vpop.eup %3697  ;;  %v1618_v34 = vadd.f32 %v5177_v40, %v1543_v56  ;;  %v1093_v29 = vmul.f32 %v5075_v11, %v5408_v47  ;;  %v5429_v58 = vadd.f32 %v5322_v8, %v5069_v33  ;;  %v1094_v19 = vmul.f32 %v5072_v42, %v5417_v10 }
 0x1e3   : > { %v1681_v7 = vmul.f32 %v1617_v30, %v5219_v25  ;;  %v1544_v6 = vmul.f32 %v3698_v44, %v5146_v45  ;;  %v3288_v63 = vmul.f32 -1.442695, %v1092_v52  ;;  %v1802_v54 = vadd.f32 %v5202_v23, %v5295_v18 }
 0x1e4   : > { %v3700_v17 = vpop.eup %3699  ;;  %v1682_v16 = vmul.f32 %v1618_v34, %v5222_v12  ;;  %v3289_v53 = vmul.f32 -1.442695, %v1093_v29  ;;  %v1804_v55 = vadd.f32 %v5202_v23, %v5311_v35  ;;  %v1095_v22 = vmul.f32 %v5075_v11, %v5429_v58 }
 0x1e5   : > { %v1619_v8 = vadd.f32 %v5156_v59, %v1544_v6  ;;  %v1545_v25 = vmul.f32 %v3700_v17, %v5149_v48  ;;  %3713 = vpow2.f32 %v3288_v63  ;;  %v5445_v61 = vmul.f32 %v5183_v20, %v1681_v7 }
 0x1e6   : > { %v3702_v28 = vpop.eup %3701  ;;  %v5448_v12 = vmul.f32 %v5183_v20, %v1682_v16  ;;  %3715 = vpow2.f32 %v3289_v53  ;;  %v3290_v18 = vmul.f32 -1.442695, %v1094_v19  ;;  %v5450_v56 = vpop.f32.mrb[40].mxu0  ;;  %v1862_v44 = vpack.c.bf16 %v1804_v55, %v1802_v54 }
 0x1e7   : > { %v3704_v35 = vpop.eup %3703  ;;  %v1683_v26 = vmul.f32 %v1619_v8, %v5248_v4  ;;  %v1620_v30 = vadd.f32 %v5177_v40, %v1545_v25  ;;  %v1546_v52 = vmul.f32 %v3702_v28, %v5146_v45  ;;  %v5455_v34 = vpop.f32.mrb[41].mxu0  ;;  %v1801_v6 = vadd.f32 %v5202_v23, %v5288_v60 }
 0x1e8   : > { %v3706_v29 = vpop.eup %3705  ;;  %v1344_v7 = vadd.f32 1.0, %v3704_v35  ;;  %3717 = vpow2.f32 %v3290_v18  ;;  %v1803_v63 = vadd.f32 %v5202_v23, %v5303_v31  ;;  %v5461_v19 = vpop.f32.mrb[42].mxu0  ;;  %v3291_v54 = vmul.f32 -1.442695, %v1095_v22  ;;  %2145 = vmatprep.mubr.bf16.mxu1 %v1862_v44 }
 0x1e9   : > { %v3708_v17 = vpop.eup %3707  ;;  %v1684_v4 = vmul.f32 %v1620_v30, %v5255_v57  ;;  %v1621_v16 = vadd.f32 %v5156_v59, %v1546_v52  ;;  %v1345_v53 = vadd.f32 1.0, %v3706_v29  ;;  %v5465_v55 = vpop.f32.mrb[43].mxu0  ;;  %v5469_v60 = vadd.f32 %v5349_v41, %v5066_v13 }
 0x1ea   : > { %v3710_v8 = vpop.eup %3709  ;;  %3719 = vrcp.f32 %v1344_v7  ;;  %v1346_v25 = vadd.f32 1.0, %v3708_v17  ;;  %v1861_v28 = vpack.c.bf16 %v1803_v63, %v1801_v6  ;;  %v5472_v18 = vmul.f32 %v5183_v20, %v1683_v26 }
 0x1eb   : > { %v3712_v31 = vpop.eup %3711  ;;  %v1685_v57 = vmul.f32 %v1621_v16, %v5263_v14  ;;  %v1547_v35 = vmul.f32 %v3710_v8, %v5149_v48  ;;  %3721 = vrcp.f32 %v1345_v53  ;;  %v1096_v30 = vmul.f32 %v5072_v42, %v5469_v60 }
 0x1ec   : > { %3723 = vrcp.f32 %v1346_v25  ;;  %v1347_v22 = vadd.f32 1.0, %v3712_v31  ;;  %2146 = vmatmul.mubr.bf16.gmra.mrb[8].mxu1 %v1861_v28  ;;  %v5480_v52 = vadd.f32 %v5359_v38, %v5069_v33  ;;  %v5483_v41 = vmul.f32 %v5183_v20, %v1684_v4 }
 0x1ed   : > { %v1622_v26 = vadd.f32 %v5177_v40, %v1547_v35  ;;  %3725 = vpow2.f32 %v3291_v54  ;;  %v5488_v14 = vadd.f32 %v5365_v21, %v5066_v13  ;;  %v3292_v44 = vmul.f32 -1.442695, %v1096_v30 }
 0x1ee   : > { %3727 = vrcp.f32 %v1347_v22  ;;  %v1097_v29 = vmul.f32 %v5075_v11, %v5480_v52  ;;  %v5494_v7 = vadd.f32 %v5375_v36, %v5069_v33  ;;  %v5496_v38 = vpop.f32.mrb[44].mxu0  ;;  %v5499_v63 = vmul.f32 %v5183_v20, %v1685_v57 }
 0x1ef   : > { %v3714_v6 = vpop.eup %3713  ;;  %v1098_v17 = vmul.f32 %v5072_v42, %v5488_v14  ;;  %v1806_v21 = vadd.f32 %v5202_v23, %v5336_v50  ;;  %v1808_v4 = vadd.f32 %v5202_v23, %v5382_v37  ;;  %v5507_v16 = vpop.f32.mrb[45].mxu0  ;;  %3729 = vpow2.f32 %v3292_v44 }
 0x1f0   : > { %v3716_v53 = vpop.eup %3715  ;;  %v1348_v36 = vadd.f32 1.0, %v3714_v6  ;;  %v3293_v54 = vmul.f32 -1.442695, %v1097_v29  ;;  %v1099_v8 = vmul.f32 %v5075_v11, %v5494_v7  ;;  %v5511_v25 = vpop.f32.mrb[46].mxu0  ;;  %v1686_v28 = vmul.f32 %v1622_v26, %v5292_v5 }
 0x1f1   : > { %v1349_v31 = vadd.f32 1.0, %v3716_v53  ;;  %v3294_v57 = vmul.f32 -1.442695, %v1098_v17  ;;  %v1864_v35 = vpack.c.bf16 %v1808_v4, %v1806_v21  ;;  %v5514_v50 = vpop.f32.mrb[47].mxu0  ;;  %v1805_v30 = vadd.f32 %v5202_v23, %v5333_v1 }
 0x1f2   : > { %v3718_v22 = vpop.eup %3717  ;;  %3731 = vrcp.f32 %v1348_v36  ;;  %v3295_v37 = vmul.f32 -1.442695, %v1099_v8  ;;  %v1807_v44 = vadd.f32 %v5202_v23, %v5352_v15  ;;  %v5522_v5 = vadd.f32 %v5393_v3, %v5066_v13 }
 0x1f3   : > { %3733 = vrcp.f32 %v1349_v31  ;;  %v1350_v29 = vadd.f32 1.0, %v3718_v22  ;;  %2155 = vmatprep.mubr.bf16.mxu1 %v1864_v35  ;;  %v5526_v26 = vadd.f32 %v5403_v24, %v5069_v33  ;;  %v5530_v1 = vadd.f32 %v5410_v62, %v5066_v13 }
 0x1f4   : > { %v3720_v6 = vpop.eup %3719  ;;  %3735 = vpow2.f32 %v3293_v54  ;;  %v1863_v17 = vpack.c.bf16 %v1807_v44, %v1805_v30  ;;  %v5534_v15 = vadd.f32 %v5419_v49, %v5069_v33  ;;  %v1100_v3 = vmul.f32 %v5072_v42, %v5522_v5 }
 0x1f5   : > { %v3722_v21 = vpop.eup %3721  ;;  %v1548_v4 = vmul.f32 %v3720_v6, %v5146_v45  ;;  %3737 = vrcp.f32 %v1350_v29  ;;  %v1101_v24 = vmul.f32 %v5075_v11, %v5526_v26  ;;  %v1102_v62 = vmul.f32 %v5072_v42, %v5530_v1 }
 0x1f6   : > { %6824 = vst [vmem:[#allocation18_spill] sm:$0xff] %v5534_v15  ;;  %v3724_v53 = vpop.eup %3723  ;;  %v1549_v36 = vmul.f32 %v3722_v21, %v5149_v48  ;;  %3739 = vpow2.f32 %v3294_v57  ;;  %2156 = vmatmul.mubr.bf16.gmra.mrb[12].mxu1 %v1863_v17  ;;  %v1103_v49 = vmul.f32 %v5075_v11, %v5534_v15  ;;  %v5546_v54 = vpop.f32.mrb[48].mxu0  ;;  %v3296_v22 = vmul.f32 -1.442695, %v1100_v3 }
 0x1f7   : > { %v3726_v8 = vpop.eup %3725  ;;  %v1623_v31 = vadd.f32 %v5156_v59, %v1548_v4  ;;  %v1550_v35 = vmul.f32 %v3724_v53, %v5146_v45  ;;  %3741 = vpow2.f32 %v3295_v37  ;;  %v5550_v30 = vpop.f32.mrb[49].mxu0  ;;  %v5553_v57 = vmul.f32 %v5183_v20, %v1686_v28 }
 0x1f8   : > { %v3728_v44 = vpop.eup %3727  ;;  %v1624_v29 = vadd.f32 %v5177_v40, %v1549_v36  ;;  %v1351_v6 = vadd.f32 1.0, %v3726_v8  ;;  %v3297_v17 = vmul.f32 -1.442695, %v1101_v24  ;;  %v5556_v21 = vpop.f32.mrb[50].mxu0  ;;  %3743 = vpow2.f32 %v3296_v22 }
 0x1f9   : > { %v1687_v2 = vmul.f32 %v1623_v31, %v5343_v51  ;;  %v1625_v4 = vadd.f32 %v5156_v59, %v1550_v35  ;;  %v1551_v53 = vmul.f32 %v3728_v44, %v5149_v48  ;;  %v5561_v37 = vpop.f32.mrb[51].mxu0  ;;  %v3730_v3 = vpop.eup %3729  ;;  %v3298_v28 = vmul.f32 -1.442695, %v1102_v62 }
 0x1fa   : > { %v1688_v27 = vmul.f32 %v1624_v29, %v5347_v46  ;;  %3745 = vrcp.f32 %v1351_v6  ;;  %v3299_v15 = vmul.f32 -1.442695, %v1103_v49  ;;  %v1352_v8 = vadd.f32 1.0, %v3730_v3 }
 0x1fb   : > { %v1689_v36 = vmul.f32 %v1625_v4, %v5357_v9  ;;  %v1626_v24 = vadd.f32 %v5177_v40, %v1551_v53  ;;  %v1810_v51 = vadd.f32 %v5202_v23, %v5422_v0  ;;  %v5569_v35 = vmul.f32 %v5183_v20, %v1687_v2 }
 0x1fc   : > { %v3732_v31 = vpop.eup %3731  ;;  %v5572_v22 = vmul.f32 %v5183_v20, %v1688_v27  ;;  %3747 = vpow2.f32 %v3297_v17  ;;  %v1812_v46 = vadd.f32 %v5202_v23, %v5448_v12  ;;  %v1809_v0 = vadd.f32 %v5202_v23, %v5396_v39 }
 0x1fd   : > { %v3734_v62 = vpop.eup %3733  ;;  %v5577_v9 = vmul.f32 %v5183_v20, %v1689_v36  ;;  %v1552_v49 = vmul.f32 %v3732_v31, %v5146_v45  ;;  %3749 = vrcp.f32 %v1352_v8  ;;  %v1811_v29 = vadd.f32 %v5202_v23, %v5445_v61 }
 0x1fe   : > { %v3736_v44 = vpop.eup %3735  ;;  %v1553_v2 = vmul.f32 %v3734_v62, %v5149_v48  ;;  %3751 = vpow2.f32 %v3298_v28  ;;  %v1866_v27 = vpack.c.bf16 %v1812_v46, %v1810_v51  ;;  %v5585_v6 = vpop.f32.mrb[52].mxu0  ;;  %v1690_v17 = vmul.f32 %v1626_v24, %v5373_v32 }
 0x1ff   : > { %v3738_v12 = vpop.eup %3737  ;;  %v1627_v4 = vadd.f32 %v5156_v59, %v1552_v49  ;;  %v1353_v53 = vadd.f32 1.0, %v3736_v44  ;;  %3753 = vpow2.f32 %v3299_v15  ;;  %v5589_v3 = vpop.f32.mrb[53].mxu0  ;;  %v1865_v8 = vpack.c.bf16 %v1811_v29, %v1809_v0 }
 0x200   : > { %v3740_v39 = vpop.eup %3739  ;;  %v1628_v36 = vadd.f32 %v5177_v40, %v1553_v2  ;;  %v1554_v28 = vmul.f32 %v3738_v12, %v5146_v45  ;;  %2165 = vmatprep.mubr.bf16.mxu1 %v1866_v27  ;;  %v5595_v61 = vadd.f32 %v5450_v56, %v5066_v13  ;;  %v5597_v51 = vpop.f32.mrb[54].mxu0  ;;  %v5602_v31 = vadd.f32 %v5455_v34, %v5069_v33 }
 0x201   : > { %v3742_v32 = vpop.eup %3741  ;;  %v1691_v24 = vmul.f32 %v1627_v4, %v5401_v43  ;;  %3755 = vrcp.f32 %v1353_v53  ;;  %v1354_v15 = vadd.f32 1.0, %v3740_v39  ;;  %v5604_v46 = vpop.f32.mrb[55].mxu0  ;;  %2166 = vmatmul.mubr.bf16.gmra.mrb[16].mxu1 %v1865_v8  ;;  %v5611_v43 = vmul.f32 %v5183_v20, %v1690_v17 }
 0x202   : > { %v1692_v62 = vmul.f32 %v1628_v36, %v5408_v47  ;;  %v1629_v49 = vadd.f32 %v5156_v59, %v1554_v28  ;;  %v1355_v0 = vadd.f32 1.0, %v3742_v32  ;;  %v1104_v56 = vmul.f32 %v5072_v42, %v5595_v61  ;;  %v3744_v44 = vpop.eup %3743 }
 0x203   : > { %3757 = vrcp.f32 %v1354_v15  ;;  %v1105_v34 = vmul.f32 %v5075_v11, %v5602_v31  ;;  %v5617_v2 = vadd.f32 %v5461_v19, %v5066_v13  ;;  %v5620_v27 = vmul.f32 %v5183_v20, %v1691_v24 }
 0x204   : > { %v3746_v47 = vpop.eup %3745  ;;  %v1693_v29 = vmul.f32 %v1629_v49, %v5417_v10  ;;  %3759 = vrcp.f32 %v1355_v0  ;;  %v1356_v12 = vadd.f32 1.0, %v3744_v44  ;;  %v3300_v17 = vmul.f32 -1.442695, %v1104_v56 }
 0x205   : > { %v1555_v4 = vmul.f32 %v3746_v47, %v5149_v48  ;;  %v3301_v53 = vmul.f32 -1.442695, %v1105_v34  ;;  %v1106_v39 = vmul.f32 %v5072_v42, %v5617_v2  ;;  %v5627_v28 = vmul.f32 %v5183_v20, %v1692_v62 }
 0x206   : > { %v3748_v36 = vpop.eup %3747  ;;  %v5630_v19 = vmul.f32 %v5183_v20, %v1693_v29  ;;  %3761 = vrcp.f32 %v1356_v12  ;;  %v5634_v10 = vadd.f32 %v5465_v55, %v5069_v33  ;;  %v5636_v8 = vpop.f32.mrb[56].mxu0  ;;  %v1816_v55 = vadd.f32 %v5202_v23, %v5553_v57 }
 0x207   : > { %v3750_v32 = vpop.eup %3749  ;;  %v1630_v24 = vadd.f32 %v5177_v40, %v1555_v4  ;;  %v1357_v15 = vadd.f32 1.0, %v3748_v36  ;;  %3763 = vpow2.f32 %v3300_v17  ;;  %v3302_v49 = vmul.f32 -1.442695, %v1106_v39  ;;  %v5639_v0 = vpop.f32.mrb[57].mxu0 }
 0x208   : > { %v3752_v62 = vpop.eup %3751  ;;  %v1556_v56 = vmul.f32 %v3750_v32, %v5146_v45  ;;  %3765 = vpow2.f32 %v3301_v53  ;;  %v1107_v44 = vmul.f32 %v5075_v11, %v5634_v10  ;;  %v5646_v34 = vpop.f32.mrb[58].mxu0  ;;  %v1814_v4 = vadd.f32 %v5202_v23, %v5483_v41 }
 0x209   : > { %6825 = vst [vmem:[#allocation20_spill] sm:$0xff] %v5646_v34  ;;  %v3754_v47 = vpop.eup %3753  ;;  %v1694_v29 = vmul.f32 %v1630_v24, %v5429_v58  ;;  %3767 = vrcp.f32 %v1357_v15  ;;  %v1358_v12 = vadd.f32 1.0, %v3752_v62  ;;  %v5651_v17 = vpop.f32.mrb[59].mxu0  ;;  %v1813_v34 = vadd.f32 %v5202_v23, %v5472_v18 }
 0x20a   : > { %v1631_v53 = vadd.f32 %v5156_v59, %v1556_v56  ;;  %v1359_v39 = vadd.f32 1.0, %v3754_v47  ;;  %3769 = vpow2.f32 %v3302_v49  ;;  %v3303_v36 = vmul.f32 -1.442695, %v1107_v44 }
 0x20b   : > { %v3756_v32 = vpop.eup %3755  ;;  %3771 = vrcp.f32 %v1358_v12  ;;  %v1868_v57 = vpack.c.bf16 %v1816_v55, %v1814_v4  ;;  %v1815_v58 = vadd.f32 %v5202_v23, %v5499_v63  ;;  %v5662_v15 = vadd.f32 %v5496_v38, %v5066_v13 }
 0x20c   : > { %v1695_v24 = vmul.f32 %v1631_v53, %v5469_v60  ;;  %v1557_v41 = vmul.f32 %v3756_v32, %v5149_v48  ;;  %3773 = vrcp.f32 %v1359_v39  ;;  %v5666_v56 = vadd.f32 %v5507_v16, %v5069_v33 }
 0x20d   : > { %v3758_v49 = vpop.eup %3757  ;;  %3775 = vpow2.f32 %v3303_v36  ;;  %2175 = vmatprep.mubr.bf16.mxu1 %v1868_v57  ;;  %v1867_v62 = vpack.c.bf16 %v1815_v58, %v1813_v34  ;;  %v5670_v18 = vadd.f32 %v5511_v25, %v5066_v13  ;;  %v5673_v63 = vmul.f32 %v5183_v20, %v1694_v29 }
 0x20e   : > { %v3760_v60 = vpop.eup %3759  ;;  %v1632_v44 = vadd.f32 %v5177_v40, %v1557_v41  ;;  %v1558_v38 = vmul.f32 %v3758_v49, %v5146_v45  ;;  %v1108_v55 = vmul.f32 %v5072_v42, %v5662_v15  ;;  %v5679_v34 = vpop.f32.mrb[60].mxu0  ;;  %v5682_v16 = vmul.f32 %v5183_v20, %v1695_v24 }
 0x20f   : > { %v1559_v47 = vmul.f32 %v3760_v60, %v5149_v48  ;;  %2176 = vmatmul.mubr.bf16.gmra.mrb[20].mxu1 %v1867_v62  ;;  %v1109_v25 = vmul.f32 %v5075_v11, %v5666_v56  ;;  %v1110_v29 = vmul.f32 %v5072_v42, %v5670_v18  ;;  %v5689_v12 = vpop.f32.mrb[61].mxu0  ;;  %v5695_v32 = vadd.f32 %v5514_v50, %v5069_v33 }
 0x210   : > { %6826 = vst [vmem:[#allocation21_spill] sm:$0xff] %v5689_v12  ;;  %v3762_v4 = vpop.eup %3761  ;;  %v1696_v53 = vmul.f32 %v1632_v44, %v5480_v52  ;;  %v1633_v39 = vadd.f32 %v5156_v59, %v1558_v38  ;;  %v3304_v36 = vmul.f32 -1.442695, %v1108_v55  ;;  %v5697_v57 = vpop.f32.mrb[62].mxu0  ;;  %v1818_v62 = vadd.f32 %v5202_v23, %v5572_v22 }
 0x211   : > { %6827 = vst [vmem:[#allocation22_spill] sm:$0xff] %v5697_v57  ;;  %v3764_v58 = vpop.eup %3763  ;;  %v1634_v24 = vadd.f32 %v5177_v40, %v1559_v47  ;;  %v1560_v41 = vmul.f32 %v3762_v4, %v5146_v45  ;;  %v3305_v49 = vmul.f32 -1.442695, %v1109_v25  ;;  %v5703_v60 = vpop.f32.mrb[63].mxu0  ;;  %v3306_v50 = vmul.f32 -1.442695, %v1110_v29 }
 0x212   : > { %v3766_v52 = vpop.eup %3765  ;;  %v1697_v44 = vmul.f32 %v1633_v39, %v5488_v14  ;;  %v1360_v38 = vadd.f32 1.0, %v3764_v58  ;;  %3777 = vpow2.f32 %v3304_v36  ;;  %v5709_v25 = vmul.f32 %v5183_v20, %v1696_v53 }
 0x213   : > { %v3768_v55 = vpop.eup %3767  ;;  %v1698_v57 = vmul.f32 %v1634_v24, %v5494_v7  ;;  %v1635_v12 = vadd.f32 %v5156_v59, %v1560_v41  ;;  %v1361_v47 = vadd.f32 1.0, %v3766_v52  ;;  %3779 = vpow2.f32 %v3305_v49 }
 0x214   : > { %v3770_v4 = vpop.eup %3769  ;;  %v1561_v22 = vmul.f32 %v3768_v55, %v5149_v48  ;;  %3781 = vrcp.f32 %v1360_v38  ;;  %v1111_v14 = vmul.f32 %v5075_v11, %v5695_v32  ;;  %v5715_v29 = vmul.f32 %v5183_v20, %v1697_v44 }
 0x215   : > { %v3772_v39 = vpop.eup %3771  ;;  %v1699_v7 = vmul.f32 %v1635_v12, %v5522_v5  ;;  %3783 = vrcp.f32 %v1361_v47  ;;  %v1362_v36 = vadd.f32 1.0, %v3770_v4  ;;  %v5721_v52 = vmul.f32 %v5183_v20, %v1698_v57 }
 0x216   : > { %v3774_v58 = vpop.eup %3773  ;;  %v1636_v24 = vadd.f32 %v5177_v40, %v1561_v22  ;;  %v1562_v53 = vmul.f32 %v3772_v39, %v5146_v45  ;;  %3785 = vpow2.f32 %v3306_v50  ;;  %v3307_v41 = vmul.f32 -1.442695, %v1111_v14 }
 0x217   : > { %v3776_v49 = vpop.eup %3775  ;;  %v1563_v38 = vmul.f32 %v3774_v58, %v5149_v48  ;;  %3787 = vrcp.f32 %v1362_v36  ;;  %v1820_v44 = vadd.f32 %v5202_v23, %v5611_v43  ;;  %v1817_v4 = vadd.f32 %v5202_v23, %v5569_v35 }
 0x218   : > { %v1700_v5 = vmul.f32 %v1636_v24, %v5526_v26  ;;  %v1637_v12 = vadd.f32 %v5156_v59, %v1562_v53  ;;  %v1363_v55 = vadd.f32 1.0, %v3776_v49  ;;  %3789 = vpow2.f32 %v3307_v41 }
 0x219   : > { %v1638_v47 = vadd.f32 %v5177_v40, %v1563_v38  ;;  %v1870_v50 = vpack.c.bf16 %v1820_v44, %v1818_v62  ;;  %v1819_v57 = vadd.f32 %v5202_v23, %v5577_v9  ;;  %v5734_v22 = vmul.f32 %v5183_v20, %v1699_v7  ;;  %v6828_v7 = vld [vmem:[#allocation18_spill] sm:$0xff] }
 0x21a   : > { %v1701_v43 = vmul.f32 %v1637_v12, %v5530_v1  ;;  %3791 = vrcp.f32 %v1363_v55  ;;  %v5739_v26 = vadd.f32 %v5546_v54, %v5066_v13  ;;  %v5742_v14 = vmul.f32 %v5183_v20, %v1700_v5 }
 0x21b   : > { %2185 = vmatprep.mubr.bf16.mxu1 %v1870_v50  ;;  %v1869_v62 = vpack.c.bf16 %v1819_v57, %v1817_v4  ;;  %v5746_v35 = vadd.f32 %v5550_v30, %v5069_v33  ;;  %v5750_v9 = vadd.f32 %v5556_v21, %v5066_v13  ;;  %v1702_v54 = vmul.f32 %v1638_v47, %v6828_v7 }
 0x21c   : > { %v3778_v39 = vpop.eup %3777  ;;  %v5753_v1 = vmul.f32 %v5183_v20, %v1701_v43  ;;  %v1112_v36 = vmul.f32 %v5072_v42, %v5739_v26  ;;  %v5760_v58 = vadd.f32 %v5561_v37, %v5069_v33  ;;  %v1822_v41 = vadd.f32 %v5202_v23, %v5627_v28 }
 0x21d   : > { %v3780_v24 = vpop.eup %3779  ;;  %v1364_v30 = vadd.f32 1.0, %v3778_v39  ;;  %2186 = vmatmul.mubr.bf16.gmra.mrb[24].mxu1 %v1869_v62  ;;  %v1113_v21 = vmul.f32 %v5075_v11, %v5746_v35  ;;  %v1114_v53 = vmul.f32 %v5072_v42, %v5750_v9  ;;  %v1824_v37 = vadd.f32 %v5202_v23, %v5673_v63 }
 0x21e   : > { %v3782_v49 = vpop.eup %3781  ;;  %v1365_v38 = vadd.f32 1.0, %v3780_v24  ;;  %v3308_v44 = vmul.f32 -1.442695, %v1112_v36  ;;  %v1115_v5 = vmul.f32 %v5075_v11, %v5760_v58  ;;  %v1821_v63 = vadd.f32 %v5202_v23, %v5620_v27 }
 0x21f   : > { %v3784_v12 = vpop.eup %3783  ;;  %v1564_v55 = vmul.f32 %v3782_v49, %v5146_v45  ;;  %3793 = vrcp.f32 %v1364_v30  ;;  %v3309_v47 = vmul.f32 -1.442695, %v1113_v21  ;;  %v3310_v50 = vmul.f32 -1.442695, %v1114_v53 }
 0x220   : > { %v3786_v4 = vpop.eup %3785  ;;  %v1565_v57 = vmul.f32 %v3784_v12, %v5149_v48  ;;  %3795 = vrcp.f32 %v1365_v38  ;;  %v3311_v28 = vmul.f32 -1.442695, %v1115_v5  ;;  %v1872_v43 = vpack.c.bf16 %v1824_v37, %v1822_v41 }
 0x221   : > { %v3788_v62 = vpop.eup %3787  ;;  %v1639_v39 = vadd.f32 %v5156_v59, %v1564_v55  ;;  %v1366_v7 = vadd.f32 1.0, %v3786_v4  ;;  %3797 = vpow2.f32 %v3308_v44  ;;  %v1823_v21 = vadd.f32 %v5202_v23, %v5630_v19 }
 0x222   : > { %v3790_v36 = vpop.eup %3789  ;;  %v1640_v24 = vadd.f32 %v5177_v40, %v1565_v57  ;;  %v1566_v30 = vmul.f32 %v3788_v62, %v5146_v45  ;;  %3799 = vpow2.f32 %v3309_v47  ;;  %2195 = vmatprep.mubr.bf16.mxu1 %v1872_v43  ;;  %v5784_v49 = vadd.f32 %v5585_v6, %v5066_v13 }
 0x223   : > { %v1703_v53 = vmul.f32 %v1639_v39, %v5595_v61  ;;  %3801 = vrcp.f32 %v1366_v7  ;;  %v1367_v41 = vadd.f32 1.0, %v3790_v36  ;;  %v1871_v5 = vpack.c.bf16 %v1823_v21, %v1821_v63 }
 0x224   : > { %v3792_v38 = vpop.eup %3791  ;;  %v1704_v27 = vmul.f32 %v1640_v24, %v5602_v31  ;;  %v1641_v44 = vadd.f32 %v5156_v59, %v1566_v30  ;;  %3803 = vpow2.f32 %v3310_v50  ;;  %v5789_v37 = vmul.f32 %v5183_v20, %v1702_v54 }
 0x225   : > { %v1567_v19 = vmul.f32 %v3792_v38, %v5149_v48  ;;  %3805 = vrcp.f32 %v1367_v41  ;;  %v1116_v61 = vmul.f32 %v5072_v42, %v5784_v49  ;;  %v5795_v12 = vmul.f32 %v5183_v20, %v1703_v53  ;;  %2196 = vmatmul.mubr.bf16.gmra.mrb[28].mxu1 %v1871_v5 }
 0x226   : > { %v1705_v6 = vmul.f32 %v1641_v44, %v5617_v2  ;;  %3807 = vpow2.f32 %v3311_v28  ;;  %v5800_v31 = vadd.f32 %v5589_v3, %v5069_v33  ;;  %v5805_v47 = vadd.f32 %v5597_v51, %v5066_v13 }
 0x227   : > { %v1642_v54 = vadd.f32 %v5177_v40, %v1567_v19  ;;  %v3312_v55 = vmul.f32 -1.442695, %v1116_v61  ;;  %v5809_v50 = vadd.f32 %v5604_v46, %v5069_v33  ;;  %v5812_v4 = vmul.f32 %v5183_v20, %v1704_v27 }
 0x228   : > { %v1117_v2 = vmul.f32 %v5075_v11, %v5800_v31  ;;  %v1826_v3 = vadd.f32 %v5202_v23, %v5709_v25  ;;  %v1828_v57 = vadd.f32 %v5202_v23, %v5721_v52  ;;  %v5821_v51 = vmul.f32 %v5183_v20, %v1705_v6 }
 0x229   : > { %v3794_v28 = vpop.eup %3793  ;;  %3809 = vpow2.f32 %v3312_v55  ;;  %v1118_v46 = vmul.f32 %v5072_v42, %v5805_v47  ;;  %v1119_v43 = vmul.f32 %v5075_v11, %v5809_v50  ;;  %v1706_v39 = vmul.f32 %v1642_v54, %v5634_v10 }
 0x22a   : > { %v3796_v62 = vpop.eup %3795  ;;  %v1568_v7 = vmul.f32 %v3794_v28, %v5146_v45  ;;  %v3313_v25 = vmul.f32 -1.442695, %v1117_v2  ;;  %v1874_v63 = vpack.c.bf16 %v1828_v57, %v1826_v3  ;;  %v1825_v21 = vadd.f32 %v5202_v23, %v5682_v16 }
 0x22b   : > { %v3798_v36 = vpop.eup %3797  ;;  %v1569_v52 = vmul.f32 %v3796_v62, %v5149_v48  ;;  %v3314_v24 = vmul.f32 -1.442695, %v1118_v46  ;;  %v3315_v30 = vmul.f32 -1.442695, %v1119_v43  ;;  %v1827_v10 = vadd.f32 %v5202_v23, %v5715_v29 }
 0x22c   : > { %v3800_v53 = vpop.eup %3799  ;;  %v1643_v41 = vadd.f32 %v5156_v59, %v1568_v7  ;;  %v1368_v38 = vadd.f32 1.0, %v3798_v36  ;;  %3811 = vpow2.f32 %v3313_v25  ;;  %2205 = vmatprep.mubr.bf16.mxu1 %v1874_v63  ;;  %v5838_v19 = vadd.f32 %v5636_v8, %v5066_v13 }
 0x22d   : > { %v3802_v27 = vpop.eup %3801  ;;  %v1644_v44 = vadd.f32 %v5177_v40, %v1569_v52  ;;  %v1369_v5 = vadd.f32 1.0, %v3800_v53  ;;  %3813 = vpow2.f32 %v3314_v24  ;;  %v1873_v54 = vpack.c.bf16 %v1827_v10, %v1825_v21 }
 0x22e   : > { %v3804_v61 = vpop.eup %3803  ;;  %v1707_v16 = vmul.f32 %v1643_v41, %v5662_v15  ;;  %v1570_v6 = vmul.f32 %v3802_v27, %v5146_v45  ;;  %3815 = vrcp.f32 %v1368_v38  ;;  %v5843_v2 = vmul.f32 %v5183_v20, %v1706_v39 }
 0x22f   : > { %v3806_v55 = vpop.eup %3805  ;;  %3817 = vrcp.f32 %v1369_v5  ;;  %v1370_v29 = vadd.f32 1.0, %v3804_v61  ;;  %v1120_v3 = vmul.f32 %v5072_v42, %v5838_v19  ;;  %v1708_v8 = vmul.f32 %v1644_v44, %v5666_v56  ;;  %2206 = vmatmul.mubr.bf16.gmra.mrb[32].mxu1 %v1873_v54  ;;  %v6829_v56 = vld [vmem:[#allocation20_spill] sm:$0xff] }
 0x230   : > { %v3808_v57 = vpop.eup %3807  ;;  %v1645_v28 = vadd.f32 %v5156_v59, %v1570_v6  ;;  %v1571_v15 = vmul.f32 %v3806_v55, %v5149_v48  ;;  %3819 = vpow2.f32 %v3315_v30  ;;  %v5851_v46 = vmul.f32 %v5183_v20, %v1707_v16 }
 0x231   : > { %3821 = vrcp.f32 %v1370_v29  ;;  %v1371_v43 = vadd.f32 1.0, %v3808_v57  ;;  %v3316_v62 = vmul.f32 -1.442695, %v1120_v3  ;;  %v5857_v25 = vadd.f32 %v5639_v0, %v5069_v33  ;;  %v6830_v3 = vld [vmem:[#allocation21_spill] sm:$0xff] }
 0x232   : > { %v1709_v39 = vmul.f32 %v1645_v28, %v5670_v18  ;;  %v1646_v7 = vadd.f32 %v5177_v40, %v1571_v15  ;;  %v5861_v63 = vadd.f32 %v6829_v56, %v5066_v13  ;;  %v5865_v52 = vadd.f32 %v5651_v17, %v5069_v33  ;;  %v6831_v28 = vld [vmem:[#allocation22_spill] sm:$0xff] }
 0x233   : > { %v3810_v36 = vpop.eup %3809  ;;  %3823 = vrcp.f32 %v1371_v43  ;;  %v1830_v24 = vadd.f32 %v5202_v23, %v5742_v14  ;;  %v1832_v18 = vadd.f32 %v5202_v23, %v5789_v37  ;;  %v5872_v30 = vmul.f32 %v5183_v20, %v1708_v8 }
 0x234   : > { %v5875_v0 = vmul.f32 %v5183_v20, %v1709_v39  ;;  %v1372_v21 = vadd.f32 1.0, %v3810_v36  ;;  %3825 = vpow2.f32 %v3316_v62  ;;  %v1121_v53 = vmul.f32 %v5075_v11, %v5857_v25 }
 0x235   : > { %v1122_v17 = vmul.f32 %v5072_v42, %v5861_v63  ;;  %v1123_v14 = vmul.f32 %v5075_v11, %v5865_v52  ;;  %v1876_v41 = vpack.c.bf16 %v1832_v18, %v1830_v24  ;;  %v1710_v37 = vmul.f32 %v1646_v7, %v5695_v32 }
 0x236   : > { %v3812_v38 = vpop.eup %3811  ;;  %3827 = vrcp.f32 %v1372_v21  ;;  %v1829_v10 = vadd.f32 %v5202_v23, %v5734_v22  ;;  %v1831_v27 = vadd.f32 %v5202_v23, %v5753_v1  ;;  %v3317_v61 = vmul.f32 -1.442695, %v1121_v53 }
 0x237   : > { %v3814_v44 = vpop.eup %3813  ;;  %v1373_v5 = vadd.f32 1.0, %v3812_v38  ;;  %v3318_v16 = vmul.f32 -1.442695, %v1122_v17  ;;  %2215 = vmatprep.mubr.bf16.mxu1 %v1876_v41  ;;  %v5890_v6 = vadd.f32 %v5679_v34, %v5066_v13  ;;  %v3319_v29 = vmul.f32 -1.442695, %v1123_v14 }
 0x238   : > { %v3816_v54 = vpop.eup %3815  ;;  %v1374_v55 = vadd.f32 1.0, %v3814_v44  ;;  %v1875_v32 = vpack.c.bf16 %v1831_v27, %v1829_v10  ;;  %v5894_v57 = vadd.f32 %v6830_v3, %v5069_v33  ;;  %v5901_v15 = vadd.f32 %v6831_v28, %v5066_v13 }
 0x239   : > { %v3818_v22 = vpop.eup %3817  ;;  %v1572_v1 = vmul.f32 %v3816_v54, %v5146_v45  ;;  %3829 = vrcp.f32 %v1373_v5  ;;  %v1124_v8 = vmul.f32 %v5072_v42, %v5890_v6  ;;  %v5908_v39 = vadd.f32 %v5703_v60, %v5069_v33 }
 0x23a   : > { %v3820_v34 = vpop.eup %3819  ;;  %v1573_v43 = vmul.f32 %v3818_v22, %v5149_v48  ;;  %3831 = vrcp.f32 %v1374_v55  ;;  %2216 = vmatmul.mubr.bf16.gmra.mrb[36].mxu1 %v1875_v32  ;;  %v1125_v62 = vmul.f32 %v5075_v11, %v5894_v57  ;;  %v1126_v33 = vmul.f32 %v5072_v42, %v5901_v15 }
 0x23b   : > { %v3822_v7 = vpop.eup %3821  ;;  %v1647_v56 = vadd.f32 %v5156_v59, %v1572_v1  ;;  %v1375_v36 = vadd.f32 1.0, %v3820_v34  ;;  %3833 = vpow2.f32 %v3317_v61  ;;  %v3320_v24 = vmul.f32 -1.442695, %v1124_v8 }
 0x23c   : > { %v1648_v13 = vadd.f32 %v5177_v40, %v1573_v43  ;;  %v1574_v18 = vmul.f32 %v3822_v7, %v5146_v45  ;;  %3835 = vpow2.f32 %v3318_v16  ;;  %v3321_v21 = vmul.f32 -1.442695, %v1125_v62 }
 0x23d   : > { %v3824_v53 = vpop.eup %3823  ;;  %v1711_v17 = vmul.f32 %v1647_v56, %v5739_v26  ;;  %3837 = vrcp.f32 %v1375_v36  ;;  %v1127_v60 = vmul.f32 %v5075_v11, %v5908_v39  ;;  %v1775_v27 = vmul.f32 %v5183_v20, %v1710_v37 }
 0x23e   : > { %v3826_v14 = vpop.eup %3825  ;;  %v1712_v41 = vmul.f32 %v1648_v13, %v5746_v35  ;;  %v1649_v38 = vadd.f32 %v5156_v59, %v1574_v18  ;;  %v1575_v10 = vmul.f32 %v3824_v53, %v5149_v48  ;;  %3839 = vpow2.f32 %v3319_v29 }
 0x23f   : > { %v1376_v44 = vadd.f32 1.0, %v3826_v14  ;;  %3841 = vpow2.f32 %v3320_v24  ;;  %v3322_v26 = vmul.f32 -1.442695, %v1126_v33  ;;  %v5923_v61 = vmul.f32 %v5183_v20, %v1711_v17 }
 0x240   : > { %v3828_v5 = vpop.eup %3827  ;;  %v1777_v42 = vmul.f32 %v5183_v20, %v1712_v41  ;;  %v1650_v11 = vadd.f32 %v5177_v40, %v1575_v10  ;;  %3843 = vpow2.f32 %v3321_v21  ;;  %v1713_v35 = vmul.f32 %v1649_v38, %v5750_v9 }
 0x241   : > { %v1576_v16 = vmul.f32 %v3828_v5, %v5146_v45  ;;  %3845 = vrcp.f32 %v1376_v44  ;;  %v3323_v54 = vmul.f32 -1.442695, %v1127_v60  ;;  %v1834_v55 = vadd.f32 %v5202_v23, %v5812_v4 }
 0x242   : > { %v1714_v37 = vmul.f32 %v1650_v11, %v5760_v58  ;;  %3847 = vpow2.f32 %v3322_v26  ;;  %v1836_v29 = vadd.f32 %v5202_v23, %v5843_v2  ;;  %v1833_v9 = vadd.f32 %v5202_v23, %v5795_v12 }
 0x243   : > { %v3830_v32 = vpop.eup %3829  ;;  %v1651_v3 = vadd.f32 %v5156_v59, %v1576_v16  ;;  %3849 = vpow2.f32 %v3323_v54  ;;  %v1835_v22 = vadd.f32 %v5202_v23, %v5821_v51  ;;  %v1838_v4 = vadd.f32 %v5202_v23, %v5872_v30 }
 0x244   : > { %v3832_v1 = vpop.eup %3831  ;;  %v1779_v58 = vmul.f32 %v5183_v20, %v1714_v37  ;;  %v1577_v8 = vmul.f32 %v3830_v32, %v5149_v48  ;;  %v1878_v28 = vpack.c.bf16 %v1836_v29, %v1834_v55  ;;  %v1840_v12 = vadd.f32 %v5202_v23, %v1775_v27 }
 0x245   : > { %v3834_v2 = vpop.eup %3833  ;;  %v1715_v34 = vmul.f32 %v1651_v3, %v5784_v49  ;;  %v1578_v43 = vmul.f32 %v3832_v1, %v5146_v45  ;;  %v1877_v62 = vpack.c.bf16 %v1835_v22, %v1833_v9  ;;  %v1837_v36 = vadd.f32 %v5202_v23, %v5851_v46 }
 0x246   : > { %v3836_v7 = vpop.eup %3835  ;;  %v1652_v51 = vadd.f32 %v5177_v40, %v1577_v8  ;;  %v1377_v56 = vadd.f32 1.0, %v3834_v2  ;;  %2225 = vmatprep.mubr.bf16.mxu1 %v1878_v28  ;;  %v1839_v24 = vadd.f32 %v5202_v23, %v5875_v0  ;;  %v1778_v13 = vmul.f32 %v5183_v20, %v1713_v35 }
 0x247   : > { %v3838_v30 = vpop.eup %3837  ;;  %v1653_v49 = vadd.f32 %v5156_v59, %v1578_v43  ;;  %v1378_v18 = vadd.f32 1.0, %v3836_v7  ;;  %2226 = vmatmul.mubr.bf16.gmra.mrb[40].mxu1 %v1877_v62  ;;  %v1880_v21 = vpack.c.bf16 %v1840_v12, %v1838_v4  ;;  %v1780_v46 = vmul.f32 %v5183_v20, %v1715_v34 }
 0x248   : > { %v3840_v53 = vpop.eup %3839  ;;  %v1716_v17 = vmul.f32 %v1652_v51, %v5800_v31  ;;  %v1579_v33 = vmul.f32 %v3838_v30, %v5149_v48  ;;  %3851 = vrcp.f32 %v1377_v56  ;;  %v1879_v60 = vpack.c.bf16 %v1839_v24, %v1837_v36 }
 0x249   : > { %v3842_v14 = vpop.eup %3841  ;;  %v1717_v0 = vmul.f32 %v1653_v49, %v5805_v47  ;;  %3853 = vrcp.f32 %v1378_v18  ;;  %v1379_v41 = vadd.f32 1.0, %v3840_v53  ;;  %2235 = vmatprep.mubr.bf16.mxu1 %v1880_v21  ;;  %v1842_v44 = vadd.f32 %v5202_v23, %v1777_v42 }
 0x24a   : > { %v3844_v38 = vpop.eup %3843  ;;  %v1654_v10 = vadd.f32 %v5177_v40, %v1579_v33  ;;  %v1380_v27 = vadd.f32 1.0, %v3842_v14  ;;  %v1844_v31 = vadd.f32 %v5202_v23, %v1779_v58  ;;  %v1781_v5 = vmul.f32 %v5183_v20, %v1716_v17 }
 0x24b   : > { %v3846_v26 = vpop.eup %3845  ;;  %v1782_v11 = vmul.f32 %v5183_v20, %v1717_v0  ;;  %3855 = vrcp.f32 %v1379_v41  ;;  %v1381_v35 = vadd.f32 1.0, %v3844_v38  ;;  %v1841_v42 = vadd.f32 %v5202_v23, %v5923_v61 }
 0x24c   : > { %v3848_v16 = vpop.eup %3847  ;;  %v1718_v47 = vmul.f32 %v1654_v10, %v5809_v50  ;;  %v1580_v54 = vmul.f32 %v3846_v26, %v5146_v45  ;;  %3857 = vrcp.f32 %v1380_v27  ;;  %v1882_v37 = vpack.c.bf16 %v1844_v31, %v1842_v44 }
 0x24d   : > { %v3850_v55 = vpop.eup %3849  ;;  %3859 = vrcp.f32 %v1381_v35  ;;  %v1382_v29 = vadd.f32 1.0, %v3848_v16  ;;  %v1843_v32 = vadd.f32 %v5202_v23, %v1778_v13  ;;  %v1845_v1 = vadd.f32 %v5202_v23, %v1780_v46 }
 0x24e   : > { %v1783_v3 = vmul.f32 %v5183_v20, %v1718_v47  ;;  %v1655_v9 = vadd.f32 %v5156_v59, %v1580_v54  ;;  %v1383_v22 = vadd.f32 1.0, %v3850_v55  ;;  %v1847_v58 = vadd.f32 %v5202_v23, %v1782_v11 }
 0x24f   : > { %3861 = vrcp.f32 %v1382_v29  ;;  %2236 = vmatmul.mubr.bf16.gmra.mrb[44].mxu1 %v1879_v60  ;;  %v1881_v50 = vpack.c.bf16 %v1843_v32, %v1841_v42  ;;  %v1846_v8 = vadd.f32 %v5202_v23, %v1781_v5  ;;  %v6832_v42 = vld [vmem:[#allocation17_spill] sm:$0xff] }
 0x250   : > { %3863 = vrcp.f32 %v1383_v22  ;;  %2245 = vmatprep.mubr.bf16.mxu1 %v1882_v37  ;;  %v1848_v61 = vadd.f32 %v5202_v23, %v1783_v3  ;;  %v1883_v28 = vpack.c.bf16 %v1847_v58, %v1845_v1  ;;  %v1719_v43 = vmul.f32 %v1655_v9, %v5838_v19  ;;  %v6833_v3 = vld [vmem:[#allocation19_spill] sm:$0xff] }
 0x252   : > { %v3852_v4 = vpop.eup %3851  ;;  %v1884_v2 = vpack.c.bf16 %v1848_v61, %v1846_v8  ;;  %v1784_v13 = vmul.f32 %v5183_v20, %v1719_v43 }
 0x253   : > { %v3854_v34 = vpop.eup %3853  ;;  %v1581_v62 = vmul.f32 %v3852_v4, %v5149_v48 }
 0x254   : > { %v1582_v12 = vmul.f32 %v3854_v34, %v5146_v45  ;;  %v1849_v10 = vadd.f32 %v5202_v23, %v1784_v13 }
 0x255   : > { %v3856_v7 = vpop.eup %3855  ;;  %v1656_v51 = vadd.f32 %v5177_v40, %v1581_v62 }
 0x256   : > { %v3858_v56 = vpop.eup %3857  ;;  %v1657_v36 = vadd.f32 %v5156_v59, %v1582_v12  ;;  %v1583_v24 = vmul.f32 %v3856_v7, %v5149_v48 }
 0x257   : > { %v3860_v30 = vpop.eup %3859  ;;  %v1720_v49 = vmul.f32 %v1656_v51, %v5857_v25  ;;  %v1584_v18 = vmul.f32 %v3858_v56, %v5146_v45  ;;  %2246 = vmatmul.mubr.bf16.gmra.mrb[48].mxu1 %v1881_v50 }
 0x258   : > { %v1721_v19 = vmul.f32 %v1657_v36, %v5861_v63  ;;  %v1658_v21 = vadd.f32 %v5177_v40, %v1583_v24  ;;  %v1585_v53 = vmul.f32 %v3860_v30, %v5149_v48  ;;  %2255 = vmatprep.mubr.bf16.mxu1 %v1884_v2 }
 0x259   : > { %v3862_v17 = vpop.eup %3861  ;;  %v1785_v33 = vmul.f32 %v5183_v20, %v1720_v49  ;;  %v1659_v60 = vadd.f32 %v5156_v59, %v1584_v18 }
 0x25a   : > { %v3864_v14 = vpop.eup %3863  ;;  %v1786_v46 = vmul.f32 %v5183_v20, %v1721_v19  ;;  %v1722_v25 = vmul.f32 %v1658_v21, %v5865_v52  ;;  %v1660_v0 = vadd.f32 %v5177_v40, %v1585_v53  ;;  %v1586_v41 = vmul.f32 %v3862_v17, %v5146_v45 }
 0x25b   : > { %v1723_v63 = vmul.f32 %v1659_v60, %v5890_v6  ;;  %v1587_v38 = vmul.f32 %v3864_v14, %v5149_v48  ;;  %v1850_v5 = vadd.f32 %v5202_v23, %v1785_v33 }
 0x25c   : > { %v1787_v27 = vmul.f32 %v5183_v20, %v1722_v25  ;;  %v1724_v44 = vmul.f32 %v1660_v0, %v5894_v57  ;;  %v1661_v31 = vadd.f32 %v5156_v59, %v1586_v41  ;;  %v1851_v26 = vadd.f32 %v5202_v23, %v1786_v46 }
 0x25d   : > { %v1662_v52 = vadd.f32 %v5177_v40, %v1587_v38  ;;  %v1788_v45 = vmul.f32 %v5183_v20, %v1723_v63 }
 0x25e   : > { %v1725_v6 = vmul.f32 %v1661_v31, %v5901_v15  ;;  %v1852_v48 = vadd.f32 %v5202_v23, %v1787_v27  ;;  %v1885_v11 = vpack.c.bf16 %v1851_v26, %v1849_v10  ;;  %v1789_v35 = vmul.f32 %v5183_v20, %v1724_v44 }
 0x25f   : > { %v1726_v16 = vmul.f32 %v1662_v52, %v5908_v39  ;;  %2256 = vmatmul.mubr.bf16.gmra.mrb[52].mxu1 %v1883_v28  ;;  %v1853_v40 = vadd.f32 %v5202_v23, %v1788_v45  ;;  %v1921_v39 = vld [vmem:[%s6752_s4] sm:$0x3] }
 0x260   : > { %v1790_v59 = vmul.f32 %v5183_v20, %v1725_v6  ;;  %v1886_v57 = vpack.c.bf16 %v1852_v48, %v1850_v5  ;;  %v1854_v15 = vadd.f32 %v5202_v23, %v1789_v35  ;;  %v6018_v32 = vrot.slane %v1921_v39, %v6832_v42  ;;  %v2286_v52 = vld [vmem:[%s6755_s7] sm:$0x3] }
 0x261   : > { %v1791_v47 = vmul.f32 %v5183_v20, %v1726_v16  ;;  %v2287_v20 = vld [vmem:[%s6756_s8] sm:$0x3]  ;;  %v6021_v9 = vrot.slane %v1921_v39, %v6833_v3 }
 0x262   : > { %2265 = vmatprep.mubr.bf16.mxu1 %v1886_v57  ;;  %v1855_v54 = vadd.f32 %v5202_v23, %v1790_v59  ;;  %v6027_v50 = vrot.slane %v2287_v20, %v6833_v3 }
 0x263   : > { %v1856_v37 = vadd.f32 %v5202_v23, %v1791_v47  ;;  %v6024_v23 = vrot.slane %v2287_v20, %v6832_v42  ;;  %v2747_v47 = vsub.f32 1.0, %v2286_v52 }
 0x264   : > { %v1887_v55 = vpack.c.bf16 %v1855_v54, %v1853_v40 }
 0x265   : > { %v1888_v29 = vpack.c.bf16 %v1856_v37, %v1854_v15 }
 0x267   : > { %2266 = vmatmul.mubr.bf16.gmra.mrb[56].mxu1 %v1885_v11 }
 0x268   : > { %2275 = vmatprep.mubr.bf16.mxu1 %v1888_v29 }
 0x26f   : > { %2276 = vmatmul.mubr.bf16.gmra.mrb[60].mxu1 %v1887_v55 }
 0x2ac   : > { %v2127_v22 = vpop.f32.mrb[0].mxu1 }
 0x2ad   : > { %v6030_v1 = vadd.f32 %v2127_v22, %v6018_v32  ;;  %v2129_v58 = vpop.f32.mrb[1].mxu1 }
 0x2ae   : > { %v6033_v8 = vadd.f32 %v2129_v58, %v6021_v9  ;;  %v2131_v61 = vpop.f32.mrb[2].mxu1  ;;  %v6093_v58 = vrot.slane %v2747_v47, %v6832_v42 }
 0x2af   : > { %v2299_v28 = vmul.f32 %v6024_v23, %v6030_v1  ;;  %v6038_v4 = vadd.f32 %v2131_v61, %v6018_v32  ;;  %v2133_v2 = vpop.f32.mrb[3].mxu1 }
 0x2b0   : > { %v2300_v34 = vmul.f32 %v6027_v50, %v6033_v8  ;;  %v6043_v43 = vadd.f32 %v2133_v2, %v6021_v9  ;;  %v6096_v2 = vrot.slane %v2747_v47, %v6833_v3 }
 0x2b1   : > { %v3356_v62 = vmul.f32 -1.442695, %v2299_v28  ;;  %v2301_v12 = vmul.f32 %v6024_v23, %v6038_v4 }
 0x2b2   : > { %v3357_v7 = vmul.f32 -1.442695, %v2300_v34  ;;  %v2302_v51 = vmul.f32 %v6027_v50, %v6043_v43 }
 0x2b3   : > { %3865 = vpow2.f32 %v3356_v62  ;;  %v3358_v56 = vmul.f32 -1.442695, %v2301_v12  ;;  %v6099_v12 = vrot.slane %v2286_v52, %v6832_v42 }
 0x2b4   : > { %3867 = vpow2.f32 %v3357_v7  ;;  %v3359_v36 = vmul.f32 -1.442695, %v2302_v51  ;;  %v2137_v24 = vpop.f32.mrb[4].mxu1 }
 0x2b5   : > { %3869 = vpow2.f32 %v3358_v56  ;;  %v6050_v30 = vadd.f32 %v2137_v24, %v6018_v32  ;;  %v2139_v13 = vpop.f32.mrb[5].mxu1  ;;  %v6102_v24 = vrot.slane %v2286_v52, %v6833_v3 }
 0x2b6   : > { %3871 = vpow2.f32 %v3359_v36  ;;  %v6053_v49 = vadd.f32 %v2139_v13, %v6021_v9  ;;  %v2141_v18 = vpop.f32.mrb[6].mxu1 }
 0x2b7   : > { %v2303_v19 = vmul.f32 %v6024_v23, %v6050_v30  ;;  %v6058_v21 = vadd.f32 %v2141_v18, %v6018_v32  ;;  %v2143_v53 = vpop.f32.mrb[7].mxu1 }
 0x2b8   : > { %v2304_v17 = vmul.f32 %v6027_v50, %v6053_v49  ;;  %v6063_v33 = vadd.f32 %v2143_v53, %v6021_v9 }
 0x2b9   : > { %v3360_v60 = vmul.f32 -1.442695, %v2303_v19  ;;  %v2305_v14 = vmul.f32 %v6024_v23, %v6058_v21 }
 0x2ba   : > { %v3361_v46 = vmul.f32 -1.442695, %v2304_v17  ;;  %v2306_v25 = vmul.f32 %v6027_v50, %v6063_v33 }
 0x2bb   : > { %3873 = vpow2.f32 %v3360_v60  ;;  %v3362_v0 = vmul.f32 -1.442695, %v2305_v14 }
 0x2bc   : > { %3875 = vpow2.f32 %v3361_v46  ;;  %v3363_v63 = vmul.f32 -1.442695, %v2306_v25 }
 0x2bd   : > { %v3866_v41 = vpop.eup %3865  ;;  %3877 = vpow2.f32 %v3362_v0 }
 0x2be   : > { %v3868_v38 = vpop.eup %3867  ;;  %v2555_v10 = vadd.f32 1.0, %v3866_v41  ;;  %3879 = vpow2.f32 %v3363_v63 }
 0x2bf   : > { %v3870_v27 = vpop.eup %3869  ;;  %v2556_v44 = vadd.f32 1.0, %v3868_v38  ;;  %v2147_v31 = vpop.f32.mrb[8].mxu1 }
 0x2c0   : > { %v3872_v26 = vpop.eup %3871  ;;  %3881 = vrcp.f32 %v2555_v10  ;;  %v2557_v5 = vadd.f32 1.0, %v3870_v27  ;;  %v6073_v45 = vadd.f32 %v2147_v31, %v6018_v32  ;;  %v2149_v6 = vpop.f32.mrb[9].mxu1 }
 0x2c1   : > { %3883 = vrcp.f32 %v2556_v44  ;;  %v2558_v48 = vadd.f32 1.0, %v3872_v26  ;;  %v6076_v11 = vadd.f32 %v2149_v6, %v6021_v9  ;;  %v2151_v35 = vpop.f32.mrb[10].mxu1 }
 0x2c2   : > { %3885 = vrcp.f32 %v2557_v5  ;;  %v2307_v16 = vmul.f32 %v6024_v23, %v6073_v45  ;;  %v6081_v59 = vadd.f32 %v2151_v35, %v6018_v32  ;;  %v2153_v57 = vpop.f32.mrb[11].mxu1 }
 0x2c3   : > { %3887 = vrcp.f32 %v2558_v48  ;;  %v2308_v40 = vmul.f32 %v6027_v50, %v6076_v11  ;;  %v6086_v54 = vadd.f32 %v2153_v57, %v6021_v9 }
 0x2c4   : > { %v3364_v15 = vmul.f32 -1.442695, %v2307_v16  ;;  %v2309_v37 = vmul.f32 %v6024_v23, %v6081_v59 }
 0x2c5   : > { %v3365_v55 = vmul.f32 -1.442695, %v2308_v40  ;;  %v2310_v29 = vmul.f32 %v6027_v50, %v6086_v54  ;;  %v3874_v39 = vpop.eup %3873 }
 0x2c6   : > { %3889 = vpow2.f32 %v3364_v15  ;;  %v3366_v20 = vmul.f32 -1.442695, %v2309_v37  ;;  %v3876_v22 = vpop.eup %3875  ;;  %v2559_v61 = vadd.f32 1.0, %v3874_v39  ;;  %v4121_v15 = vld [vmem:[%s4620_s18] sm:$0xff]  ;;  %v4122_v39 = vld [vmem:[%s4620_s18 + $0x8] sm:$0xff] }
 0x2c7   : > { %3891 = vpow2.f32 %v3365_v55  ;;  %v3878_v28 = vpop.eup %3877  ;;  %v2560_v34 = vadd.f32 1.0, %v3876_v22  ;;  %v3367_v51 = vmul.f32 -1.442695, %v2310_v29 }
 0x2c8   : > { %3893 = vpow2.f32 %v3366_v20  ;;  %v3880_v62 = vpop.eup %3879  ;;  %v2561_v7 = vadd.f32 1.0, %v3878_v28  ;;  %v4123_v28 = vld [vmem:[%s4620_s18 + $0x10] sm:$0xff] }
 0x2c9   : > { %3895 = vrcp.f32 %v2559_v61  ;;  %v2157_v56 = vpop.f32.mrb[12].mxu1  ;;  %v2562_v13 = vadd.f32 1.0, %v3880_v62 }
 0x2ca   : > { %v3882_v36 = vpop.eup %3881  ;;  %3897 = vrcp.f32 %v2560_v34  ;;  %v6105_v18 = vadd.f32 %v2157_v56, %v6018_v32  ;;  %v2159_v19 = vpop.f32.mrb[13].mxu1 }
 0x2cb   : > { %v3884_v53 = vpop.eup %3883  ;;  %v2759_v17 = vmul.f32 %v3882_v36, %v6093_v58  ;;  %3899 = vrcp.f32 %v2561_v7  ;;  %v6109_v42 = vadd.f32 %v2159_v19, %v6021_v9  ;;  %v2161_v60 = vpop.f32.mrb[14].mxu1 }
 0x2cc   : > { %v3886_v14 = vpop.eup %3885  ;;  %v2760_v46 = vmul.f32 %v3884_v53, %v6096_v2  ;;  %3901 = vrcp.f32 %v2562_v13  ;;  %v2311_v3 = vmul.f32 %v6024_v23, %v6105_v18  ;;  %v6115_v25 = vadd.f32 %v2161_v60, %v6018_v32  ;;  %v2163_v0 = vpop.f32.mrb[15].mxu1 }
 0x2cd   : > { %v3888_v41 = vpop.eup %3887  ;;  %v2834_v63 = vadd.f32 %v6099_v12, %v2759_v17  ;;  %v2761_v38 = vmul.f32 %v3886_v14, %v6093_v58  ;;  %3903 = vpow2.f32 %v3367_v51  ;;  %v2312_v10 = vmul.f32 %v6027_v50, %v6109_v42 }
 0x2ce   : > { %v2835_v27 = vadd.f32 %v6102_v24, %v2760_v46  ;;  %v2762_v44 = vmul.f32 %v3888_v41, %v6096_v2  ;;  %v3368_v31 = vmul.f32 -1.442695, %v2311_v3  ;;  %v2313_v26 = vmul.f32 %v6024_v23, %v6115_v25 }
 0x2cf   : > { %v2898_v52 = vmul.f32 %v2834_v63, %v6030_v1  ;;  %v2836_v5 = vadd.f32 %v6099_v12, %v2761_v38  ;;  %v3369_v6 = vmul.f32 -1.442695, %v2312_v10  ;;  %v6128_v48 = vadd.f32 %v2163_v0, %v6021_v9 }
 0x2d0   : > { %v3890_v35 = vpop.eup %3889  ;;  %v2899_v16 = vmul.f32 %v2835_v27, %v6033_v8  ;;  %v2837_v57 = vadd.f32 %v6102_v24, %v2762_v44  ;;  %3905 = vpow2.f32 %v3368_v31  ;;  %v3370_v47 = vmul.f32 -1.442695, %v2313_v26 }
 0x2d1   : > { %v3892_v40 = vpop.eup %3891  ;;  %v2962_v37 = vadd.f32 %v4121_v15, %v2898_v52  ;;  %v2900_v1 = vmul.f32 %v2836_v5, %v6038_v4  ;;  %v2563_v55 = vadd.f32 1.0, %v3890_v35  ;;  %3907 = vpow2.f32 %v3369_v6 }
 0x2d2   : > { %v3894_v29 = vpop.eup %3893  ;;  %v2963_v20 = vadd.f32 %v4122_v39, %v2899_v16  ;;  %v2901_v22 = vmul.f32 %v2837_v57, %v6043_v43  ;;  %v2564_v8 = vadd.f32 1.0, %v3892_v40  ;;  %3909 = vpow2.f32 %v3370_v47  ;;  %v4124_v43 = vld [vmem:[%s4620_s18 + $0x18] sm:$0xff]  ;;  %v4125_v57 = vld [vmem:[%s4620_s18 + $0x20] sm:$0xff] }
 0x2d3   : > { %v3896_v61 = vpop.eup %3895  ;;  %3026 = vst [vmem:[%s6138_s10] sm:$0xff] %v2962_v37  ;;  %v2964_v4 = vadd.f32 %v4123_v28, %v2900_v1  ;;  %3911 = vrcp.f32 %v2563_v55  ;;  %v2565_v34 = vadd.f32 1.0, %v3894_v29  ;;  %v2314_v62 = vmul.f32 %v6027_v50, %v6128_v48  ;;  %v4126_v37 = vld [vmem:[%s4620_s18 + $0x28] sm:$0xff] }
 0x2d4   : > { %v3898_v7 = vpop.eup %3897  ;;  %3027 = vst [vmem:[%s6138_s10 + $0x8] sm:$0xff] %v2963_v20  ;;  %v2965_v51 = vadd.f32 %v4124_v43, %v2901_v22  ;;  %v2763_v56 = vmul.f32 %v3896_v61, %v6093_v58  ;;  %3913 = vrcp.f32 %v2564_v8  ;;  %v2167_v53 = vpop.f32.mrb[16].mxu1  ;;  %v4127_v22 = vld [vmem:[%s4620_s18 + $0x30] sm:$0xff] }
 0x2d5   : > { %v3900_v36 = vpop.eup %3899  ;;  %3028 = vst [vmem:[%s6138_s10 + $0x10] sm:$0xff] %v2964_v4  ;;  %v2764_v13 = vmul.f32 %v3898_v7, %v6096_v2  ;;  %3915 = vrcp.f32 %v2565_v34  ;;  %v3371_v19 = vmul.f32 -1.442695, %v2314_v62  ;;  %v6153_v46 = vadd.f32 %v2167_v53, %v6018_v32  ;;  %v2169_v3 = vpop.f32.mrb[17].mxu1  ;;  %v4128_v4 = vld [vmem:[%s4620_s18 + $0x38] sm:$0xff] }
 0x2d6   : > { %v3902_v17 = vpop.eup %3901  ;;  %3029 = vst [vmem:[%s6138_s10 + $0x18] sm:$0xff] %v2965_v51  ;;  %v2838_v60 = vadd.f32 %v6099_v12, %v2763_v56  ;;  %v2765_v14 = vmul.f32 %v3900_v36, %v6093_v58  ;;  %v6158_v38 = vadd.f32 %v2169_v3, %v6021_v9  ;;  %v2171_v10 = vpop.f32.mrb[18].mxu1 }
 0x2d7   : > { %v3904_v0 = vpop.eup %3903  ;;  %v2839_v41 = vadd.f32 %v6102_v24, %v2764_v13  ;;  %v2766_v63 = vmul.f32 %v3902_v17, %v6096_v2  ;;  %3917 = vpow2.f32 %v3371_v19  ;;  %v2315_v26 = vmul.f32 %v6024_v23, %v6153_v46  ;;  %v2173_v52 = vpop.f32.mrb[19].mxu1 }
 0x2d8   : > { %v2902_v27 = vmul.f32 %v2838_v60, %v6050_v30  ;;  %v2840_v44 = vadd.f32 %v6099_v12, %v2765_v14  ;;  %v2566_v31 = vadd.f32 1.0, %v3904_v0  ;;  %v2316_v35 = vmul.f32 %v6027_v50, %v6158_v38 }
 0x2d9   : > { %v2903_v5 = vmul.f32 %v2839_v41, %v6053_v49  ;;  %v2841_v6 = vadd.f32 %v6102_v24, %v2766_v63  ;;  %v6169_v16 = vadd.f32 %v2171_v10, %v6018_v32  ;;  %v3372_v15 = vmul.f32 -1.442695, %v2315_v26  ;;  %v4129_v26 = vld [vmem:[%s4620_s18 + $0x40] sm:$0xff] }
 0x2da   : > { %v3906_v30 = vpop.eup %3905  ;;  %v2966_v47 = vadd.f32 %v4125_v57, %v2902_v27  ;;  %v2904_v40 = vmul.f32 %v2840_v44, %v6058_v21  ;;  %3919 = vrcp.f32 %v2566_v31  ;;  %v3373_v39 = vmul.f32 -1.442695, %v2316_v35  ;;  %v4130_v35 = vld [vmem:[%s4620_s18 + $0x48] sm:$0xff] }
 0x2db   : > { %v3908_v49 = vpop.eup %3907  ;;  %v2967_v1 = vadd.f32 %v4126_v37, %v2903_v5  ;;  %v2905_v55 = vmul.f32 %v2841_v6, %v6063_v33  ;;  %v2567_v29 = vadd.f32 1.0, %v3906_v30  ;;  %3921 = vpow2.f32 %v3372_v15 }
 0x2dc   : > { %v3910_v20 = vpop.eup %3909  ;;  %3030 = vst [vmem:[%s6138_s10 + $0x20] sm:$0xff] %v2966_v47  ;;  %v2968_v8 = vadd.f32 %v4127_v22, %v2904_v40  ;;  %v2568_v61 = vadd.f32 1.0, %v3908_v49  ;;  %v2317_v21 = vmul.f32 %v6024_v23, %v6169_v16  ;;  %v6182_v33 = vadd.f32 %v2173_v52, %v6021_v9 }
 0x2dd   : > { %v3912_v28 = vpop.eup %3911  ;;  %3031 = vst [vmem:[%s6138_s10 + $0x28] sm:$0xff] %v2967_v1  ;;  %v2969_v34 = vadd.f32 %v4128_v4, %v2905_v55  ;;  %3923 = vrcp.f32 %v2567_v29  ;;  %v2569_v62 = vadd.f32 1.0, %v3910_v20 }
 0x2de   : > { %v3914_v7 = vpop.eup %3913  ;;  %3032 = vst [vmem:[%s6138_s10 + $0x30] sm:$0xff] %v2968_v8  ;;  %v2767_v43 = vmul.f32 %v3912_v28, %v6093_v58  ;;  %3925 = vrcp.f32 %v2568_v61  ;;  %v3374_v51 = vmul.f32 -1.442695, %v2317_v21  ;;  %v2318_v13 = vmul.f32 %v6027_v50, %v6182_v33 }
 0x2df   : > { %v3916_v56 = vpop.eup %3915  ;;  %3033 = vst [vmem:[%s6138_s10 + $0x38] sm:$0xff] %v2969_v34  ;;  %v2768_v36 = vmul.f32 %v3914_v7, %v6096_v2  ;;  %3927 = vrcp.f32 %v2569_v62 }
 0x2e0   : > { %v2842_v19 = vadd.f32 %v6099_v12, %v2767_v43  ;;  %v2769_v53 = vmul.f32 %v3916_v56, %v6093_v58  ;;  %3929 = vpow2.f32 %v3373_v39  ;;  %v3375_v14 = vmul.f32 -1.442695, %v2318_v13 }
 0x2e1   : > { %v3918_v17 = vpop.eup %3917  ;;  %v2843_v60 = vadd.f32 %v6102_v24, %v2768_v36  ;;  %3931 = vpow2.f32 %v3374_v51 }
 0x2e2   : > { %v2906_v3 = vmul.f32 %v2842_v19, %v6073_v45  ;;  %v2844_v0 = vadd.f32 %v6099_v12, %v2769_v53  ;;  %v2570_v41 = vadd.f32 1.0, %v3918_v17  ;;  %v2177_v63 = vpop.f32.mrb[20].mxu1  ;;  %3933 = vpow2.f32 %v3375_v14  ;;  %v4132_v19 = vld [vmem:[%s4620_s18 + $0x58] sm:$0xff] }
 0x2e3   : > { %v2907_v10 = vmul.f32 %v2843_v60, %v6076_v11  ;;  %v6197_v27 = vadd.f32 %v2177_v63, %v6018_v32  ;;  %v2179_v44 = vpop.f32.mrb[21].mxu1 }
 0x2e4   : > { %v3920_v31 = vpop.eup %3919  ;;  %v2970_v52 = vadd.f32 %v4129_v26, %v2906_v3  ;;  %v2908_v5 = vmul.f32 %v2844_v0, %v6081_v59  ;;  %3935 = vrcp.f32 %v2570_v41  ;;  %v6202_v45 = vadd.f32 %v2179_v44, %v6021_v9  ;;  %v2181_v6 = vpop.f32.mrb[22].mxu1  ;;  %v4131_v59 = vld [vmem:[%s4620_s18 + $0x50] sm:$0xff]  ;;  %v4134_v26 = vld [vmem:[%s4620_s18 + $0x68] sm:$0xff] }
 0x2e5   : > { %v2971_v11 = vadd.f32 %v4130_v35, %v2907_v10  ;;  %v2770_v30 = vmul.f32 %v3920_v31, %v6096_v2  ;;  %v2319_v57 = vmul.f32 %v6024_v23, %v6197_v27  ;;  %v6209_v47 = vadd.f32 %v2181_v6, %v6018_v32  ;;  %v2183_v40 = vpop.f32.mrb[23].mxu1  ;;  %v3922_v15 = vpop.eup %3921  ;;  %v4133_v10 = vld [vmem:[%s4620_s18 + $0x60] sm:$0xff]  ;;  %v4135_v6 = vld [vmem:[%s4620_s18 + $0x70] sm:$0xff] }
 0x2e6   : > { %3034 = vst [vmem:[%s6138_s10 + $0x40] sm:$0xff] %v2970_v52  ;;  %v2972_v49 = vadd.f32 %v4131_v59, %v2908_v5  ;;  %v2320_v37 = vmul.f32 %v6027_v50, %v6202_v45  ;;  %v6216_v1 = vadd.f32 %v2183_v40, %v6021_v9  ;;  %v2571_v39 = vadd.f32 1.0, %v3922_v15 }
 0x2e7   : > { %v3924_v55 = vpop.eup %3923  ;;  %3035 = vst [vmem:[%s6138_s10 + $0x48] sm:$0xff] %v2971_v11  ;;  %v2845_v29 = vadd.f32 %v6102_v24, %v2770_v30  ;;  %v3376_v20 = vmul.f32 -1.442695, %v2319_v57  ;;  %v2321_v22 = vmul.f32 %v6024_v23, %v6209_v47 }
 0x2e8   : > { %v3926_v8 = vpop.eup %3925  ;;  %3036 = vst [vmem:[%s6138_s10 + $0x50] sm:$0xff] %v2972_v49  ;;  %v2771_v61 = vmul.f32 %v3924_v55, %v6093_v58  ;;  %v3377_v21 = vmul.f32 -1.442695, %v2320_v37  ;;  %v2322_v28 = vmul.f32 %v6027_v50, %v6216_v1  ;;  %3937 = vrcp.f32 %v2571_v39 }
 0x2e9   : > { %v3928_v4 = vpop.eup %3927  ;;  %v2909_v34 = vmul.f32 %v2845_v29, %v6086_v54  ;;  %v2772_v62 = vmul.f32 %v3926_v8, %v6096_v2  ;;  %v3378_v7 = vmul.f32 -1.442695, %v2321_v22  ;;  %3939 = vpow2.f32 %v3376_v20 }
 0x2ea   : > { %v3930_v43 = vpop.eup %3929  ;;  %v2846_v51 = vadd.f32 %v6099_v12, %v2771_v61  ;;  %v2773_v56 = vmul.f32 %v3928_v4, %v6093_v58  ;;  %v3379_v36 = vmul.f32 -1.442695, %v2322_v28  ;;  %3941 = vpow2.f32 %v3377_v21  ;;  %v4136_v61 = vld [vmem:[%s4620_s18 + $0x78] sm:$0xff] }
 0x2eb   : > { %v3932_v13 = vpop.eup %3931  ;;  %v2973_v53 = vadd.f32 %v4132_v19, %v2909_v34  ;;  %v2847_v17 = vadd.f32 %v6102_v24, %v2772_v62  ;;  %v2572_v60 = vadd.f32 1.0, %v3930_v43  ;;  %3943 = vpow2.f32 %v3378_v7 }
 0x2ec   : > { %v2910_v54 = vmul.f32 %v2846_v51, %v6105_v18  ;;  %v2848_v14 = vadd.f32 %v6099_v12, %v2773_v56  ;;  %v2573_v3 = vadd.f32 1.0, %v3932_v13  ;;  %v3934_v0 = vpop.eup %3933 }
 0x2ed   : > { %3037 = vst [vmem:[%s6138_s10 + $0x58] sm:$0xff] %v2973_v53  ;;  %v2911_v41 = vmul.f32 %v2847_v17, %v6109_v42  ;;  %3945 = vrcp.f32 %v2572_v60  ;;  %v2574_v18 = vadd.f32 1.0, %v3934_v0 }
 0x2ee   : > { %v3936_v63 = vpop.eup %3935  ;;  %v2974_v44 = vadd.f32 %v4133_v10, %v2910_v54  ;;  %v2912_v31 = vmul.f32 %v2848_v14, %v6115_v25  ;;  %3947 = vrcp.f32 %v2573_v3 }
 0x2ef   : > { %v2975_v52 = vadd.f32 %v4134_v26, %v2911_v41  ;;  %v2774_v5 = vmul.f32 %v3936_v63, %v6096_v2  ;;  %3949 = vpow2.f32 %v3379_v36  ;;  %v4137_v41 = vld [vmem:[%s4620_s18 + $0x80] sm:$0xff] }
 0x2f0   : > { %3038 = vst [vmem:[%s6138_s10 + $0x60] sm:$0xff] %v2974_v44  ;;  %v2976_v35 = vadd.f32 %v4135_v6, %v2912_v31  ;;  %3951 = vrcp.f32 %v2574_v18  ;;  %v2187_v42 = vpop.f32.mrb[24].mxu1 }
 0x2f1   : > { %3039 = vst [vmem:[%s6138_s10 + $0x68] sm:$0xff] %v2975_v52  ;;  %v2849_v11 = vadd.f32 %v6102_v24, %v2774_v5  ;;  %v6245_v30 = vadd.f32 %v2187_v42, %v6018_v32  ;;  %v2189_v25 = vpop.f32.mrb[25].mxu1 }
 0x2f2   : > { %3040 = vst [vmem:[%s6138_s10 + $0x70] sm:$0xff] %v2976_v35  ;;  %v6249_v57 = vadd.f32 %v2189_v25, %v6021_v9  ;;  %v2191_v40 = vpop.f32.mrb[26].mxu1  ;;  %v3938_v15 = vpop.eup %3937 }
 0x2f3   : > { %v2913_v59 = vmul.f32 %v2849_v11, %v6128_v48  ;;  %v2323_v49 = vmul.f32 %v6024_v23, %v6245_v30  ;;  %v6255_v37 = vadd.f32 %v2191_v40, %v6018_v32  ;;  %v2193_v55 = vpop.f32.mrb[27].mxu1  ;;  %v3940_v29 = vpop.eup %3939  ;;  %v2775_v39 = vmul.f32 %v3938_v15, %v6093_v58 }
 0x2f4   : > { %v2324_v20 = vmul.f32 %v6027_v50, %v6249_v57  ;;  %v6261_v22 = vadd.f32 %v2193_v55, %v6021_v9  ;;  %v3942_v8 = vpop.eup %3941  ;;  %v2575_v21 = vadd.f32 1.0, %v3940_v29  ;;  %v4139_v55 = vld [vmem:[%s4620_s18 + $0x90] sm:$0xff] }
 0x2f5   : > { %v2977_v48 = vadd.f32 %v4136_v61, %v2913_v59  ;;  %v2325_v28 = vmul.f32 %v6024_v23, %v6255_v37  ;;  %v3944_v4 = vpop.eup %3943  ;;  %v2850_v34 = vadd.f32 %v6099_v12, %v2775_v39  ;;  %v2576_v62 = vadd.f32 1.0, %v3942_v8 }
 0x2f6   : > { %v3380_v7 = vmul.f32 -1.442695, %v2323_v49  ;;  %v2326_v43 = vmul.f32 %v6027_v50, %v6261_v22  ;;  %3953 = vrcp.f32 %v2575_v21  ;;  %v2577_v56 = vadd.f32 1.0, %v3944_v4  ;;  %v4140_v21 = vld [vmem:[%s4620_s18 + $0x98] sm:$0xff] }
 0x2f7   : > { %v3946_v51 = vpop.eup %3945  ;;  %3041 = vst [vmem:[%s6138_s10 + $0x78] sm:$0xff] %v2977_v48  ;;  %v3381_v36 = vmul.f32 -1.442695, %v2324_v20  ;;  %v2914_v19 = vmul.f32 %v2850_v34, %v6153_v46  ;;  %3955 = vrcp.f32 %v2576_v62  ;;  %v3382_v54 = vmul.f32 -1.442695, %v2325_v28 }
 0x2f8   : > { %v3948_v13 = vpop.eup %3947  ;;  %v2776_v53 = vmul.f32 %v3946_v51, %v6096_v2  ;;  %3957 = vrcp.f32 %v2577_v56  ;;  %v3383_v14 = vmul.f32 -1.442695, %v2326_v43  ;;  %v2197_v3 = vpop.f32.mrb[28].mxu1 }
 0x2f9   : > { %v3950_v17 = vpop.eup %3949  ;;  %v2777_v60 = vmul.f32 %v3948_v13, %v6093_v58  ;;  %v2978_v63 = vadd.f32 %v4137_v41, %v2914_v19  ;;  %3959 = vpow2.f32 %v3380_v7  ;;  %v2199_v31 = vpop.f32.mrb[29].mxu1  ;;  %v6278_v26 = vadd.f32 %v2197_v3, %v6018_v32 }
 0x2fa   : > { %v3952_v0 = vpop.eup %3951  ;;  %v2851_v10 = vadd.f32 %v6102_v24, %v2776_v53  ;;  %v2578_v44 = vadd.f32 1.0, %v3950_v17  ;;  %3961 = vpow2.f32 %v3381_v36  ;;  %v2201_v52 = vpop.f32.mrb[30].mxu1  ;;  %v6283_v6 = vadd.f32 %v2199_v31, %v6021_v9 }
 0x2fb   : > { %v2852_v46 = vadd.f32 %v6099_v12, %v2777_v60  ;;  %v2778_v18 = vmul.f32 %v3952_v0, %v6096_v2  ;;  %3042 = vst [vmem:[%s6138_s10 + $0x80] sm:$0xff] %v2978_v63  ;;  %v6286_v35 = vadd.f32 %v2201_v52, %v6018_v32  ;;  %v2203_v42 = vpop.f32.mrb[31].mxu1  ;;  %v2327_v40 = vmul.f32 %v6024_v23, %v6278_v26 }
 0x2fc   : > { %v2915_v5 = vmul.f32 %v2851_v10, %v6158_v38  ;;  %3963 = vrcp.f32 %v2578_v44  ;;  %v4138_v38 = vld [vmem:[%s4620_s18 + $0x88] sm:$0xff]  ;;  %v2328_v59 = vmul.f32 %v6027_v50, %v6283_v6  ;;  %v6300_v20 = vadd.f32 %v2203_v42, %v6021_v9  ;;  %v4141_v42 = vld [vmem:[%s4620_s18 + $0xa0] sm:$0xff] }
 0x2fd   : > { %v2916_v11 = vmul.f32 %v2852_v46, %v6169_v16  ;;  %v2853_v25 = vadd.f32 %v6102_v24, %v2778_v18  ;;  %3965 = vpow2.f32 %v3382_v54  ;;  %v2329_v49 = vmul.f32 %v6024_v23, %v6286_v35 }
 0x2fe   : > { %v2979_v15 = vadd.f32 %v4138_v38, %v2915_v5  ;;  %3967 = vpow2.f32 %v3383_v14  ;;  %v3384_v39 = vmul.f32 -1.442695, %v2327_v40  ;;  %v3385_v8 = vmul.f32 -1.442695, %v2328_v59  ;;  %v4142_v38 = vld [vmem:[%s4620_s18 + $0xa8] sm:$0xff] }
 0x2ff   : > { %v2980_v29 = vadd.f32 %v4139_v55, %v2916_v11  ;;  %v2917_v16 = vmul.f32 %v2853_v25, %v6182_v33  ;;  %v3386_v61 = vmul.f32 -1.442695, %v2329_v49  ;;  %v2330_v4 = vmul.f32 %v6027_v50, %v6300_v20  ;;  %v4143_v55 = vld [vmem:[%s4620_s18 + $0xb0] sm:$0xff] }
 0x300   : > { %3043 = vst [vmem:[%s6138_s10 + $0x88] sm:$0xff] %v2979_v15  ;;  %v3954_v48 = vpop.eup %3953  ;;  %3969 = vpow2.f32 %v3384_v39 }
 0x301   : > { %3044 = vst [vmem:[%s6138_s10 + $0x90] sm:$0xff] %v2980_v29  ;;  %v2981_v28 = vadd.f32 %v4140_v21, %v2917_v16  ;;  %v3956_v34 = vpop.eup %3955  ;;  %v2779_v62 = vmul.f32 %v3954_v48, %v6093_v58  ;;  %3971 = vpow2.f32 %v3385_v8  ;;  %v3387_v43 = vmul.f32 -1.442695, %v2330_v4 }
 0x302   : > { %v3958_v33 = vpop.eup %3957  ;;  %v2780_v7 = vmul.f32 %v3956_v34, %v6096_v2  ;;  %3973 = vpow2.f32 %v3386_v61  ;;  %v2207_v51 = vpop.f32.mrb[32].mxu1  ;;  %v4144_v34 = vld [vmem:[%s4620_s18 + $0xb8] sm:$0xff] }
 0x303   : > { %3045 = vst [vmem:[%s6138_s10 + $0x98] sm:$0xff] %v2981_v28  ;;  %v3960_v56 = vpop.eup %3959  ;;  %v2854_v36 = vadd.f32 %v6099_v12, %v2779_v62  ;;  %v2781_v13 = vmul.f32 %v3958_v33, %v6093_v58  ;;  %v6313_v19 = vadd.f32 %v2207_v51, %v6018_v32  ;;  %v2209_v53 = vpop.f32.mrb[33].mxu1  ;;  %3975 = vpow2.f32 %v3387_v43 }
 0x304   : > { %v3962_v17 = vpop.eup %3961  ;;  %v2855_v60 = vadd.f32 %v6102_v24, %v2780_v7  ;;  %v2579_v54 = vadd.f32 1.0, %v3960_v56  ;;  %v6317_v14 = vadd.f32 %v2209_v53, %v6021_v9  ;;  %v2211_v3 = vpop.f32.mrb[34].mxu1 }
 0x305   : > { %v2918_v41 = vmul.f32 %v2854_v36, %v6197_v27  ;;  %v2856_v63 = vadd.f32 %v6099_v12, %v2781_v13  ;;  %v2580_v10 = vadd.f32 1.0, %v3962_v17  ;;  %v2331_v44 = vmul.f32 %v6024_v23, %v6313_v19  ;;  %v2213_v31 = vpop.f32.mrb[35].mxu1 }
 0x306   : > { %v3964_v0 = vpop.eup %3963  ;;  %v2919_v18 = vmul.f32 %v2855_v60, %v6202_v45  ;;  %3977 = vrcp.f32 %v2579_v54  ;;  %v2332_v5 = vmul.f32 %v6027_v50, %v6317_v14  ;;  %v6334_v39 = vadd.f32 %v2211_v3, %v6018_v32 }
 0x307   : > { %v3966_v46 = vpop.eup %3965  ;;  %v2782_v52 = vmul.f32 %v3964_v0, %v6096_v2  ;;  %v2982_v11 = vadd.f32 %v4141_v42, %v2918_v41  ;;  %v2920_v25 = vmul.f32 %v2856_v63, %v6209_v47  ;;  %3979 = vrcp.f32 %v2580_v10 }
 0x308   : > { %v3968_v27 = vpop.eup %3967  ;;  %v2581_v40 = vadd.f32 1.0, %v3966_v46  ;;  %v2983_v15 = vadd.f32 %v4142_v38, %v2919_v18  ;;  %v3388_v49 = vmul.f32 -1.442695, %v2331_v44  ;;  %v3389_v16 = vmul.f32 -1.442695, %v2332_v5 }
 0x309   : > { %v2857_v45 = vadd.f32 %v6102_v24, %v2782_v52  ;;  %v2582_v59 = vadd.f32 1.0, %v3968_v27  ;;  %3046 = vst [vmem:[%s6138_s10 + $0xa0] sm:$0xff] %v2982_v11  ;;  %v2984_v29 = vadd.f32 %v4143_v55, %v2920_v25  ;;  %v6339_v61 = vadd.f32 %v2213_v31, %v6021_v9 }
 0x30a   : > { %3981 = vrcp.f32 %v2581_v40  ;;  %v3970_v8 = vpop.eup %3969  ;;  %3047 = vst [vmem:[%s6138_s10 + $0xa8] sm:$0xff] %v2983_v15  ;;  %v2333_v28 = vmul.f32 %v6024_v23, %v6334_v39 }
 0x30b   : > { %v2921_v47 = vmul.f32 %v2857_v45, %v6216_v1  ;;  %3983 = vrcp.f32 %v2582_v59  ;;  %v3972_v48 = vpop.eup %3971  ;;  %3048 = vst [vmem:[%s6138_s10 + $0xb0] sm:$0xff] %v2984_v29  ;;  %v2583_v21 = vadd.f32 1.0, %v3970_v8  ;;  %v2334_v1 = vmul.f32 %v6027_v50, %v6339_v61 }
 0x30c   : > { %3985 = vpow2.f32 %v3388_v49  ;;  %v3974_v4 = vpop.eup %3973  ;;  %v2584_v33 = vadd.f32 1.0, %v3972_v48  ;;  %v3390_v51 = vmul.f32 -1.442695, %v2333_v28  ;;  %v4145_v28 = vld [vmem:[%s4620_s18 + $0xc0] sm:$0xff] }
 0x30d   : > { %v2985_v62 = vadd.f32 %v4144_v34, %v2921_v47  ;;  %3987 = vpow2.f32 %v3389_v16  ;;  %v2217_v7 = vpop.f32.mrb[36].mxu1  ;;  %v2585_v43 = vadd.f32 1.0, %v3974_v4  ;;  %v3976_v13 = vpop.eup %3975  ;;  %v3391_v53 = vmul.f32 -1.442695, %v2334_v1 }
 0x30e   : > { %3989 = vrcp.f32 %v2583_v21  ;;  %v6348_v56 = vadd.f32 %v2217_v7, %v6018_v32  ;;  %v2219_v36 = vpop.f32.mrb[37].mxu1  ;;  %v2586_v54 = vadd.f32 1.0, %v3976_v13 }
 0x30f   : > { %3049 = vst [vmem:[%s6138_s10 + $0xb8] sm:$0xff] %v2985_v62  ;;  %3991 = vrcp.f32 %v2584_v33  ;;  %v6352_v17 = vadd.f32 %v2219_v36, %v6021_v9  ;;  %v2221_v60 = vpop.f32.mrb[38].mxu1  ;;  %v4146_v33 = vld [vmem:[%s4620_s18 + $0xc8] sm:$0xff] }
 0x310   : > { %3993 = vrcp.f32 %v2585_v43  ;;  %v2335_v3 = vmul.f32 %v6024_v23, %v6348_v56  ;;  %v6357_v0 = vadd.f32 %v2221_v60, %v6018_v32  ;;  %v2223_v41 = vpop.f32.mrb[39].mxu1  ;;  %v3978_v63 = vpop.eup %3977  ;;  %v4147_v60 = vld [vmem:[%s4620_s18 + $0xd0] sm:$0xff] }
 0x311   : > { %3995 = vpow2.f32 %v3390_v51  ;;  %v2336_v10 = vmul.f32 %v6027_v50, %v6352_v17  ;;  %v6362_v44 = vadd.f32 %v2223_v41, %v6021_v9  ;;  %v3980_v31 = vpop.eup %3979  ;;  %v2783_v46 = vmul.f32 %v3978_v63, %v6093_v58 }
 0x312   : > { %3997 = vrcp.f32 %v2586_v54  ;;  %v3392_v18 = vmul.f32 -1.442695, %v2335_v3  ;;  %v2337_v52 = vmul.f32 %v6024_v23, %v6357_v0  ;;  %v2784_v5 = vmul.f32 %v3980_v31, %v6096_v2 }
 0x313   : > { %3999 = vpow2.f32 %v3391_v53  ;;  %v3393_v27 = vmul.f32 -1.442695, %v2336_v10  ;;  %v2338_v42 = vmul.f32 %v6027_v50, %v6362_v44  ;;  %v2858_v25 = vadd.f32 %v6099_v12, %v2783_v46 }
 0x314   : > { %v3982_v11 = vpop.eup %3981  ;;  %4001 = vpow2.f32 %v3392_v18  ;;  %v3394_v40 = vmul.f32 -1.442695, %v2337_v52  ;;  %v2859_v15 = vadd.f32 %v6102_v24, %v2784_v5 }
 0x315   : > { %v3984_v38 = vpop.eup %3983  ;;  %v2785_v45 = vmul.f32 %v3982_v11, %v6093_v58  ;;  %4003 = vpow2.f32 %v3393_v27  ;;  %v3395_v59 = vmul.f32 -1.442695, %v2338_v42  ;;  %v2922_v55 = vmul.f32 %v2858_v25, %v6245_v30 }
 0x316   : > { %v3986_v49 = vpop.eup %3985  ;;  %v2786_v29 = vmul.f32 %v3984_v38, %v6096_v2  ;;  %4005 = vpow2.f32 %v3394_v40  ;;  %v2923_v8 = vmul.f32 %v2859_v15, %v6249_v57 }
 0x317   : > { %v3988_v16 = vpop.eup %3987  ;;  %v2860_v47 = vadd.f32 %v6099_v12, %v2785_v45  ;;  %v2587_v48 = vadd.f32 1.0, %v3986_v49  ;;  %4007 = vpow2.f32 %v3395_v59  ;;  %v2986_v4 = vadd.f32 %v4145_v28, %v2922_v55  ;;  %v4149_v55 = vld [vmem:[%s4620_s18 + $0xe0] sm:$0xff] }
 0x318   : > { %v3990_v21 = vpop.eup %3989  ;;  %v2861_v34 = vadd.f32 %v6102_v24, %v2786_v29  ;;  %v2588_v62 = vadd.f32 1.0, %v3988_v16  ;;  %v2987_v1 = vadd.f32 %v4146_v33, %v2923_v8 }
 0x319   : > { %v3992_v30 = vpop.eup %3991  ;;  %v2924_v7 = vmul.f32 %v2860_v47, %v6255_v37  ;;  %v2787_v57 = vmul.f32 %v3990_v21, %v6093_v58  ;;  %4009 = vrcp.f32 %v2587_v48  ;;  %3050 = vst [vmem:[%s6138_s10 + $0xc0] sm:$0xff] %v2986_v4  ;;  %v4150_v21 = vld [vmem:[%s4620_s18 + $0xe8] sm:$0xff] }
 0x31a   : > { %v3994_v43 = vpop.eup %3993  ;;  %v2925_v51 = vmul.f32 %v2861_v34, %v6261_v22  ;;  %v2788_v36 = vmul.f32 %v3992_v30, %v6096_v2  ;;  %4011 = vrcp.f32 %v2588_v62  ;;  %v2227_v13 = vpop.f32.mrb[40].mxu1  ;;  %3051 = vst [vmem:[%s6138_s10 + $0xc8] sm:$0xff] %v2987_v1  ;;  %v4148_v22 = vld [vmem:[%s4620_s18 + $0xd8] sm:$0xff]  ;;  %v4151_v62 = vld [vmem:[%s4620_s18 + $0xf0] sm:$0xff] }
 0x31b   : > { %v3996_v53 = vpop.eup %3995  ;;  %v2988_v54 = vadd.f32 %v4147_v60, %v2924_v7  ;;  %v2862_v3 = vadd.f32 %v6099_v12, %v2787_v57  ;;  %v2789_v37 = vmul.f32 %v3994_v43, %v6093_v58  ;;  %v6390_v41 = vadd.f32 %v2227_v13, %v6018_v32  ;;  %v2229_v63 = vpop.f32.mrb[41].mxu1 }
 0x31c   : > { %v3998_v10 = vpop.eup %3997  ;;  %v2989_v31 = vadd.f32 %v4148_v22, %v2925_v51  ;;  %v2863_v46 = vadd.f32 %v6102_v24, %v2788_v36  ;;  %v2589_v18 = vadd.f32 1.0, %v3996_v53  ;;  %v6395_v52 = vadd.f32 %v2229_v63, %v6021_v9  ;;  %v2231_v5 = vpop.f32.mrb[42].mxu1  ;;  %v4152_v36 = vld [vmem:[%s4620_s18 + $0xf8] sm:$0xff] }
 0x31d   : > { %v4000_v27 = vpop.eup %3999  ;;  %3052 = vst [vmem:[%s6138_s10 + $0xd0] sm:$0xff] %v2988_v54  ;;  %v2926_v42 = vmul.f32 %v2862_v3, %v6278_v26  ;;  %v2864_v11 = vadd.f32 %v6099_v12, %v2789_v37  ;;  %v2790_v25 = vmul.f32 %v3998_v10, %v6096_v2  ;;  %v2339_v40 = vmul.f32 %v6024_v23, %v6390_v41  ;;  %v2233_v38 = vpop.f32.mrb[43].mxu1 }
 0x31e   : > { %v4002_v15 = vpop.eup %4001  ;;  %3053 = vst [vmem:[%s6138_s10 + $0xd8] sm:$0xff] %v2989_v31  ;;  %v2927_v45 = vmul.f32 %v2863_v46, %v6283_v6  ;;  %4013 = vrcp.f32 %v2589_v18  ;;  %v2590_v59 = vadd.f32 1.0, %v4000_v27  ;;  %v2340_v26 = vmul.f32 %v6027_v50, %v6395_v52 }
 0x31f   : > { %v4004_v49 = vpop.eup %4003  ;;  %v2990_v29 = vadd.f32 %v4149_v55, %v2926_v42  ;;  %v2928_v16 = vmul.f32 %v2864_v11, %v6286_v35  ;;  %v2865_v8 = vadd.f32 %v6102_v24, %v2790_v25  ;;  %v2591_v47 = vadd.f32 1.0, %v4002_v15 }
 0x320   : > { %v4006_v48 = vpop.eup %4005  ;;  %v2991_v28 = vadd.f32 %v4150_v21, %v2927_v45  ;;  %4015 = vrcp.f32 %v2590_v59  ;;  %v2592_v6 = vadd.f32 1.0, %v4004_v49  ;;  %v3396_v4 = vmul.f32 -1.442695, %v2339_v40 }
 0x321   : > { %v4008_v34 = vpop.eup %4007  ;;  %3054 = vst [vmem:[%s6138_s10 + $0xe0] sm:$0xff] %v2990_v29  ;;  %v2992_v30 = vadd.f32 %v4151_v62, %v2928_v16  ;;  %v2929_v33 = vmul.f32 %v2865_v8, %v6300_v20  ;;  %4017 = vrcp.f32 %v2591_v47  ;;  %v2593_v35 = vadd.f32 1.0, %v4006_v48  ;;  %v4153_v8 = vld [vmem:[%s4620_s18 + $0x100] sm:$0xff] }
 0x322   : > { %3055 = vst [vmem:[%s6138_s10 + $0xe8] sm:$0xff] %v2991_v28  ;;  %4019 = vrcp.f32 %v2592_v6  ;;  %v2594_v1 = vadd.f32 1.0, %v4008_v34  ;;  %v3397_v7 = vmul.f32 -1.442695, %v2340_v26  ;;  %v6416_v57 = vadd.f32 %v2231_v5, %v6018_v32  ;;  %v2237_v43 = vpop.f32.mrb[44].mxu1  ;;  %v4154_v28 = vld [vmem:[%s4620_s18 + $0x108] sm:$0xff] }
 0x323   : > { %v4010_v51 = vpop.eup %4009  ;;  %3056 = vst [vmem:[%s6138_s10 + $0xf0] sm:$0xff] %v2992_v30  ;;  %v2993_v13 = vadd.f32 %v4152_v36, %v2929_v33  ;;  %4021 = vrcp.f32 %v2593_v35  ;;  %v6421_v53 = vadd.f32 %v2233_v38, %v6021_v9  ;;  %v6424_v20 = vadd.f32 %v2237_v43, %v6018_v32  ;;  %v2239_v60 = vpop.f32.mrb[45].mxu1 }
 0x324   : > { %v4012_v54 = vpop.eup %4011  ;;  %v2791_v3 = vmul.f32 %v4010_v51, %v6093_v58  ;;  %4023 = vrcp.f32 %v2594_v1  ;;  %v2341_v37 = vmul.f32 %v6024_v23, %v6416_v57  ;;  %v6430_v63 = vadd.f32 %v2239_v60, %v6021_v9  ;;  %v2241_v10 = vpop.f32.mrb[46].mxu1 }
 0x325   : > { %3057 = vst [vmem:[%s6138_s10 + $0xf8] sm:$0xff] %v2993_v13  ;;  %v2792_v22 = vmul.f32 %v4012_v54, %v6096_v2  ;;  %4025 = vpow2.f32 %v3396_v4  ;;  %v2342_v31 = vmul.f32 %v6027_v50, %v6421_v53  ;;  %v2343_v46 = vmul.f32 %v6024_v23, %v6424_v20  ;;  %v2243_v18 = vpop.f32.mrb[47].mxu1 }
 0x326   : > { %v2866_v5 = vadd.f32 %v6099_v12, %v2791_v3  ;;  %4027 = vpow2.f32 %v3397_v7  ;;  %v3398_v27 = vmul.f32 -1.442695, %v2341_v37  ;;  %v2344_v42 = vmul.f32 %v6027_v50, %v6430_v63 }
 0x327   : > { %v2867_v11 = vadd.f32 %v6102_v24, %v2792_v22  ;;  %v3399_v25 = vmul.f32 -1.442695, %v2342_v31  ;;  %v3400_v40 = vmul.f32 -1.442695, %v2343_v46  ;;  %v6443_v38 = vadd.f32 %v2241_v10, %v6018_v32  ;;  %v4155_v31 = vld [vmem:[%s4620_s18 + $0x110] sm:$0xff] }
 0x328   : > { %v4014_v15 = vpop.eup %4013  ;;  %v2930_v45 = vmul.f32 %v2866_v5, %v6313_v19  ;;  %4029 = vpow2.f32 %v3398_v27  ;;  %v3401_v59 = vmul.f32 -1.442695, %v2344_v42  ;;  %v6447_v26 = vadd.f32 %v2243_v18, %v6021_v9 }
 0x329   : > { %v2931_v49 = vmul.f32 %v2867_v11, %v6317_v14  ;;  %v2793_v55 = vmul.f32 %v4014_v15, %v6093_v58  ;;  %4031 = vpow2.f32 %v3399_v25  ;;  %v2345_v29 = vmul.f32 %v6024_v23, %v6443_v38  ;;  %v4156_v15 = vld [vmem:[%s4620_s18 + $0x118] sm:$0xff] }
 0x32a   : > { %v4016_v16 = vpop.eup %4015  ;;  %v2994_v47 = vadd.f32 %v4153_v8, %v2930_v45  ;;  %4033 = vpow2.f32 %v3400_v40  ;;  %v2346_v19 = vmul.f32 %v6027_v50, %v6447_v26  ;;  %v2247_v48 = vpop.f32.mrb[48].mxu1 }
 0x32b   : > { %v4018_v21 = vpop.eup %4017  ;;  %v2995_v6 = vadd.f32 %v4154_v28, %v2931_v49  ;;  %v2868_v14 = vadd.f32 %v6099_v12, %v2793_v55  ;;  %v2794_v4 = vmul.f32 %v4016_v16, %v6096_v2  ;;  %4035 = vpow2.f32 %v3401_v59  ;;  %v2249_v34 = vpop.f32.mrb[49].mxu1 }
 0x32c   : > { %v4020_v62 = vpop.eup %4019  ;;  %3058 = vst [vmem:[%s6138_s10 + $0x100] sm:$0xff] %v2994_v47  ;;  %v2795_v30 = vmul.f32 %v4018_v21, %v6093_v58  ;;  %v3402_v33 = vmul.f32 -1.442695, %v2345_v29  ;;  %v3403_v35 = vmul.f32 -1.442695, %v2346_v19  ;;  %v6462_v1 = vadd.f32 %v2247_v48, %v6018_v32  ;;  %v2251_v7 = vpop.f32.mrb[50].mxu1 }
 0x32d   : > { %v4022_v43 = vpop.eup %4021  ;;  %3059 = vst [vmem:[%s6138_s10 + $0x108] sm:$0xff] %v2995_v6  ;;  %v2932_v51 = vmul.f32 %v2868_v14, %v6334_v39  ;;  %v2869_v36 = vadd.f32 %v6102_v24, %v2794_v4  ;;  %v2796_v13 = vmul.f32 %v4020_v62, %v6096_v2  ;;  %v6469_v60 = vadd.f32 %v2249_v34, %v6021_v9  ;;  %v2253_v54 = vpop.f32.mrb[51].mxu1  ;;  %v4157_v29 = vld [vmem:[%s4620_s18 + $0x120] sm:$0xff]  ;;  %v4158_v48 = vld [vmem:[%s4620_s18 + $0x128] sm:$0xff]  ;;  %v4159_v4 = vld [vmem:[%s4620_s18 + $0x130] sm:$0xff] }
 0x32e   : > { %v4024_v3 = vpop.eup %4023  ;;  %v2870_v37 = vadd.f32 %v6099_v12, %v2795_v30  ;;  %v2797_v10 = vmul.f32 %v4022_v43, %v6093_v58  ;;  %4037 = vpow2.f32 %v3402_v33  ;;  %v2347_v22 = vmul.f32 %v6024_v23, %v6462_v1 }
 0x32f   : > { %v4026_v39 = vpop.eup %4025  ;;  %v2996_v46 = vadd.f32 %v4155_v31, %v2932_v51  ;;  %v2933_v18 = vmul.f32 %v2869_v36, %v6339_v61  ;;  %v2871_v5 = vadd.f32 %v6102_v24, %v2796_v13  ;;  %v2798_v27 = vmul.f32 %v4024_v3, %v6096_v2 }
 0x330   : > { %v4028_v42 = vpop.eup %4027  ;;  %v2934_v11 = vmul.f32 %v2870_v37, %v6348_v56  ;;  %v2872_v25 = vadd.f32 %v6099_v12, %v2797_v10  ;;  %v2595_v40 = vadd.f32 1.0, %v4026_v39  ;;  %4039 = vpow2.f32 %v3403_v35  ;;  %v4160_v35 = vld [vmem:[%s4620_s18 + $0x138] sm:$0xff] }
 0x331   : > { %3060 = vst [vmem:[%s6138_s10 + $0x110] sm:$0xff] %v2996_v46  ;;  %v2997_v45 = vadd.f32 %v4156_v15, %v2933_v18  ;;  %v2935_v59 = vmul.f32 %v2871_v5, %v6352_v17  ;;  %v2873_v61 = vadd.f32 %v6102_v24, %v2798_v27  ;;  %v2596_v49 = vadd.f32 1.0, %v4028_v42 }
 0x332   : > { %v4030_v55 = vpop.eup %4029  ;;  %v2998_v16 = vadd.f32 %v4157_v29, %v2934_v11  ;;  %v2936_v56 = vmul.f32 %v2872_v25, %v6357_v0  ;;  %4041 = vrcp.f32 %v2595_v40  ;;  %v3404_v8 = vmul.f32 -1.442695, %v2347_v22  ;;  %v2257_v47 = vpop.f32.mrb[52].mxu1 }
 0x333   : > { %v4032_v19 = vpop.eup %4031  ;;  %3061 = vst [vmem:[%s6138_s10 + $0x118] sm:$0xff] %v2997_v45  ;;  %v2999_v21 = vadd.f32 %v4158_v48, %v2935_v59  ;;  %v2937_v17 = vmul.f32 %v2873_v61, %v6362_v44  ;;  %4043 = vrcp.f32 %v2596_v49  ;;  %v2597_v28 = vadd.f32 1.0, %v4030_v55  ;;  %v2259_v6 = vpop.f32.mrb[53].mxu1 }
 0x334   : > { %v4034_v14 = vpop.eup %4033  ;;  %3062 = vst [vmem:[%s6138_s10 + $0x120] sm:$0xff] %v2998_v16  ;;  %v3000_v34 = vadd.f32 %v4159_v4, %v2936_v56  ;;  %v2598_v0 = vadd.f32 1.0, %v4032_v19  ;;  %4045 = vpow2.f32 %v3404_v8  ;;  %v2348_v62 = vmul.f32 %v6027_v50, %v6469_v60  ;;  %v2261_v30 = vpop.f32.mrb[54].mxu1 }
 0x335   : > { %v4036_v33 = vpop.eup %4035  ;;  %3063 = vst [vmem:[%s6138_s10 + $0x128] sm:$0xff] %v2999_v21  ;;  %v3001_v43 = vadd.f32 %v4160_v35, %v2937_v17  ;;  %4047 = vrcp.f32 %v2597_v28  ;;  %v2599_v44 = vadd.f32 1.0, %v4034_v14  ;;  %v6497_v51 = vadd.f32 %v2251_v7, %v6018_v32  ;;  %v2263_v36 = vpop.f32.mrb[55].mxu1 }
 0x336   : > { %3064 = vst [vmem:[%s6138_s10 + $0x130] sm:$0xff] %v3000_v34  ;;  %4049 = vrcp.f32 %v2598_v0  ;;  %v2600_v13 = vadd.f32 1.0, %v4036_v33  ;;  %v3405_v3 = vmul.f32 -1.442695, %v2348_v62  ;;  %v6501_v37 = vadd.f32 %v2253_v54, %v6021_v9 }
 0x337   : > { %3065 = vst [vmem:[%s6138_s10 + $0x138] sm:$0xff] %v3001_v43  ;;  %4051 = vrcp.f32 %v2599_v44  ;;  %v2349_v10 = vmul.f32 %v6024_v23, %v6497_v51  ;;  %v6507_v22 = vadd.f32 %v2257_v47, %v6018_v32  ;;  %v6510_v39 = vadd.f32 %v2259_v6, %v6021_v9 }
 0x338   : > { %v4038_v7 = vpop.eup %4037  ;;  %4053 = vrcp.f32 %v2600_v13  ;;  %v2350_v31 = vmul.f32 %v6027_v50, %v6501_v37  ;;  %v6515_v46 = vadd.f32 %v2261_v30, %v6018_v32  ;;  %v6518_v54 = vadd.f32 %v2263_v36, %v6021_v9 }
 0x339   : > { %v2601_v18 = vadd.f32 1.0, %v4038_v7  ;;  %4055 = vpow2.f32 %v3405_v3  ;;  %v3406_v5 = vmul.f32 -1.442695, %v2349_v10  ;;  %v2351_v27 = vmul.f32 %v6024_v23, %v6507_v22 }
 0x33a   : > { %v4040_v42 = vpop.eup %4039  ;;  %v3407_v11 = vmul.f32 -1.442695, %v2350_v31  ;;  %v2352_v25 = vmul.f32 %v6027_v50, %v6510_v39  ;;  %v2353_v40 = vmul.f32 %v6024_v23, %v6515_v46  ;;  %v2354_v15 = vmul.f32 %v6027_v50, %v6518_v54  ;;  %v2267_v45 = vpop.f32.mrb[56].mxu1 }
 0x33b   : > { %4057 = vrcp.f32 %v2601_v18  ;;  %v2602_v59 = vadd.f32 1.0, %v4040_v42  ;;  %v3408_v61 = vmul.f32 -1.442695, %v2351_v27  ;;  %v6529_v49 = vadd.f32 %v2267_v45, %v6018_v32  ;;  %v2269_v55 = vpop.f32.mrb[57].mxu1 }
 0x33c   : > { %v4042_v29 = vpop.eup %4041  ;;  %4059 = vpow2.f32 %v3406_v5  ;;  %v3409_v16 = vmul.f32 -1.442695, %v2352_v25  ;;  %v3410_v56 = vmul.f32 -1.442695, %v2353_v40  ;;  %v6535_v48 = vadd.f32 %v2269_v55, %v6021_v9  ;;  %v2271_v21 = vpop.f32.mrb[58].mxu1 }
 0x33d   : > { %v4044_v8 = vpop.eup %4043  ;;  %v2799_v47 = vmul.f32 %v4042_v29, %v6093_v58  ;;  %4061 = vrcp.f32 %v2602_v59  ;;  %v2355_v19 = vmul.f32 %v6024_v23, %v6529_v49  ;;  %v3411_v6 = vmul.f32 -1.442695, %v2354_v15  ;;  %v6541_v4 = vpop.f32.mrb[59].mxu1 }
 0x33e   : > { %v4046_v17 = vpop.eup %4045  ;;  %v2800_v28 = vmul.f32 %v4044_v8, %v6096_v2  ;;  %4063 = vpow2.f32 %v3407_v11  ;;  %v6539_v14 = vadd.f32 %v2271_v21, %v6018_v32  ;;  %v2356_v44 = vmul.f32 %v6027_v50, %v6535_v48  ;;  %v4161_v11 = vld [vmem:[%s4620_s18 + $0x140] sm:$0xff] }
 0x33f   : > { %v4048_v34 = vpop.eup %4047  ;;  %v2874_v0 = vadd.f32 %v6099_v12, %v2799_v47  ;;  %v2603_v62 = vadd.f32 1.0, %v4046_v17  ;;  %4065 = vpow2.f32 %v3408_v61  ;;  %v3412_v30 = vmul.f32 -1.442695, %v2355_v19 }
 0x340   : > { %v4050_v33 = vpop.eup %4049  ;;  %v2875_v35 = vadd.f32 %v6102_v24, %v2800_v28  ;;  %v2801_v43 = vmul.f32 %v4048_v34, %v6093_v58  ;;  %4067 = vpow2.f32 %v3409_v16  ;;  %v2357_v10 = vmul.f32 %v6024_v23, %v6539_v14 }
 0x341   : > { %v4052_v36 = vpop.eup %4051  ;;  %v2938_v13 = vmul.f32 %v2874_v0, %v6390_v41  ;;  %v2802_v3 = vmul.f32 %v4050_v33, %v6096_v2  ;;  %4069 = vrcp.f32 %v2603_v62  ;;  %v3413_v47 = vmul.f32 -1.442695, %v2356_v44 }
 0x342   : > { %v4054_v7 = vpop.eup %4053  ;;  %v2939_v31 = vmul.f32 %v2875_v35, %v6395_v52  ;;  %v2876_v18 = vadd.f32 %v6099_v12, %v2801_v43  ;;  %v2803_v5 = vmul.f32 %v4052_v36, %v6093_v58  ;;  %4071 = vpow2.f32 %v3410_v56  ;;  %v2277_v27 = vpop.f32.mrb[60].mxu1  ;;  %v4162_v52 = vld [vmem:[%s4620_s18 + $0x148] sm:$0xff]  ;;  %v4165_v35 = vld [vmem:[%s4620_s18 + $0x160] sm:$0xff] }
 0x343   : > { %v4056_v42 = vpop.eup %4055  ;;  %v3002_v41 = vadd.f32 %v4161_v11, %v2938_v13  ;;  %v2877_v25 = vadd.f32 %v6102_v24, %v2802_v3  ;;  %v2804_v40 = vmul.f32 %v4054_v7, %v6096_v2  ;;  %4073 = vpow2.f32 %v3411_v6  ;;  %v6558_v15 = vpop.f32.mrb[61].mxu1  ;;  %v4166_v3 = vld [vmem:[%s4620_s18 + $0x168] sm:$0xff] }
 0x344   : > { %v3003_v45 = vadd.f32 %v4162_v52, %v2939_v31  ;;  %v2940_v59 = vmul.f32 %v2876_v18, %v6416_v57  ;;  %v2878_v61 = vadd.f32 %v6099_v12, %v2803_v5  ;;  %v2604_v55 = vadd.f32 1.0, %v4056_v42  ;;  %v6563_v29 = vpop.f32.mrb[62].mxu1  ;;  %v4163_v57 = vld [vmem:[%s4620_s18 + $0x150] sm:$0xff] }
 0x345   : > { %v4058_v16 = vpop.eup %4057  ;;  %3066 = vst [vmem:[%s6138_s10 + $0x140] sm:$0xff] %v3002_v41  ;;  %v2941_v56 = vmul.f32 %v2877_v25, %v6421_v53  ;;  %v2879_v8 = vadd.f32 %v6102_v24, %v2804_v40  ;;  %4075 = vpow2.f32 %v3412_v30  ;;  %v2283_v19 = vpop.f32.mrb[63].mxu1  ;;  %v4164_v53 = vld [vmem:[%s4620_s18 + $0x158] sm:$0xff]  ;;  %v3414_v36 = vmul.f32 -1.442695, %v2357_v10  ;;  %v4167_v52 = vld [vmem:[%s4620_s18 + $0x170] sm:$0xff] }
 0x346   : > { %v4060_v21 = vpop.eup %4059  ;;  %3067 = vst [vmem:[%s6138_s10 + $0x148] sm:$0xff] %v3003_v45  ;;  %v3004_v17 = vadd.f32 %v4163_v57, %v2940_v59  ;;  %v2942_v28 = vmul.f32 %v2878_v61, %v6424_v20  ;;  %v2805_v6 = vmul.f32 %v4058_v16, %v6093_v58  ;;  %4077 = vrcp.f32 %v2604_v55 }
 0x347   : > { %v4062_v34 = vpop.eup %4061  ;;  %v3005_v0 = vadd.f32 %v4164_v53, %v2941_v56  ;;  %v2943_v62 = vmul.f32 %v2879_v8, %v6430_v63  ;;  %v2605_v30 = vadd.f32 1.0, %v4060_v21  ;;  %4079 = vpow2.f32 %v3413_v47  ;;  %v4168_v8 = vld [vmem:[%s4620_s18 + $0x178] sm:$0xff] }
 0x348   : > { %v4064_v33 = vpop.eup %4063  ;;  %3068 = vst [vmem:[%s6138_s10 + $0x150] sm:$0xff] %v3004_v17  ;;  %v3006_v43 = vadd.f32 %v4165_v35, %v2942_v28  ;;  %v2880_v44 = vadd.f32 %v6099_v12, %v2805_v6  ;;  %v2806_v20 = vmul.f32 %v4062_v34, %v6096_v2  ;;  %v6582_v31 = vadd.f32 %v6541_v4, %v6021_v9 }
 0x349   : > { %v4066_v13 = vpop.eup %4065  ;;  %3069 = vst [vmem:[%s6138_s10 + $0x158] sm:$0xff] %v3005_v0  ;;  %v3007_v7 = vadd.f32 %v4166_v3, %v2943_v62  ;;  %4081 = vrcp.f32 %v2605_v30  ;;  %v2606_v63 = vadd.f32 1.0, %v4064_v33  ;;  %v6591_v4 = vadd.f32 %v2277_v27, %v6018_v32 }
 0x34a   : > { %v4068_v18 = vpop.eup %4067  ;;  %3070 = vst [vmem:[%s6138_s10 + $0x160] sm:$0xff] %v3006_v43  ;;  %v2944_v5 = vmul.f32 %v2880_v44, %v6443_v38  ;;  %v2881_v42 = vadd.f32 %v6102_v24, %v2806_v20  ;;  %v2607_v11 = vadd.f32 1.0, %v4066_v13  ;;  %4083 = vpow2.f32 %v3414_v36 }
 0x34b   : > { %v4070_v10 = vpop.eup %4069  ;;  %3071 = vst [vmem:[%s6138_s10 + $0x168] sm:$0xff] %v3007_v7  ;;  %4085 = vrcp.f32 %v2606_v63  ;;  %v2608_v41 = vadd.f32 1.0, %v4068_v18  ;;  %v2358_v25 = vmul.f32 %v6027_v50, %v6582_v31  ;;  %v2359_v56 = vmul.f32 %v6024_v23, %v6591_v4 }
 0x34c   : > { %v4072_v40 = vpop.eup %4071  ;;  %v3008_v45 = vadd.f32 %v4167_v52, %v2944_v5  ;;  %v2945_v38 = vmul.f32 %v2881_v42, %v6447_v26  ;;  %v2807_v59 = vmul.f32 %v4070_v10, %v6093_v58  ;;  %4087 = vrcp.f32 %v2607_v11  ;;  %v4170_v42 = vld [vmem:[%s4620_s18 + $0x188] sm:$0xff] }
 0x34d   : > { %v4074_v61 = vpop.eup %4073  ;;  %4089 = vrcp.f32 %v2608_v41  ;;  %v2609_v55 = vadd.f32 1.0, %v4072_v40  ;;  %v3415_v16 = vmul.f32 -1.442695, %v2358_v25  ;;  %v6603_v26 = vadd.f32 %v6558_v15, %v6021_v9 }
 0x34e   : > { %3072 = vst [vmem:[%s6138_s10 + $0x170] sm:$0xff] %v3008_v45  ;;  %v3009_v27 = vadd.f32 %v4168_v8, %v2945_v38  ;;  %v2882_v47 = vadd.f32 %v6099_v12, %v2807_v59  ;;  %v2610_v21 = vadd.f32 1.0, %v4074_v61  ;;  %v3416_v17 = vmul.f32 -1.442695, %v2359_v56  ;;  %v4171_v38 = vld [vmem:[%s4620_s18 + $0x190] sm:$0xff] }
 0x34f   : > { %v4076_v57 = vpop.eup %4075  ;;  %4091 = vrcp.f32 %v2609_v55  ;;  %v6607_v28 = vadd.f32 %v6563_v29, %v6018_v32  ;;  %v6610_v6 = vadd.f32 %v2283_v19, %v6021_v9  ;;  %v2360_v15 = vmul.f32 %v6027_v50, %v6603_v26  ;;  %v4169_v29 = vld [vmem:[%s4620_s18 + $0x180] sm:$0xff] }
 0x350   : > { %v4078_v34 = vpop.eup %4077  ;;  %3073 = vst [vmem:[%s6138_s10 + $0x178] sm:$0xff] %v3009_v27  ;;  %v2946_v53 = vmul.f32 %v2882_v47, %v6462_v1  ;;  %4093 = vrcp.f32 %v2610_v21  ;;  %v2611_v0 = vadd.f32 1.0, %v4076_v57  ;;  %v4172_v47 = vld [vmem:[%s4620_s18 + $0x198] sm:$0xff] }
 0x351   : > { %v4080_v62 = vpop.eup %4079  ;;  %v2808_v30 = vmul.f32 %v4078_v34, %v6096_v2  ;;  %4095 = vpow2.f32 %v3415_v16  ;;  %v2361_v32 = vmul.f32 %v6024_v23, %v6607_v28  ;;  %v2362_v9 = vmul.f32 %v6027_v50, %v6610_v6 }
 0x352   : > { %v3010_v19 = vadd.f32 %v4169_v29, %v2946_v53  ;;  %4097 = vrcp.f32 %v2611_v0  ;;  %v2612_v1 = vadd.f32 1.0, %v4080_v62  ;;  %v3417_v33 = vmul.f32 -1.442695, %v2360_v15  ;;  %v4173_v53 = vld [vmem:[%s4620_s18 + $0x1a0] sm:$0xff] }
 0x353   : > { %v4082_v35 = vpop.eup %4081  ;;  %v2883_v43 = vadd.f32 %v6102_v24, %v2808_v30  ;;  %4099 = vpow2.f32 %v3416_v17  ;;  %v3418_v44 = vmul.f32 -1.442695, %v2361_v32  ;;  %v3419_v23 = vmul.f32 -1.442695, %v2362_v9  ;;  %v4174_v30 = vld [vmem:[%s4620_s18 + $0x1a8] sm:$0xff] }
 0x354   : > { %v4084_v20 = vpop.eup %4083  ;;  %3074 = vst [vmem:[%s6138_s10 + $0x180] sm:$0xff] %v3010_v19  ;;  %v2809_v36 = vmul.f32 %v4082_v35, %v6093_v58  ;;  %4101 = vrcp.f32 %v2612_v1 }
 0x355   : > { %v4086_v13 = vpop.eup %4085  ;;  %v2947_v50 = vmul.f32 %v2883_v43, %v6469_v60  ;;  %v2613_v3 = vadd.f32 1.0, %v4084_v20  ;;  %4103 = vpow2.f32 %v3417_v33  ;;  %v4175_v43 = vld [vmem:[%s4620_s18 + $0x1b0] sm:$0xff] }
 0x356   : > { %v4088_v7 = vpop.eup %4087  ;;  %v2884_v63 = vadd.f32 %v6099_v12, %v2809_v36  ;;  %v2810_v18 = vmul.f32 %v4086_v13, %v6096_v2  ;;  %4105 = vpow2.f32 %v3418_v44  ;;  %v4176_v36 = vld [vmem:[%s4620_s18 + $0x1b8] sm:$0xff] }
 0x357   : > { %v4090_v5 = vpop.eup %4089  ;;  %v3011_v11 = vadd.f32 %v4170_v42, %v2947_v50  ;;  %v2811_v10 = vmul.f32 %v4088_v7, %v6093_v58  ;;  %4107 = vrcp.f32 %v2613_v3 }
 0x358   : > { %v2948_v41 = vmul.f32 %v2884_v63, %v6497_v51  ;;  %v2885_v60 = vadd.f32 %v6102_v24, %v2810_v18  ;;  %v2812_v25 = vmul.f32 %v4090_v5, %v6096_v2  ;;  %4109 = vpow2.f32 %v3419_v23  ;;  %v4177_v63 = vld [vmem:[%s4620_s18 + $0x1c0] sm:$0xff] }
 0x359   : > { %v4092_v40 = vpop.eup %4091  ;;  %3075 = vst [vmem:[%s6138_s10 + $0x188] sm:$0xff] %v3011_v11  ;;  %v2886_v52 = vadd.f32 %v6099_v12, %v2811_v10  ;;  %v4178_v11 = vld [vmem:[%s4620_s18 + $0x1c8] sm:$0xff] }
 0x35a   : > { %v4094_v45 = vpop.eup %4093  ;;  %v3012_v59 = vadd.f32 %v4171_v38, %v2948_v41  ;;  %v2949_v61 = vmul.f32 %v2885_v60, %v6501_v37  ;;  %v2887_v55 = vadd.f32 %v6102_v24, %v2812_v25  ;;  %v2813_v51 = vmul.f32 %v4092_v40, %v6093_v58  ;;  %v4179_v25 = vld [vmem:[%s4620_s18 + $0x1d0] sm:$0xff] }
 0x35b   : > { %v4096_v16 = vpop.eup %4095  ;;  %v2950_v56 = vmul.f32 %v2886_v52, %v6507_v22  ;;  %v2814_v8 = vmul.f32 %v4094_v45, %v6096_v2 }
 0x35c   : > { %v4098_v27 = vpop.eup %4097  ;;  %3076 = vst [vmem:[%s6138_s10 + $0x190] sm:$0xff] %v3012_v59  ;;  %v3013_v21 = vadd.f32 %v4172_v47, %v2949_v61  ;;  %v2951_v57 = vmul.f32 %v2887_v55, %v6510_v39  ;;  %v2888_v37 = vadd.f32 %v6099_v12, %v2813_v51  ;;  %v2614_v17 = vadd.f32 1.0, %v4096_v16 }
 0x35d   : > { %v4100_v34 = vpop.eup %4099  ;;  %v3014_v0 = vadd.f32 %v4173_v53, %v2950_v56  ;;  %v2889_v15 = vadd.f32 %v6102_v24, %v2814_v8  ;;  %v2815_v22 = vmul.f32 %v4098_v27, %v6093_v58  ;;  %v4180_v8 = vld [vmem:[%s4620_s18 + $0x1d8] sm:$0xff] }
 0x35e   : > { %v4102_v62 = vpop.eup %4101  ;;  %3077 = vst [vmem:[%s6138_s10 + $0x198] sm:$0xff] %v3013_v21  ;;  %v3015_v32 = vadd.f32 %v4174_v30, %v2951_v57  ;;  %v2952_v39 = vmul.f32 %v2888_v37, %v6515_v46  ;;  %4111 = vrcp.f32 %v2614_v17  ;;  %v2615_v9 = vadd.f32 1.0, %v4100_v34  ;;  %v4181_v37 = vld [vmem:[%s4620_s18 + $0x1e0] sm:$0xff] }
 0x35f   : > { %v4104_v29 = vpop.eup %4103  ;;  %3078 = vst [vmem:[%s6138_s10 + $0x1a0] sm:$0xff] %v3014_v0  ;;  %v2953_v19 = vmul.f32 %v2889_v15, %v6518_v54  ;;  %v2890_v1 = vadd.f32 %v6099_v12, %v2815_v22  ;;  %v2816_v33 = vmul.f32 %v4102_v62, %v6096_v2 }
 0x360   : > { %v4106_v35 = vpop.eup %4105  ;;  %3079 = vst [vmem:[%s6138_s10 + $0x1a8] sm:$0xff] %v3015_v32  ;;  %v3016_v44 = vadd.f32 %v4175_v43, %v2952_v39  ;;  %4113 = vrcp.f32 %v2615_v9  ;;  %v2616_v20 = vadd.f32 1.0, %v4104_v29 }
 0x361   : > { %v4108_v46 = vpop.eup %4107  ;;  %v3017_v23 = vadd.f32 %v4176_v36, %v2953_v19  ;;  %v2954_v54 = vmul.f32 %v2890_v1, %v6529_v49  ;;  %v2891_v13 = vadd.f32 %v6102_v24, %v2816_v33  ;;  %v2617_v50 = vadd.f32 1.0, %v4106_v35 }
 0x362   : > { %v4110_v3 = vpop.eup %4109  ;;  %3080 = vst [vmem:[%s6138_s10 + $0x1b0] sm:$0xff] %v3016_v44  ;;  %v2817_v7 = vmul.f32 %v4108_v46, %v6093_v58  ;;  %4115 = vrcp.f32 %v2616_v20 }
 0x363   : > { %3081 = vst [vmem:[%s6138_s10 + $0x1b8] sm:$0xff] %v3017_v23  ;;  %v3018_v18 = vadd.f32 %v4177_v63, %v2954_v54  ;;  %v2955_v5 = vmul.f32 %v2891_v13, %v6535_v48  ;;  %4117 = vrcp.f32 %v2617_v50  ;;  %v2618_v42 = vadd.f32 1.0, %v4110_v3 }
 0x364   : > { %v2892_v49 = vadd.f32 %v6099_v12, %v2817_v7 }
 0x365   : > { %3082 = vst [vmem:[%s6138_s10 + $0x1c0] sm:$0xff] %v3018_v18  ;;  %v3019_v10 = vadd.f32 %v4178_v11, %v2955_v5  ;;  %4119 = vrcp.f32 %v2618_v42 }
 0x366   : > { %v2956_v41 = vmul.f32 %v2892_v49, %v6539_v14 }
 0x367   : > { %3083 = vst [vmem:[%s6138_s10 + $0x1c8] sm:$0xff] %v3019_v10 }
 0x368   : > { %v4112_v60 = vpop.eup %4111  ;;  %v3020_v40 = vadd.f32 %v4179_v25, %v2956_v41 }
 0x369   : > { %v2818_v52 = vmul.f32 %v4112_v60, %v6096_v2 }
 0x36a   : > { %v4114_v45 = vpop.eup %4113  ;;  %3084 = vst [vmem:[%s6138_s10 + $0x1d0] sm:$0xff] %v3020_v40 }
 0x36b   : > { %v2893_v48 = vadd.f32 %v6102_v24, %v2818_v52  ;;  %v2819_v38 = vmul.f32 %v4114_v45, %v6093_v58 }
 0x36c   : > { %v4116_v59 = vpop.eup %4115 }
 0x36d   : > { %v4118_v61 = vpop.eup %4117  ;;  %v2957_v55 = vmul.f32 %v2893_v48, %v6582_v31  ;;  %v2894_v14 = vadd.f32 %v6099_v12, %v2819_v38  ;;  %v2820_v51 = vmul.f32 %v4116_v59, %v6096_v2 }
 0x36e   : > { %v2821_v16 = vmul.f32 %v4118_v61, %v6093_v58 }
 0x36f   : > { %v4120_v56 = vpop.eup %4119  ;;  %v3021_v27 = vadd.f32 %v4180_v8, %v2957_v55  ;;  %v2958_v47 = vmul.f32 %v2894_v14, %v6591_v4  ;;  %v2895_v21 = vadd.f32 %v6102_v24, %v2820_v51 }
 0x370   : > { %v2896_v31 = vadd.f32 %v6099_v12, %v2821_v16  ;;  %v2822_v57 = vmul.f32 %v4120_v56, %v6096_v2  ;;  %v4182_v12 = vld [vmem:[%s4620_s18 + $0x1e8] sm:$0xff]  ;;  %v4183_v2 = vld [vmem:[%s4620_s18 + $0x1f0] sm:$0xff] }
 0x371   : > { %3085 = vst [vmem:[%s6138_s10 + $0x1d8] sm:$0xff] %v3021_v27  ;;  %v3022_v17 = vadd.f32 %v4181_v37, %v2958_v47  ;;  %v2959_v58 = vmul.f32 %v2895_v21, %v6603_v26 }
 0x372   : > { %v2960_v34 = vmul.f32 %v2896_v31, %v6607_v28  ;;  %v2897_v53 = vadd.f32 %v6102_v24, %v2822_v57  ;;  %v4184_v24 = vld [vmem:[%s4620_s18 + $0x1f8] sm:$0xff] }
 0x373   : > { %3086 = vst [vmem:[%s6138_s10 + $0x1e0] sm:$0xff] %v3022_v17  ;;  %v3023_v4 = vadd.f32 %v4182_v12, %v2959_v58 }
 0x374   : > { %v3024_v0 = vadd.f32 %v4183_v2, %v2960_v34  ;;  %v2961_v15 = vmul.f32 %v2897_v53, %v6610_v6 }
 0x375   : > { %3087 = vst [vmem:[%s6138_s10 + $0x1e8] sm:$0xff] %v3023_v4 }
 0x376   : > { %3088 = vst [vmem:[%s6138_s10 + $0x1f0] sm:$0xff] %v3024_v0  ;;  %v3025_v26 = vadd.f32 %v4184_v24, %v2961_v15 }
 0x378   : > { %3089 = vst [vmem:[%s6138_s10 + $0x1f8] sm:$0xff] %v3025_v26 }
 0x379   : > { %4299 = shalt.err (!%p4296_p0)
}
 0x37a   : > { %s4300_s18 = scalar_lea.hbm %s6699_s12, 8192  ;;  %s4304_s10 = scalar_lea.hbm %s6834_s26, 16384 }
 0x37b   : > { %p4301_p2 = scmp.ne.s32.totalorder %s6699_s12, %s4300_s18  ;;  %p4305_p8 = scmp.lt.u32.totalorder %s6699_s12, %s6834_s26 }
 0x37c   : > { %p4306_p11 = scmp.lt.u32.totalorder %s4304_s10, %s4300_s18  ;;  %p4308_p12 = scmp.lt.u32.totalorder %s4300_s18, %s6699_s12 }
 0x37d   : > { %p4302_p4 = pnand %p4301_p2, %p6835_p1 }
 0x37e   : > { %p4307_p7 = por %p4306_p11, %p4305_p8 }
 0x37f   : > { %p4303_p3 = pneg %p4302_p4 }
 0x380   : > { %p4309_p6 = por %p4308_p12, %p4307_p7 }
 0x382   : > { %p4310_p10 = pnand %p4309_p6, %p4303_p3 }
 0x384   : > { %4313 = shalt.err (!%p4310_p10)
}
 0x385   : > { %s4371_s23 = smov 256   ;;  %s4372_s30 = smov 16  }
 0x386   : > { %3444 = dma.vmem_to_hbm [thread:$0]  (%p6835_p1), %s6701_s13, 8192, %s6699_s12, %s3091_s17, %s4371_s23, %s4371_s23, %s4372_s30  }
 0x387 PF: > { %s6836_s25 = sld [smem:[#allocation15_spill]]  ;;  %s6837_s19 = sld [smem:[#allocation16_spill]] }
 0x388   : > { %p6839_p9 = scmp.ge.s32.totalorder %s4360_s16, 2 }
 0x38d   : > { %s3120_s21 = sand.u32 1, %s6836_s25   ;;  %p6838_p5 = scmp.ne.s32.totalorder %s6837_s19, 0 }
 0x38e   : > { %s3121_s18 = scalar_lea.sflag [#allocation4], %s3120_s21 }
 0x38f   : > { %p3461_p13 = pnand %p6839_p9, %p6838_p5 }
 0x391   : > { %4343 = dma.done.wait (!%p3461_p13), %s3121_s18, 8192  }
 0x392   : > { %4345 = vsyncadd (!%p3461_p13), %s3121_s18, 4294959104  ;;  %p25_p0 = scmp.ge.s32.totalorder %s4552_s20, 4   ;;  %s6840_s13 = smov %s4352_s14 }
 0x393   : > { %s6841_s14 = smov %s4356_s15  ;;  %s6842_s15 = smov %s4562_s24 }
 0x394   : > { %s6843_s16 = smov %s4552_s20  ;;  %27 = sbr.rel (!%p25_p0) target bundleno = 10 (0xa), region = 118 }
 0x39b   :  { %3126 = vsyncpa [#allocation3], 1 }
 0x39c   :  { %3128 = vsyncpa [#allocation3 + $0x1], 1 }
 0x39d   :  { %3129 = vsyncpa [#allocation7], 1 }
 0x39e   :  { %3130 = vsyncpa [#allocation4], 1 }
 0x39f   :  { %3132 = vsyncpa [#allocation4 + $0x1], 1 }
 0x3a0   :  { %3133 = vsyncpa [#allocation5], 1 }
 0x3a1   :  { %3135 = vsyncpa [#allocation5 + $0x1], 1 }

</bundles_post_ra>
